<compile_context>
chip_gen: v7x
topology: tpu7x:2x2x1
jax: 0.10.0
libtpu: 0.0.40
codegen_flags: <defaults>
</compile_context>

<pallas_src>
import functools

import jax
import jax.numpy as jnp
import numpy as np
from jax.experimental import pallas as pl
from jax.experimental.pallas import tpu as pltpu


# --------------------------------------------------------------------------
# Fused per-sample kernel.
# --------------------------------------------------------------------------
def _tv_block_kernel(H, W, C_in, planes, reduction,
                     xp_ref, w1_ref, w2_ref, fc1w_ref, fc1b_ref,
                     fc2w_ref, fc2b_ref, a_ref, out_ref, pad2_ref):
    K = 3
    Ho, Wo = H, W                       # stride=1, padding=1
    P = Ho * Wo
    a = a_ref[...]                      # (1, 1) PReLU slope, broadcast in use

    # ---- conv1: im2col (P, 9*C_in) @ (9*C_in, planes) on the MXU ------------
    cols = []
    for kh in range(K):
        for kw in range(K):
            cols.append(xp_ref[0, kh:kh + Ho, kw:kw + Wo, :])
    im2col1 = jnp.concatenate(cols, axis=-1).reshape(P, K * K * C_in)
    x1 = jnp.dot(im2col1, w1_ref[...], preferred_element_type=jnp.float32)  # (P, planes)

    # shared PReLU
    act1 = jnp.where(x1 > 0, x1, a * x1)

    # ---- zero-pad act1 into VMEM scratch for conv2 --------------------------
    # Only the 1-pixel border is zeroed, and it is refreshed every grid step so
    # the batch axis can stay "parallel" (each core sees a valid scratch).
    zr = jnp.zeros((1, Wo + 2, planes), jnp.float32)
    zc = jnp.zeros((Ho + 2, 1, planes), jnp.float32)
    pad2_ref[0:1, :, :] = zr
    pad2_ref[Ho + 1:Ho + 2, :, :] = zr
    pad2_ref[:, 0:1, :] = zc
    pad2_ref[:, Wo + 1:Wo + 2, :] = zc
    pad2_ref[1:Ho + 1, 1:Wo + 1, :] = act1.reshape(Ho, Wo, planes)

    # ---- conv2: im2col (P, 9*planes) @ (9*planes, planes) on the MXU --------
    cols2 = []
    for kh in range(K):
        for kw in range(K):
            cols2.append(pad2_ref[kh:kh + Ho, kw:kw + Wo, :])
    im2col2 = jnp.concatenate(cols2, axis=-1).reshape(P, K * K * planes)
    y2 = jnp.dot(im2col2, w2_ref[...], preferred_element_type=jnp.float32)  # (P, planes)

    # ---- SE_TVLayer: TV statistics -> 2-layer MLP gate -> channel scaling ---
    y2_3d = y2.reshape(Ho, Wo, planes)
    f = y2_3d[:Ho - 1, :Wo - 1, :]
    g = y2_3d[:Ho - 1, 1:, :]
    h = y2_3d[1:, :Wo - 1, :]
    tv = (f - g) ** 2 + (f - h) ** 2
    tv_mean = (jnp.sum(tv, axis=(0, 1), keepdims=True).reshape(1, planes)
               * (1.0 / float((Ho - 1) * (Wo - 1))))
    s = jnp.maximum(
        jnp.dot(tv_mean, fc1w_ref[...], preferred_element_type=jnp.float32)
        + fc1b_ref[...], 0.0)                                          # (1, reduction)
    gate = jax.nn.sigmoid(
        jnp.dot(s, fc2w_ref[...], preferred_element_type=jnp.float32)
        + fc2b_ref[...])                                               # (1, planes)

    # SE scaling + residual (residual is the conv1 output) + final PReLU
    res = y2 * gate + x1
    res = jnp.where(res > 0, res, a * res)

    # lane-dense, NCHW-ordered store: (planes, Ho*Wo) with 256 on the lane axis
    out_ref[0] = jnp.transpose(res, (1, 0))


# --------------------------------------------------------------------------
# Wrapper: NCHW in / NCHW out, weight folding, pallas_call plumbing.
# --------------------------------------------------------------------------
def tv_basic_block_forward(x_nchw, params, *, stride=1):
    # TODO(synk): stride > 1 (strided im2col) is not implemented; module default is stride=1.
    # TODO(synk): with_norm=True (BatchNorm2d branches) is not implemented; module default is False.
    assert stride == 1, "only stride=1 is implemented"
    N, C_in, H, W = x_nchw.shape
    planes = params["w1"].shape[0]
    reduction = params["fc1_w"].shape[1]
    K, pad = 3, 1
    Hp, Wp = H + 2 * pad, W + 2 * pad
    Ho, Wo = H, W
    P = Ho * Wo

    # NCHW -> NHWC, pre-pad once (no per-step zero-fill inside the kernel)
    x_nhwc = jnp.transpose(x_nchw, (0, 2, 3, 1)).astype(jnp.float32)
    xpad = jnp.pad(x_nhwc, ((0, 0), (pad, pad), (pad, pad), (0, 0)))

    # fold PyTorch-layout conv weights (O, C, kh, kw) into im2col form
    # column order is (kh, kw, c) to match the in-kernel concatenation order.
    w1col = jnp.transpose(params["w1"], (2, 3, 1, 0)).reshape(K * K * C_in, planes)
    w2col = jnp.transpose(params["w2"], (2, 3, 1, 0)).reshape(K * K * planes, planes)
    a2d = params["prelu_a"].reshape(1, 1).astype(jnp.float32)

    kernel = functools.partial(_tv_block_kernel, H, W, C_in, planes, reduction)
    out_cp = pl.pallas_call(
        kernel,
        out_shape=jax.ShapeDtypeStruct((N, planes, P), jnp.float32),
        grid=(N,),
        in_specs=[
            pl.BlockSpec((1, Hp, Wp, C_in), lambda n: (n, 0, 0, 0)),
            pl.BlockSpec((K * K * C_in, planes), lambda n: (0, 0)),
            pl.BlockSpec((K * K * planes, planes), lambda n: (0, 0)),
            pl.BlockSpec((planes, reduction), lambda n: (0, 0)),
            pl.BlockSpec((1, reduction), lambda n: (0, 0)),
            pl.BlockSpec((reduction, planes), lambda n: (0, 0)),
            pl.BlockSpec((1, planes), lambda n: (0, 0)),
            pl.BlockSpec((1, 1), lambda n: (0, 0)),
        ],
        out_specs=pl.BlockSpec((1, planes, P), lambda n: (n, 0, 0)),
        scratch_shapes=[pltpu.VMEM((Ho + 2, Wo + 2, planes), jnp.float32)],
        compiler_params=pltpu.CompilerParams(
            dimension_semantics=("parallel",)),   # fully per-sample -> megacore OK
    )(xpad, w1col, w2col, params["fc1_w"], params["fc1_b"],
      params["fc2_w"], params["fc2_b"], a2d)

    # already channel-major; only a free reshape to NCHW
    return out_cp.reshape(N, planes, Ho, Wo)


# --------------------------------------------------------------------------
# Deterministic parameter init (shapes follow the nn.Module __init__).
# --------------------------------------------------------------------------
def init_params(key, C_in, planes, reduction):
    ks = jax.random.split(key, 6)
    return {
        "w1": 0.2 * jax.random.normal(ks[0], (planes, C_in, 3, 3), jnp.float32),
        "w2": 0.2 * jax.random.normal(ks[1], (planes, planes, 3, 3), jnp.float32),
        # Linear weights stored "right-multiply" style: y = x @ W + b
        "fc1_w": 0.2 * jax.random.normal(ks[2], (planes, reduction), jnp.float32),
        "fc1_b": 0.1 * jax.random.normal(ks[3], (1, reduction), jnp.float32),
        "fc2_w": 0.2 * jax.random.normal(ks[4], (reduction, planes), jnp.float32),
        "fc2_b": 0.1 * jax.random.normal(ks[5], (1, planes), jnp.float32),
        "prelu_a": jnp.full((1,), 0.25, jnp.float32),   # nn.PReLU() default init
    }


# --------------------------------------------------------------------------
# Pure-JAX reference (no Pallas) for a correctness smoke test.
# --------------------------------------------------------------------------
def ref_forward(x_nchw, params):
    hp = jax.lax.Precision.HIGHEST
    a = params["prelu_a"][0]
    prelu = lambda t: jnp.where(t > 0, t, a * t)

    def conv3x3(z, w):  # z (N,C,H,W), w (O,C,3,3), stride=1, pad=1, no bias
        N, C, H, W = z.shape
        zp = jnp.pad(z, ((0, 0), (0, 0), (1, 1), (1, 1)))
        out = jnp.zeros((N, w.shape[0], H, W), jnp.float32)
        for kh in range(3):
            for kw in range(3):
                out = out + jnp.einsum("nchw,oc->nohw",
                                       zp[:, :, kh:kh + H, kw:kw + W],
                                       w[:, :, kh, kw], precision=hp)
        return out

    x1 = conv3x3(x_nchw.astype(jnp.float32), params["w1"])
    out = prelu(x1)
    out = conv3x3(out, params["w2"])
    # SE_TVLayer
    f = out[:, :, :-1, :-1]
    g = out[:, :, :-1, 1:]
    h = out[:, :, 1:, :-1]
    tv = (f - g) ** 2 + (f - h) ** 2
    y = jnp.mean(tv, axis=(2, 3))                                   # (N, C)
    y = jnp.maximum(jnp.dot(y, params["fc1_w"], precision=hp) + params["fc1_b"], 0.0)
    y = jax.nn.sigmoid(jnp.dot(y, params["fc2_w"], precision=hp) + params["fc2_b"])
    out = out * y[:, :, None, None]
    out = out + x1
    return prelu(out)


if __name__ == "__main__":
    N, C_in, planes, H, W = 2, 4, 8, 16, 16
    reduction = 16

    key = jax.random.PRNGKey(0)
    kx, kp = jax.random.split(key)
    x = jax.random.normal(kx, (N, C_in, H, W), jnp.float32)
    params = init_params(kp, C_in, planes, reduction)

    fwd = jax.jit(functools.partial(tv_basic_block_forward, stride=1))
    out = jax.block_until_ready(fwd(x, params))
    assert out.shape == (N, planes, H, W)

    ref = ref_forward(x, params)
    np.testing.assert_allclose(np.asarray(out), np.asarray(ref),
                               rtol=2e-3, atol=2e-3)
    print("KERNEL_OK")
</pallas_src>

<mosaic_0001>
module attributes {stable_mosaic.version = 11 : i64} {
  func.func @_tv_block_kernel(%arg0: i32, %arg1: memref<1x18x18x4xf32, #tpu.memory_space<vmem>>, %arg2: memref<36x8xf32, #tpu.memory_space<vmem>>, %arg3: memref<72x8xf32, #tpu.memory_space<vmem>>, %arg4: memref<8x16xf32, #tpu.memory_space<vmem>>, %arg5: memref<1x16xf32, #tpu.memory_space<vmem>>, %arg6: memref<16x8xf32, #tpu.memory_space<vmem>>, %arg7: memref<1x8xf32, #tpu.memory_space<vmem>>, %arg8: memref<1x1xf32, #tpu.memory_space<vmem>>, %arg9: memref<1x8x256xf32, #tpu.memory_space<vmem>>, %arg10: memref<18x18x8xf32, #tpu.memory_space<vmem>>) attributes {dimension_semantics = [#tpu.dimension_semantics<parallel>], iteration_bounds = array<i64: 2>, scalar_prefetch = 0 : i64, scratch_operands = 1 : i64, tpu.core_type = #tpu.core_type<tc>, window_params = [{transform_indices = @transform_0, window_bounds = array<i64: 1, 18, 18, 4>}, {pipeline_mode = #tpu.pipeline_mode<synchronous>, transform_indices = @transform_1, window_bounds = array<i64: 36, 8>}, {pipeline_mode = #tpu.pipeline_mode<synchronous>, transform_indices = @transform_2, window_bounds = array<i64: 72, 8>}, {pipeline_mode = #tpu.pipeline_mode<synchronous>, transform_indices = @transform_3, window_bounds = array<i64: 8, 16>}, {pipeline_mode = #tpu.pipeline_mode<synchronous>, transform_indices = @transform_4, window_bounds = array<i64: 1, 16>}, {pipeline_mode = #tpu.pipeline_mode<synchronous>, transform_indices = @transform_5, window_bounds = array<i64: 16, 8>}, {pipeline_mode = #tpu.pipeline_mode<synchronous>, transform_indices = @transform_6, window_bounds = array<i64: 1, 8>}, {pipeline_mode = #tpu.pipeline_mode<synchronous>, transform_indices = @transform_7, window_bounds = array<i64: 1, 1>}, {transform_indices = @transform_8, window_bounds = array<i64: 1, 8, 256>}]} {
    %c0 = arith.constant 0 : index
    %c0_0 = arith.constant 0 : index
    %0 = vector.load %arg8[%c0, %c0_0] : memref<1x1xf32, #tpu.memory_space<vmem>>, vector<1x1xf32>
    %c0_1 = arith.constant 0 : index
    %c0_2 = arith.constant 0 : index
    %c0_3 = arith.constant 0 : index
    %c0_4 = arith.constant 0 : index
    %1 = vector.load %arg1[%c0_1, %c0_2, %c0_3, %c0_4] : memref<1x18x18x4xf32, #tpu.memory_space<vmem>>, vector<1x16x16x4xf32>
    %2 = vector.shape_cast %1 : vector<1x16x16x4xf32> to vector<16x16x4xf32>
    %c0_5 = arith.constant 0 : index
    %c0_6 = arith.constant 0 : index
    %c1 = arith.constant 1 : index
    %c0_7 = arith.constant 0 : index
    %3 = vector.load %arg1[%c0_5, %c0_6, %c1, %c0_7] : memref<1x18x18x4xf32, #tpu.memory_space<vmem>>, vector<1x16x16x4xf32>
    %4 = vector.shape_cast %3 : vector<1x16x16x4xf32> to vector<16x16x4xf32>
    %c0_8 = arith.constant 0 : index
    %c0_9 = arith.constant 0 : index
    %c2 = arith.constant 2 : index
    %c0_10 = arith.constant 0 : index
    %5 = vector.load %arg1[%c0_8, %c0_9, %c2, %c0_10] : memref<1x18x18x4xf32, #tpu.memory_space<vmem>>, vector<1x16x16x4xf32>
    %6 = vector.shape_cast %5 : vector<1x16x16x4xf32> to vector<16x16x4xf32>
    %c0_11 = arith.constant 0 : index
    %c1_12 = arith.constant 1 : index
    %c0_13 = arith.constant 0 : index
    %c0_14 = arith.constant 0 : index
    %7 = vector.load %arg1[%c0_11, %c1_12, %c0_13, %c0_14] : memref<1x18x18x4xf32, #tpu.memory_space<vmem>>, vector<1x16x16x4xf32>
    %8 = vector.shape_cast %7 : vector<1x16x16x4xf32> to vector<16x16x4xf32>
    %c0_15 = arith.constant 0 : index
    %c1_16 = arith.constant 1 : index
    %c1_17 = arith.constant 1 : index
    %c0_18 = arith.constant 0 : index
    %9 = vector.load %arg1[%c0_15, %c1_16, %c1_17, %c0_18] : memref<1x18x18x4xf32, #tpu.memory_space<vmem>>, vector<1x16x16x4xf32>
    %10 = vector.shape_cast %9 : vector<1x16x16x4xf32> to vector<16x16x4xf32>
    %c0_19 = arith.constant 0 : index
    %c1_20 = arith.constant 1 : index
    %c2_21 = arith.constant 2 : index
    %c0_22 = arith.constant 0 : index
    %11 = vector.load %arg1[%c0_19, %c1_20, %c2_21, %c0_22] : memref<1x18x18x4xf32, #tpu.memory_space<vmem>>, vector<1x16x16x4xf32>
    %12 = vector.shape_cast %11 : vector<1x16x16x4xf32> to vector<16x16x4xf32>
    %c0_23 = arith.constant 0 : index
    %c2_24 = arith.constant 2 : index
    %c0_25 = arith.constant 0 : index
    %c0_26 = arith.constant 0 : index
    %13 = vector.load %arg1[%c0_23, %c2_24, %c0_25, %c0_26] : memref<1x18x18x4xf32, #tpu.memory_space<vmem>>, vector<1x16x16x4xf32>
    %14 = vector.shape_cast %13 : vector<1x16x16x4xf32> to vector<16x16x4xf32>
    %c0_27 = arith.constant 0 : index
    %c2_28 = arith.constant 2 : index
    %c1_29 = arith.constant 1 : index
    %c0_30 = arith.constant 0 : index
    %15 = vector.load %arg1[%c0_27, %c2_28, %c1_29, %c0_30] : memref<1x18x18x4xf32, #tpu.memory_space<vmem>>, vector<1x16x16x4xf32>
    %16 = vector.shape_cast %15 : vector<1x16x16x4xf32> to vector<16x16x4xf32>
    %c0_31 = arith.constant 0 : index
    %c2_32 = arith.constant 2 : index
    %c2_33 = arith.constant 2 : index
    %c0_34 = arith.constant 0 : index
    %17 = vector.load %arg1[%c0_31, %c2_32, %c2_33, %c0_34] : memref<1x18x18x4xf32, #tpu.memory_space<vmem>>, vector<1x16x16x4xf32>
    %18 = vector.shape_cast %17 : vector<1x16x16x4xf32> to vector<16x16x4xf32>
    %19 = tpu.concatenate %2, %4, %6, %8, %10, %12, %14, %16, %18 in 2 : vector<16x16x4xf32>, vector<16x16x4xf32>, vector<16x16x4xf32>, vector<16x16x4xf32>, vector<16x16x4xf32>, vector<16x16x4xf32>, vector<16x16x4xf32>, vector<16x16x4xf32>, vector<16x16x4xf32> -> vector<16x16x36xf32>
    %20 = vector.shape_cast %19 : vector<16x16x36xf32> to vector<256x36xf32>
    %c0_35 = arith.constant 0 : index
    %c0_36 = arith.constant 0 : index
    %21 = vector.load %arg2[%c0_35, %c0_36] : memref<36x8xf32, #tpu.memory_space<vmem>>, vector<36x8xf32>
    %cst = arith.constant dense<0.000000e+00> : vector<256x8xf32>
    %22 = tpu.matmul %20, %21, %cst {dimension_numbers = #tpu.dot_dimension_numbers<[1], [0], [0], [1], [0, 0, 1, 1], [], []>} : vector<256x36xf32>, vector<36x8xf32>, vector<256x8xf32> -> vector<256x8xf32>
    %cst_37 = arith.constant 0.000000e+00 : f32
    %23 = vector.broadcast %cst_37 : f32 to vector<256x8xf32>
    %24 = arith.cmpf ogt, %22, %23 : vector<256x8xf32>
    %25 = vector.broadcast %0 : vector<1x1xf32> to vector<256x8xf32>
    %26 = arith.mulf %25, %22 : vector<256x8xf32>
    %27 = arith.select %24, %22, %26 : vector<256x8xi1>, vector<256x8xf32>
    %cst_38 = arith.constant 0.000000e+00 : f32
    %28 = vector.broadcast %cst_38 : f32 to vector<1x18x8xf32>
    %cst_39 = arith.constant 0.000000e+00 : f32
    %29 = vector.broadcast %cst_39 : f32 to vector<18x1x8xf32>
    %c0_40 = arith.constant 0 : index
    %c0_41 = arith.constant 0 : index
    %c0_42 = arith.constant 0 : index
    %30 = vector.load %arg10[%c0_40, %c0_41, %c0_42] : memref<18x18x8xf32, #tpu.memory_space<vmem>>, vector<1x18x8xf32>
    tpu.vector_store %arg10[%c0_40, %c0_41, %c0_42], %28 {strides = array<i32>} : memref<18x18x8xf32, #tpu.memory_space<vmem>>, vector<1x18x8xf32>,
    %c17 = arith.constant 17 : index
    %c0_43 = arith.constant 0 : index
    %c0_44 = arith.constant 0 : index
    %31 = vector.load %arg10[%c17, %c0_43, %c0_44] : memref<18x18x8xf32, #tpu.memory_space<vmem>>, vector<1x18x8xf32>
    tpu.vector_store %arg10[%c17, %c0_43, %c0_44], %28 {strides = array<i32>} : memref<18x18x8xf32, #tpu.memory_space<vmem>>, vector<1x18x8xf32>,
    %c0_45 = arith.constant 0 : index
    %c0_46 = arith.constant 0 : index
    %c0_47 = arith.constant 0 : index
    %32 = vector.load %arg10[%c0_45, %c0_46, %c0_47] : memref<18x18x8xf32, #tpu.memory_space<vmem>>, vector<18x1x8xf32>
    tpu.vector_store %arg10[%c0_45, %c0_46, %c0_47], %29 {strides = array<i32>} : memref<18x18x8xf32, #tpu.memory_space<vmem>>, vector<18x1x8xf32>,
    %c0_48 = arith.constant 0 : index
    %c17_49 = arith.constant 17 : index
    %c0_50 = arith.constant 0 : index
    %33 = vector.load %arg10[%c0_48, %c17_49, %c0_50] : memref<18x18x8xf32, #tpu.memory_space<vmem>>, vector<18x1x8xf32>
    tpu.vector_store %arg10[%c0_48, %c17_49, %c0_50], %29 {strides = array<i32>} : memref<18x18x8xf32, #tpu.memory_space<vmem>>, vector<18x1x8xf32>,
    %34 = vector.shape_cast %27 : vector<256x8xf32> to vector<16x16x8xf32>
    %c1_51 = arith.constant 1 : index
    %c1_52 = arith.constant 1 : index
    %c0_53 = arith.constant 0 : index
    %35 = vector.load %arg10[%c1_51, %c1_52, %c0_53] : memref<18x18x8xf32, #tpu.memory_space<vmem>>, vector<16x16x8xf32>
    tpu.vector_store %arg10[%c1_51, %c1_52, %c0_53], %34 {strides = array<i32>} : memref<18x18x8xf32, #tpu.memory_space<vmem>>, vector<16x16x8xf32>,
    %c0_54 = arith.constant 0 : index
    %c0_55 = arith.constant 0 : index
    %c0_56 = arith.constant 0 : index
    %36 = vector.load %arg10[%c0_54, %c0_55, %c0_56] : memref<18x18x8xf32, #tpu.memory_space<vmem>>, vector<16x16x8xf32>
    %c0_57 = arith.constant 0 : index
    %c1_58 = arith.constant 1 : index
    %c0_59 = arith.constant 0 : index
    %37 = vector.load %arg10[%c0_57, %c1_58, %c0_59] : memref<18x18x8xf32, #tpu.memory_space<vmem>>, vector<16x16x8xf32>
    %c0_60 = arith.constant 0 : index
    %c2_61 = arith.constant 2 : index
    %c0_62 = arith.constant 0 : index
    %38 = vector.load %arg10[%c0_60, %c2_61, %c0_62] : memref<18x18x8xf32, #tpu.memory_space<vmem>>, vector<16x16x8xf32>
    %c1_63 = arith.constant 1 : index
    %c0_64 = arith.constant 0 : index
    %c0_65 = arith.constant 0 : index
    %39 = vector.load %arg10[%c1_63, %c0_64, %c0_65] : memref<18x18x8xf32, #tpu.memory_space<vmem>>, vector<16x16x8xf32>
    %c1_66 = arith.constant 1 : index
    %c1_67 = arith.constant 1 : index
    %c0_68 = arith.constant 0 : index
    %40 = vector.load %arg10[%c1_66, %c1_67, %c0_68] : memref<18x18x8xf32, #tpu.memory_space<vmem>>, vector<16x16x8xf32>
    %c1_69 = arith.constant 1 : index
    %c2_70 = arith.constant 2 : index
    %c0_71 = arith.constant 0 : index
    %41 = vector.load %arg10[%c1_69, %c2_70, %c0_71] : memref<18x18x8xf32, #tpu.memory_space<vmem>>, vector<16x16x8xf32>
    %c2_72 = arith.constant 2 : index
    %c0_73 = arith.constant 0 : index
    %c0_74 = arith.constant 0 : index
    %42 = vector.load %arg10[%c2_72, %c0_73, %c0_74] : memref<18x18x8xf32, #tpu.memory_space<vmem>>, vector<16x16x8xf32>
    %c2_75 = arith.constant 2 : index
    %c1_76 = arith.constant 1 : index
    %c0_77 = arith.constant 0 : index
    %43 = vector.load %arg10[%c2_75, %c1_76, %c0_77] : memref<18x18x8xf32, #tpu.memory_space<vmem>>, vector<16x16x8xf32>
    %c2_78 = arith.constant 2 : index
    %c2_79 = arith.constant 2 : index
    %c0_80 = arith.constant 0 : index
    %44 = vector.load %arg10[%c2_78, %c2_79, %c0_80] : memref<18x18x8xf32, #tpu.memory_space<vmem>>, vector<16x16x8xf32>
    %45 = tpu.concatenate %36, %37, %38, %39, %40, %41, %42, %43, %44 in 2 : vector<16x16x8xf32>, vector<16x16x8xf32>, vector<16x16x8xf32>, vector<16x16x8xf32>, vector<16x16x8xf32>, vector<16x16x8xf32>, vector<16x16x8xf32>, vector<16x16x8xf32>, vector<16x16x8xf32> -> vector<16x16x72xf32>
    %46 = vector.shape_cast %45 : vector<16x16x72xf32> to vector<256x72xf32>
    %c0_81 = arith.constant 0 : index
    %c0_82 = arith.constant 0 : index
    %47 = vector.load %arg3[%c0_81, %c0_82] : memref<72x8xf32, #tpu.memory_space<vmem>>, vector<72x8xf32>
    %cst_83 = arith.constant dense<0.000000e+00> : vector<256x8xf32>
    %48 = tpu.matmul %46, %47, %cst_83 {dimension_numbers = #tpu.dot_dimension_numbers<[1], [0], [0], [1], [0, 0, 1, 1], [], []>} : vector<256x72xf32>, vector<72x8xf32>, vector<256x8xf32> -> vector<256x8xf32>
    %49 = vector.shape_cast %48 : vector<256x8xf32> to vector<16x16x8xf32>
    %50 = vector.extract_strided_slice %49 {offsets = [0, 0, 0], sizes = [15, 15, 8], strides = [1, 1, 1]} : vector<16x16x8xf32> to vector<15x15x8xf32>
    %51 = vector.extract_strided_slice %49 {offsets = [0, 1, 0], sizes = [15, 15, 8], strides = [1, 1, 1]} : vector<16x16x8xf32> to vector<15x15x8xf32>
    %52 = vector.extract_strided_slice %49 {offsets = [1, 0, 0], sizes = [15, 15, 8], strides = [1, 1, 1]} : vector<16x16x8xf32> to vector<15x15x8xf32>
    %53 = arith.subf %50, %51 : vector<15x15x8xf32>
    %54 = arith.mulf %53, %53 : vector<15x15x8xf32>
    %55 = arith.subf %50, %52 : vector<15x15x8xf32>
    %56 = arith.mulf %55, %55 : vector<15x15x8xf32>
    %57 = arith.addf %54, %56 : vector<15x15x8xf32>
    %cst_84 = arith.constant dense<0.000000e+00> : vector<8xf32>
    %58 = vector.multi_reduction <add>, %57, %cst_84 [0, 1] : vector<15x15x8xf32> to vector<8xf32>
    %59 = vector.shape_cast %58 : vector<8xf32> to vector<1x1x8xf32>
    %60 = vector.shape_cast %59 : vector<1x1x8xf32> to vector<1x8xf32>
    %cst_85 = arith.constant 0.00444444455 : f32
    %61 = vector.broadcast %cst_85 : f32 to vector<1x8xf32>
    %62 = arith.mulf %60, %61 : vector<1x8xf32>
    %c0_86 = arith.constant 0 : index
    %c0_87 = arith.constant 0 : index
    %63 = vector.load %arg4[%c0_86, %c0_87] : memref<8x16xf32, #tpu.memory_space<vmem>>, vector<8x16xf32>
    %cst_88 = arith.constant dense<0.000000e+00> : vector<1x16xf32>
    %64 = tpu.matmul %62, %63, %cst_88 {dimension_numbers = #tpu.dot_dimension_numbers<[1], [0], [0], [1], [0, 0, 1, 1], [], []>} : vector<1x8xf32>, vector<8x16xf32>, vector<1x16xf32> -> vector<1x16xf32>
    %c0_89 = arith.constant 0 : index
    %c0_90 = arith.constant 0 : index
    %65 = vector.load %arg5[%c0_89, %c0_90] : memref<1x16xf32, #tpu.memory_space<vmem>>, vector<1x16xf32>
    %66 = arith.addf %64, %65 : vector<1x16xf32>
    %cst_91 = arith.constant 0.000000e+00 : f32
    %67 = vector.broadcast %cst_91 : f32 to vector<1x16xf32>
    %68 = arith.maximumf %66, %67 : vector<1x16xf32>
    %c0_92 = arith.constant 0 : index
    %c0_93 = arith.constant 0 : index
    %69 = vector.load %arg6[%c0_92, %c0_93] : memref<16x8xf32, #tpu.memory_space<vmem>>, vector<16x8xf32>
    %cst_94 = arith.constant dense<0.000000e+00> : vector<1x8xf32>
    %70 = tpu.matmul %68, %69, %cst_94 {dimension_numbers = #tpu.dot_dimension_numbers<[1], [0], [0], [1], [0, 0, 1, 1], [], []>} : vector<1x16xf32>, vector<16x8xf32>, vector<1x8xf32> -> vector<1x8xf32>
    %c0_95 = arith.constant 0 : index
    %c0_96 = arith.constant 0 : index
    %71 = vector.load %arg7[%c0_95, %c0_96] : memref<1x8xf32, #tpu.memory_space<vmem>>, vector<1x8xf32>
    %72 = arith.addf %70, %71 : vector<1x8xf32>
    %73 = arith.negf %72 : vector<1x8xf32>
    %74 = math.exp %73 : vector<1x8xf32>
    %cst_97 = arith.constant 1.000000e+00 : f32
    %75 = vector.broadcast %cst_97 : f32 to vector<1x8xf32>
    %76 = arith.addf %75, %74 : vector<1x8xf32>
    %77 = arith.divf %75, %76 : vector<1x8xf32>
    %78 = vector.broadcast %77 : vector<1x8xf32> to vector<256x8xf32>
    %79 = arith.mulf %48, %78 : vector<256x8xf32>
    %80 = arith.addf %79, %22 : vector<256x8xf32>
    %cst_98 = arith.constant 0.000000e+00 : f32
    %81 = vector.broadcast %cst_98 : f32 to vector<256x8xf32>
    %82 = arith.cmpf ogt, %80, %81 : vector<256x8xf32>
    %83 = vector.broadcast %0 : vector<1x1xf32> to vector<256x8xf32>
    %84 = arith.mulf %83, %80 : vector<256x8xf32>
    %85 = arith.select %82, %80, %84 : vector<256x8xi1>, vector<256x8xf32>
    %86 = tpu.transpose %85, [1, 0] : vector<256x8xf32> -> vector<8x256xf32>
    %c0_99 = arith.constant 0 : index
    %c0_100 = arith.constant 0 : index
    %c0_101 = arith.constant 0 : index
    %87 = vector.load %arg9[%c0_99, %c0_100, %c0_101] : memref<1x8x256xf32, #tpu.memory_space<vmem>>, vector<1x8x256xf32>
    %88 = vector.shape_cast %87 : vector<1x8x256xf32> to vector<8x256xf32>
    %89 = vector.shape_cast %86 : vector<8x256xf32> to vector<1x8x256xf32>
    tpu.vector_store %arg9[%c0_99, %c0_100, %c0_101], %89 {strides = array<i32>} : memref<1x8x256xf32, #tpu.memory_space<vmem>>, vector<1x8x256xf32>,
    return
  }
  func.func @transform_0(%arg0: i32) -> (i32, i32, i32, i32) {
    %c0_i32 = arith.constant 0 : i32
    %c0_i32_0 = arith.constant 0 : i32
    %c0_i32_1 = arith.constant 0 : i32
    %c0_i32_2 = arith.constant 0 : i32
    return %arg0, %c0_i32, %c0_i32_0, %c0_i32_1 : i32, i32, i32, i32
  }
  func.func @transform_1(%arg0: i32) -> (i32, i32) {
    %c0_i32 = arith.constant 0 : i32
    %c0_i32_0 = arith.constant 0 : i32
    %c0_i32_1 = arith.constant 0 : i32
    return %c0_i32, %c0_i32_0 : i32, i32
  }
  func.func @transform_2(%arg0: i32) -> (i32, i32) {
    %c0_i32 = arith.constant 0 : i32
    %c0_i32_0 = arith.constant 0 : i32
    %c0_i32_1 = arith.constant 0 : i32
    return %c0_i32, %c0_i32_0 : i32, i32
  }
  func.func @transform_3(%arg0: i32) -> (i32, i32) {
    %c0_i32 = arith.constant 0 : i32
    %c0_i32_0 = arith.constant 0 : i32
    %c0_i32_1 = arith.constant 0 : i32
    return %c0_i32, %c0_i32_0 : i32, i32
  }
  func.func @transform_4(%arg0: i32) -> (i32, i32) {
    %c0_i32 = arith.constant 0 : i32
    %c0_i32_0 = arith.constant 0 : i32
    %c0_i32_1 = arith.constant 0 : i32
    return %c0_i32, %c0_i32_0 : i32, i32
  }
  func.func @transform_5(%arg0: i32) -> (i32, i32) {
    %c0_i32 = arith.constant 0 : i32
    %c0_i32_0 = arith.constant 0 : i32
    %c0_i32_1 = arith.constant 0 : i32
    return %c0_i32, %c0_i32_0 : i32, i32
  }
  func.func @transform_6(%arg0: i32) -> (i32, i32) {
    %c0_i32 = arith.constant 0 : i32
    %c0_i32_0 = arith.constant 0 : i32
    %c0_i32_1 = arith.constant 0 : i32
    return %c0_i32, %c0_i32_0 : i32, i32
  }
  func.func @transform_7(%arg0: i32) -> (i32, i32) {
    %c0_i32 = arith.constant 0 : i32
    %c0_i32_0 = arith.constant 0 : i32
    %c0_i32_1 = arith.constant 0 : i32
    return %c0_i32, %c0_i32_0 : i32, i32
  }
  func.func @transform_8(%arg0: i32) -> (i32, i32, i32) {
    %c0_i32 = arith.constant 0 : i32
    %c0_i32_0 = arith.constant 0 : i32
    %c0_i32_1 = arith.constant 0 : i32
    return %arg0, %c0_i32, %c0_i32_0 : i32, i32, i32
  }
}

</mosaic_0001>

<bundles_post_ra>
// kernel: tv_basic_block_forward.1
= control target key start
LH: loop header
LB: loop body
LE: loop exit
PB: predicated region body
PF: predicated region fallthrough
CT: control target
= control target key end

     0   :  { %s5691_s29 = smov 0   ;;  %s8585_s0 = inlined_call_operand.vmem [shape: f32[2,18,18,4], index: 0, kind: input, shape index: {}]   ;;  %s8586_s1 = inlined_call_operand.vmem [shape: f32[36,8], index: 1, kind: input, shape index: {}]   ;;  %s8587_s2 = inlined_call_operand.vmem [shape: f32[72,8], index: 2, kind: input, shape index: {}]   ;;  %s8588_s3 = inlined_call_operand.vmem [shape: f32[8,16], index: 3, kind: input, shape index: {}]   ;;  %s8589_s4 = inlined_call_operand.vmem [shape: f32[1,16], index: 4, kind: input, shape index: {}]   ;;  %s8590_s5 = inlined_call_operand.vmem [shape: f32[16,8], index: 5, kind: input, shape index: {}]   ;;  %s8591_s6 = inlined_call_operand.vmem [shape: f32[1,8], index: 6, kind: input, shape index: {}]   ;;  %s8592_s7 = inlined_call_operand.<no memory space> [shape: f32[1,1], index: 7, kind: input, shape index: {}]   ;;  %s8593_s8 = inlined_call_operand.vmem [shape: f32[2,8,256], index: 8, kind: output, shape index: {}]  }
   0x1   :  { %v13_v0 = vstv %s8592_s7 }
   0x2   :  { %14 = vst [vmem:[#allocation3] sm:$0x1] %v13_v0 }
   0x3 LB: > { %s5071_s30 = sadd.s32 4294967295, %s5625_s29   ;;  %p5075_p0 = scmp.ge.s32.totalorder %s5625_s29, 1  ;;  %s5625_s29 = sphi %s5691_s29, %s20_s29  }
   0x4   : > { %p264_p1 = scmp.lt.s32.totalorder %s5625_s29, 3 }
   0x6   : > { %p265_p2 = pnand %p5075_p0, %p264_p1 }
   0x8   : > { %268 = sbr.rel (%p265_p2) target bundleno = 2129 (0x851), region = 52 }
   0xf   : > { %p298_p3 = scmp.lt.s32.totalorder %s5071_s30, 1  ;;  %s5627_s12 = smov 8   ;;  %v1887_v12 = vld [vmem:[%s8586_s1] sm:$0xff]  ;;  %v1888_v13 = vld [vmem:[%s8586_s1 + $0x8] sm:$0xff]  ;;  %v1889_v15 = vld [vmem:[%s8586_s1 + $0x10] sm:$0xff]  ;;  %vm1989_vm0 = vcmask 1043456  }
  0x10   : > { %s5628_s13 = smov 4   ;;  %s5629_s14 = smov 12   ;;  %v5562_v14 = vpack.c.bf16 %v1888_v13, %v1887_v12  ;;  %v1890_v16 = vld [vmem:[%s8586_s1 + $0x18] sm:$0xff]  ;;  %v1891_v20 = vld [vmem:[%s8586_s1 + $0x20] sm:$0xf]  ;;  %vm1623_vm1 = vcmask 31744  }
  0x11   : > { %s8700_s30 = smov (!%p298_p3, %s5071_s30), 1  ;;  %s5630_s15 = smov 16   ;;  %v5566_v19 = vpack.c.bf16 %v1890_v16, %v1889_v15  ;;  %vm1656_vm2 = vcmask 64512   ;;  %vm1689_vm3 = vcmask 97280   ;;  %vm1722_vm4 = vcmask 130048  }
  0x12   : > { %s5589_s7 = smul.u32 432, %s8700_s30  ;;  %s5631_s16 = smov 20   ;;  %5563 = vmatprep.subr.bf16.mxu0 %v5562_v14  ;;  %vm1755_vm5 = vcmask 162816   ;;  %vm1788_vm6 = vcmask 195584   ;;  %vm1821_vm7 = vcmask 228352   ;;  %vm8594_vm8 = vcmask 261120  }
  0x13   : > { %s5632_s21 = smov 24   ;;  %5565 = vmatpush3.bf16.msra.mxu0 %v5562_v14  ;;  %s5633_s26 = smov 28   ;;  %vm1892_vm9 = vcmask 293888   ;;  %vm2325_vm10 = vcmask 58368   ;;  %vm2331_vm11 = vcmask 57344  }
  0x14   : > { %s5705_s11 = scalar_lea.vmem %s8585_s0, %s5589_s7  ;;  %5567 = vmatprep.subr.bf16.mxu0 %v5566_v19  ;;  %s5634_s7 = smov 32  }
  0x15   : > { %v373_v1 = vld [vmem:[%s5705_s11 + $0x2] sm:$0xff]  ;;  %v374_v3 = vld [vmem:[%s5705_s11 + $0xa] sm:$0xff]  ;;  %v5719_v6 = vld [vmem:[%s5705_s11 + $0x18] sm:$0xff]  ;;  %s5637_s9 = smov 40   ;;  %s5640_s17 = smov 64  }
  0x16   : > { %v341_v2 = vld [vmem:[%s5705_s11 + $0x1] sm:$0xff]  ;;  %759 = vrot.lane.b32.xlu1 %v373_v1, %s5627_s12  ;;  %v342_v4 = vld [vmem:[%s5705_s11 + $0x9] sm:$0xff]  ;;  %v343_v7 = vld [vmem:[%s5705_s11 + $0x19] sm:$0xff]  ;;  %s5342_s23 = sshll.u32 %s8700_s30, 4 }
  0x17   : > { %631 = vrot.lane.b32.xlu0 %v341_v2, %s5628_s13  ;;  %v5716_v5 = vld [vmem:[%s5705_s11 + $0x20] sm:$0xff]  ;;  %v5735_v10 = vld [vmem:[%s5705_s11 + $0x30] sm:$0xff]  ;;  %v5758_v18 = vld [vmem:[%s5705_s11 + $0x38] sm:$0xff]  ;;  %5569 = vmatpush3.bf16.msra.mxu0 %v5566_v19 }
  0x18   : > { %v5143_v8 = vld [vmem:[%s5705_s11 + $0x1a] sm:$0xff]  ;;  %v5144_v11 = vld [vmem:[%s5705_s11 + $0x22] sm:$0xff]  ;;  %v5207_v17 = vld [vmem:[%s5705_s11 + $0x31] sm:$0xff]  ;;  %5434 = vmatprep.subr.msk.mxu0 %vm1989_vm0, %v1891_v20 }
  0x19   : > { %v5112_v9 = vld [vmem:[%s5705_s11 + $0x21] sm:$0xff]  ;;  %v5239_v21 = vld [vmem:[%s5705_s11 + $0x32] sm:$0xff]  ;;  %v5209_v25 = vld [vmem:[%s5705_s11 + $0x49] sm:$0xff] }
  0x1a   : > { %761 = vrot.lane.b32.xlu1 %v374_v3, %s5627_s12  ;;  %v5208_v22 = vld [vmem:[%s5705_s11 + $0x39] sm:$0xff]  ;;  %v5781_v24 = vld [vmem:[%s5705_s11 + $0x48] sm:$0xff]  ;;  %v5791_v26 = vld [vmem:[%s5705_s11 + $0x50] sm:$0xff] }
  0x1b   : > { %633 = vrot.lane.b32.xlu0 %v342_v4, %s5628_s13  ;;  %5435 = vmatpush3.msk.msra.mxu0 %vm1989_vm0, %v1891_v20  ;;  %v5240_v23 = vld [vmem:[%s5705_s11 + $0x3a] sm:$0xff]  ;;  %v5241_v27 = vld [vmem:[%s5705_s11 + $0x4a] sm:$0xff]  ;;  %v5242_v29 = vld [vmem:[%s5705_s11 + $0x52] sm:$0xff] }
  0x1c   : > { %v5210_v28 = vld [vmem:[%s5705_s11 + $0x51] sm:$0xff]  ;;  %v5811_v30 = vld [vmem:[%s5705_s11 + $0x60] sm:$0xff]  ;;  %v5821_v32 = vld [vmem:[%s5705_s11 + $0x68] sm:$0xff] }
  0x1d   : > { %v5211_v31 = vld [vmem:[%s5705_s11 + $0x61] sm:$0xff]  ;;  %v5212_v34 = vld [vmem:[%s5705_s11 + $0x69] sm:$0xff]  ;;  %v5841_v38 = vld [vmem:[%s5705_s11 + $0x78] sm:$0xff] }
  0x1e   : > { %889 = vrot.lane.b32.xlu1 %v5716_v5, %s5629_s14  ;;  %v5243_v33 = vld [vmem:[%s5705_s11 + $0x62] sm:$0xff]  ;;  %v5244_v35 = vld [vmem:[%s5705_s11 + $0x6a] sm:$0xff]  ;;  %v5213_v43 = vld [vmem:[%s5705_s11 + $0x79] sm:$0xff] }
  0x1f   : > { %887 = vrot.lane.b32.xlu0 %v5719_v6, %s5629_s14  ;;  %v5855_v44 = vld [vmem:[%s5705_s11 + $0x80] sm:$0xff]  ;;  %v5888_v63 = vld [vmem:[%s5705_s11 + $0x90] sm:$0xff]  ;;  %v310_v3 = vld [vmem:[%s5705_s11 + $0x8] sm:$0xff] }
  0x20   : > { %v5245_v49 = vld [vmem:[%s5705_s11 + $0x7a] sm:$0xff]  ;;  %v5246_v55 = vld [vmem:[%s5705_s11 + $0x82] sm:$0xff]  ;;  %v5215_v16 = vld [vmem:[%s5705_s11 + $0x91] sm:$0xff] }
  0x21   : > { %v5214_v50 = vld [vmem:[%s5705_s11 + $0x81] sm:$0xff] }
  0x22   : > { %635 = vrot.lane.b32.xlu1 %v343_v7, %s5628_s13  ;;  %v309_v58 = vld [vmem:[%s5705_s11] sm:$0xff] }
  0x23   : > { %1015 = vrot.lane.b32.xlu0 %v343_v7, %s5630_s15 }
  0x26   : > { %1143 = vrot.lane.b32.xlu1 %v5143_v8, %s5631_s16 }
  0x27   : > { %1017 = vrot.lane.b32.xlu0 %v5112_v9, %s5630_s15 }
  0x2a   : > { %763 = vrot.lane.b32.xlu1 %v5143_v8, %s5627_s12 }
  0x2b   : > { %637 = vrot.lane.b32.xlu0 %v5112_v9, %s5628_s13 }
  0x2e   : > { %1271 = vrot.lane.b32.xlu1 %v5735_v10, %s5632_s21 }
  0x2f   : > { %1145 = vrot.lane.b32.xlu0 %v5144_v11, %s5631_s16 }
  0x32   : > { %891 = vrot.lane.b32.xlu1 %v5735_v10, %s5629_s14 }
  0x33   : > { %765 = vrot.lane.b32.xlu0 %v5144_v11, %s5627_s12 }
  0x36   : > { %1399 = vrot.lane.b32.xlu1 %v5207_v17, %s5633_s26 }
  0x37   : > { %1273 = vrot.lane.b32.xlu0 %v5758_v18, %s5632_s21 }
  0x3a   : > { %1019 = vrot.lane.b32.xlu1 %v5207_v17, %s5630_s15 }
  0x3b   : > { %893 = vrot.lane.b32.xlu0 %v5758_v18, %s5629_s14 }
  0x3e   : > { %1527 = vrot.lane.b32.xlu1 %v5239_v21, %s5634_s7 }
  0x3f   : > { %1401 = vrot.lane.b32.xlu0 %v5208_v22, %s5633_s26 }
  0x42   : > { %1021 = vrot.lane.b32.xlu1 %v5208_v22, %s5630_s15 }
  0x43   : > { %639 = vrot.lane.b32.xlu0 %v5207_v17, %s5628_s13  ;;  %v5911_v17 = vld [vmem:[%s5705_s11 + $0x98] sm:$0xff] }
  0x46   : > { %1529 = vrot.lane.b32.xlu1 %v5240_v23, %s5634_s7 }
  0x47   : > { %1147 = vrot.lane.b32.xlu0 %v5239_v21, %s5631_s16 }
  0x4a   : > { %767 = vrot.lane.b32.xlu1 %v5239_v21, %s5627_s12 }
  0x4b   : > { %641 = vrot.lane.b32.xlu0 %v5208_v22, %s5628_s13 }
  0x4e   : > { %1275 = vrot.lane.b32.xlu1 %v5781_v24, %s5632_s21 }
  0x4f   : > { %1149 = vrot.lane.b32.xlu0 %v5240_v23, %s5631_s16 }
  0x52   : > { %895 = vrot.lane.b32.xlu1 %v5781_v24, %s5629_s14 }
  0x53   : > { %769 = vrot.lane.b32.xlu0 %v5240_v23, %s5627_s12 }
  0x56   : > { %1403 = vrot.lane.b32.xlu1 %v5209_v25, %s5633_s26 }
  0x57   : > { %1277 = vrot.lane.b32.xlu0 %v5791_v26, %s5632_s21 }
  0x5a   : > { %1023 = vrot.lane.b32.xlu1 %v5209_v25, %s5630_s15 }
  0x5b   : > { %897 = vrot.lane.b32.xlu0 %v5791_v26, %s5629_s14 }
  0x5e   : > { %1531 = vrot.lane.b32.xlu1 %v5241_v27, %s5634_s7 }
  0x5f   : > { %1405 = vrot.lane.b32.xlu0 %v5210_v28, %s5633_s26 }
  0x62   : > { %1025 = vrot.lane.b32.xlu1 %v5210_v28, %s5630_s15 }
  0x63   : > { %643 = vrot.lane.b32.xlu0 %v5209_v25, %s5628_s13 }
  0x66   : > { %1533 = vrot.lane.b32.xlu1 %v5242_v29, %s5634_s7 }
  0x67   : > { %1151 = vrot.lane.b32.xlu0 %v5241_v27, %s5631_s16 }
  0x6a   : > { %771 = vrot.lane.b32.xlu1 %v5241_v27, %s5627_s12 }
  0x6b   : > { %645 = vrot.lane.b32.xlu0 %v5210_v28, %s5628_s13 }
  0x6e   : > { %1279 = vrot.lane.b32.xlu1 %v5811_v30, %s5632_s21 }
  0x6f   : > { %1153 = vrot.lane.b32.xlu0 %v5242_v29, %s5631_s16 }
  0x72   : > { %899 = vrot.lane.b32.xlu1 %v5811_v30, %s5629_s14 }
  0x73   : > { %773 = vrot.lane.b32.xlu0 %v5242_v29, %s5627_s12 }
  0x76   : > { %1407 = vrot.lane.b32.xlu1 %v5211_v31, %s5633_s26 }
  0x77   : > { %1281 = vrot.lane.b32.xlu0 %v5821_v32, %s5632_s21 }
  0x7a   : > { %1027 = vrot.lane.b32.xlu1 %v5211_v31, %s5630_s15 }
  0x7b   : > { %901 = vrot.lane.b32.xlu0 %v5821_v32, %s5629_s14 }
  0x7e   : > { %1535 = vrot.lane.b32.xlu1 %v5243_v33, %s5634_s7 }
  0x7f   : > { %1409 = vrot.lane.b32.xlu0 %v5212_v34, %s5633_s26 }
  0x82   : > { %1029 = vrot.lane.b32.xlu1 %v5212_v34, %s5630_s15 }
  0x83   : > { %647 = vrot.lane.b32.xlu0 %v5211_v31, %s5628_s13 }
  0x86   : > { %1537 = vrot.lane.b32.xlu1 %v5244_v35, %s5634_s7 }
  0x87   : > { %1155 = vrot.lane.b32.xlu0 %v5243_v33, %s5631_s16 }
  0x88   : > { %v760_v36 = vpop.permute.xlu1 %759 }
  0x89   : > { %v632_v37 = vpop.permute.xlu0 %631 }
  0x8a   : > { %775 = vrot.lane.b32.xlu1 %v5243_v33, %s5627_s12  ;;  %v1624_v59 = vsel %vm1623_vm1, %v309_v58, %v632_v37  ;;  %v5247_v33 = vld [vmem:[%s5705_s11 + $0x92] sm:$0xff] }
  0x8b   : > { %649 = vrot.lane.b32.xlu0 %v5212_v34, %s5628_s13  ;;  %v1657_v62 = vsel %vm1656_vm2, %v1624_v59, %v760_v36  ;;  %v5216_v34 = vld [vmem:[%s5705_s11 + $0x99] sm:$0xff] }
  0x8c   : > { %v5843_v39 = vpop.permute.xlu1 %761 }
  0x8d   : > { %v634_v40 = vpop.permute.xlu0 %633 }
  0x8e   : > { %1283 = vrot.lane.b32.xlu1 %v5841_v38, %s5632_s21  ;;  %v1625_v9 = vsel %vm1623_vm1, %v310_v3, %v634_v40 }
  0x8f   : > { %1157 = vrot.lane.b32.xlu0 %v5244_v35, %s5631_s16  ;;  %v1658_v15 = vsel %vm1656_vm2, %v1625_v9, %v5843_v39 }
  0x90   : > { %v5848_v41 = vpop.permute.xlu1 %889 }
  0x91   : > { %v888_v42 = vpop.permute.xlu0 %887  ;;  %v1691_v19 = vsel %vm1689_vm3, %v1658_v15, %v5848_v41  ;;  %v5248_v41 = vld [vmem:[%s5705_s11 + $0x9a] sm:$0xff] }
  0x92   : > { %903 = vrot.lane.b32.xlu1 %v5841_v38, %s5629_s14  ;;  %v1690_v0 = vsel %vm1689_vm3, %v1657_v62, %v888_v42  ;;  %v5217_v62 = vld [vmem:[%s5705_s11 + $0xa9] sm:$0xff] }
  0x93   : > { %777 = vrot.lane.b32.xlu0 %v5244_v35, %s5627_s12 }
  0x94   : > { %v5857_v45 = vpop.permute.xlu1 %635 }
  0x95   : > { %v1016_v46 = vpop.permute.xlu0 %1015  ;;  %v1626_v40 = vsel %vm1623_vm1, %v5719_v6, %v5857_v45 }
  0x96   : > { %1411 = vrot.lane.b32.xlu1 %v5213_v43, %s5633_s26  ;;  %v1723_v4 = vsel %vm1722_vm4, %v1690_v0, %v1016_v46  ;;  %v5979_v0 = vld [vmem:[%s5705_s11 + $0xb0] sm:$0xff] }
  0x97   : > { %1285 = vrot.lane.b32.xlu0 %v5855_v44, %s5632_s21 }
  0x98   : > { %v1144_v47 = vpop.permute.xlu1 %1143 }
  0x99   : > { %v1018_v48 = vpop.permute.xlu0 %1017  ;;  %v1756_v7 = vsel %vm1755_vm5, %v1723_v4, %v1144_v47 }
  0x9a   : > { %1031 = vrot.lane.b32.xlu1 %v5213_v43, %s5630_s15  ;;  %v1724_v22 = vsel %vm1722_vm4, %v1691_v19, %v1018_v48  ;;  %v5250_v19 = vld [vmem:[%s5705_s11 + $0xb2] sm:$0xff] }
  0x9b   : > { %905 = vrot.lane.b32.xlu0 %v5855_v44, %s5629_s14 }
  0x9c   : > { %v5867_v51 = vpop.permute.xlu1 %763 }
  0x9d   : > { %v5869_v52 = vpop.permute.xlu0 %637  ;;  %v1659_v46 = vsel %vm1656_vm2, %v1626_v40, %v5867_v51 }
  0x9e   : > { %1539 = vrot.lane.b32.xlu1 %v5245_v49, %s5634_s7 }
  0x9f   : > { %1413 = vrot.lane.b32.xlu0 %v5214_v50, %s5633_s26 }
  0xa0   : > { %v1272_v53 = vpop.permute.xlu1 %1271 }
  0xa1   : > { %v1146_v54 = vpop.permute.xlu0 %1145  ;;  %v1789_v8 = vsel %vm1788_vm6, %v1756_v7, %v1272_v53 }
  0xa2   : > { %1033 = vrot.lane.b32.xlu1 %v5214_v50, %s5630_s15  ;;  %v1757_v23 = vsel %vm1755_vm5, %v1724_v22, %v1146_v54 }
  0xa3   : > { %651 = vrot.lane.b32.xlu0 %v5213_v43, %s5628_s13 }
  0xa4   : > { %v5876_v56 = vpop.permute.xlu1 %891 }
  0xa5   : > { %v5878_v57 = vpop.permute.xlu0 %765  ;;  %v1692_v47 = vsel %vm1689_vm3, %v1659_v46, %v5876_v56 }
  0xa6   : > { %1541 = vrot.lane.b32.xlu1 %v5246_v55, %s5634_s7 }
  0xa7   : > { %1159 = vrot.lane.b32.xlu0 %v5245_v49, %s5631_s16 }
  0xa8   : > { %v1400_v60 = vpop.permute.xlu1 %1399 }
  0xa9   : > { %v1274_v61 = vpop.permute.xlu0 %1273  ;;  %v1822_v11 = vsel %vm1821_vm7, %v1789_v8, %v1400_v60  ;;  %v1627_v60 = vsel %vm1623_vm1, %v5716_v5, %v5869_v52 }
  0xaa   : > { %779 = vrot.lane.b32.xlu1 %v5245_v49, %s5627_s12  ;;  %v1790_v25 = vsel %vm1788_vm6, %v1757_v23, %v1274_v61  ;;  %v5957_v49 = vld [vmem:[%s5705_s11 + $0xa8] sm:$0xff]  ;;  %v1660_v61 = vsel %vm1656_vm2, %v1627_v60, %v5878_v57 }
  0xab   : > { %653 = vrot.lane.b32.xlu0 %v5214_v50, %s5628_s13 }
  0xac   : > { %v1020_v1 = vpop.permute.xlu1 %1019 }
  0xad   : > { %v5891_v2 = vpop.permute.xlu0 %893  ;;  %v1725_v48 = vsel %vm1722_vm4, %v1692_v47, %v1020_v1  ;;  %v5219_v47 = vld [vmem:[%s5705_s11 + $0xc1] sm:$0xff] }
  0xae   : > { %1287 = vrot.lane.b32.xlu1 %v5888_v63, %s5632_s21  ;;  %v1693_v1 = vsel %vm1689_vm3, %v1660_v61, %v5891_v2 }
  0xaf   : > { %1161 = vrot.lane.b32.xlu0 %v5246_v55, %s5631_s16 }
  0xb0   : > { %v1528_v12 = vpop.permute.xlu1 %1527 }
  0xb1   : > { %v1402_v13 = vpop.permute.xlu0 %1401  ;;  %v1855_v14 = vsel %vm8594_vm8, %v1822_v11, %v1528_v12  ;;  %v5249_v11 = vld [vmem:[%s5705_s11 + $0xaa] sm:$0xff] }
  0xb2   : > { %907 = vrot.lane.b32.xlu1 %v5888_v63, %s5629_s14  ;;  %5436 = vmatprep.mubr.msk.f32.mxu0 %vm1892_vm9, %v1855_v14  ;;  %v1823_v27 = vsel %vm1821_vm7, %v1790_v25, %v1402_v13  ;;  %v5218_v12 = vld [vmem:[%s5705_s11 + $0xb1] sm:$0xff] }
  0xb3   : > { %781 = vrot.lane.b32.xlu0 %v5246_v55, %s5627_s12 }
  0xb4   : > { %v1022_v20 = vpop.permute.xlu1 %1021 }
  0xb5   : > { %v5915_v21 = vpop.permute.xlu0 %639  ;;  %v1726_v52 = vsel %vm1722_vm4, %v1693_v1, %v1022_v20  ;;  %v5252_v1 = vld [vmem:[%s5705_s11 + $0xca] sm:$0xff] }
  0xb6   : > { %1415 = vrot.lane.b32.xlu1 %v5215_v16, %s5633_s26 }
  0xb7   : > { %1289 = vrot.lane.b32.xlu0 %v5911_v17, %s5632_s21 }
  0xb8   : > { %v1530_v28 = vpop.permute.xlu1 %1529 }
  0xb9   : > { %v1148_v29 = vpop.permute.xlu0 %1147  ;;  %v1856_v31 = vsel %vm8594_vm8, %v1823_v27, %v1530_v28  ;;  %v1628_v27 = vsel %vm1623_vm1, %v5735_v10, %v5915_v21 }
  0xba   : > { %1035 = vrot.lane.b32.xlu1 %v5215_v16, %s5630_s15  ;;  %5437 = vmatmul.mubr.msk.f32.vlgmr.msra.gmra.mrb[0].mxu0 %vm1892_vm9, %v1856_v31  ;;  %v1758_v53 = vsel %vm1755_vm5, %v1725_v48, %v1148_v29  ;;  %v6022_v29 = vld [vmem:[%s5705_s11 + $0xc0] sm:$0xff] }
  0xbb   : > { %909 = vrot.lane.b32.xlu0 %v5911_v17, %s5629_s14 }
  0xbc   : > { %v5931_v35 = vpop.permute.xlu1 %767 }
  0xbd   : > { %v5933_v36 = vpop.permute.xlu0 %641  ;;  %v1661_v28 = vsel %vm1656_vm2, %v1628_v27, %v5931_v35  ;;  %v5221_v27 = vld [vmem:[%s5705_s11 + $0xd9] sm:$0xff] }
  0xbe   : > { %1543 = vrot.lane.b32.xlu1 %v5247_v33, %s5634_s7 }
  0xbf   : > { %1417 = vrot.lane.b32.xlu0 %v5216_v34, %s5633_s26 }
  0xc0   : > { %v1276_v37 = vpop.permute.xlu1 %1275 }
  0xc1   : > { %v1150_v39 = vpop.permute.xlu0 %1149  ;;  %v1791_v54 = vsel %vm1788_vm6, %v1758_v53, %v1276_v37 }
  0xc2   : > { %1037 = vrot.lane.b32.xlu1 %v5216_v34, %s5630_s15  ;;  %v1759_v4 = vsel %vm1755_vm5, %v1726_v52, %v1150_v39 }
  0xc3   : > { %655 = vrot.lane.b32.xlu0 %v5215_v16, %s5628_s13 }
  0xc4   : > { %v5943_v42 = vpop.permute.xlu1 %895 }
  0xc5   : > { %v5945_v43 = vpop.permute.xlu0 %769  ;;  %v1694_v31 = vsel %vm1689_vm3, %v1661_v28, %v5943_v42  ;;  %v1629_v42 = vsel %vm1623_vm1, %v5758_v18, %v5933_v36  ;;  %v6115_v28 = vld [vmem:[%s5705_s11 + $0xe0] sm:$0xff] }
  0xc6   : > { %1545 = vrot.lane.b32.xlu1 %v5248_v41, %s5634_s7  ;;  %v1662_v46 = vsel %vm1656_vm2, %v1629_v42, %v5945_v43 }
  0xc7   : > { %1163 = vrot.lane.b32.xlu0 %v5247_v33, %s5631_s16 }
  0xc8   : > { %v1404_v6 = vpop.permute.xlu1 %1403 }
  0xc9   : > { %v1278_v45 = vpop.permute.xlu0 %1277  ;;  %v1824_v55 = vsel %vm1821_vm7, %v1791_v54, %v1404_v6  ;;  %v6047_v6 = vld [vmem:[%s5705_s11 + $0xc8] sm:$0xff] }
  0xca   : > { %783 = vrot.lane.b32.xlu1 %v5247_v33, %s5627_s12  ;;  %v1792_v57 = vsel %vm1788_vm6, %v1759_v4, %v1278_v45 }
  0xcb   : > { %657 = vrot.lane.b32.xlu0 %v5216_v34, %s5628_s13 }
  0xcc   : > { %v1024_v50 = vpop.permute.xlu1 %1023 }
  0xcd   : > { %v5959_v51 = vpop.permute.xlu0 %897  ;;  %v1727_v37 = vsel %vm1722_vm4, %v1694_v31, %v1024_v50 }
  0xce   : > { %1291 = vrot.lane.b32.xlu1 %v5957_v49, %s5632_s21  ;;  %v1695_v45 = vsel %vm1689_vm3, %v1662_v46, %v5959_v51 }
  0xcf   : > { %1165 = vrot.lane.b32.xlu0 %v5248_v41, %s5631_s16 }
  0xd0   : > { %v1532_v56 = vpop.permute.xlu1 %1531 }
  0xd1   : > { %v1406_v58 = vpop.permute.xlu0 %1405  ;;  %v1857_v59 = vsel %vm8594_vm8, %v1824_v55, %v1532_v56  ;;  %v5251_v56 = vld [vmem:[%s5705_s11 + $0xc2] sm:$0xff] }
  0xd2   : > { %911 = vrot.lane.b32.xlu1 %v5957_v49, %s5629_s14  ;;  %5439 = vmatprep.mubr.msk.f32.mxu0 %vm1892_vm9, %v1857_v59  ;;  %v1825_v7 = vsel %vm1821_vm7, %v1792_v57, %v1406_v58  ;;  %v5220_v58 = vld [vmem:[%s5705_s11 + $0xc9] sm:$0xff] }
  0xd3   : > { %785 = vrot.lane.b32.xlu0 %v5248_v41, %s5627_s12 }
  0xd4   : > { %v1026_v3 = vpop.permute.xlu1 %1025 }
  0xd5   : > { %v5983_v5 = vpop.permute.xlu0 %643  ;;  %v1728_v36 = vsel %vm1722_vm4, %v1695_v45, %v1026_v3  ;;  %v5254_v45 = vld [vmem:[%s5705_s11 + $0xe2] sm:$0xff] }
  0xd6   : > { %1419 = vrot.lane.b32.xlu1 %v5217_v62, %s5633_s26 }
  0xd7   : > { %1293 = vrot.lane.b32.xlu0 %v5979_v0, %s5632_s21 }
  0xd8   : > { %v1534_v8 = vpop.permute.xlu1 %1533 }
  0xd9   : > { %v1152_v2 = vpop.permute.xlu0 %1151  ;;  %v1858_v9 = vsel %vm8594_vm8, %v1825_v7, %v1534_v8  ;;  %v1630_v7 = vsel %vm1623_vm1, %v5781_v24, %v5983_v5 }
  0xda   : > { %1039 = vrot.lane.b32.xlu1 %v5217_v62, %s5630_s15  ;;  %5440 = vmatmul.mubr.msk.f32.gmra.mrb[2].mxu0 %vm1892_vm9, %v1858_v9  ;;  %v1760_v10 = vsel %vm1755_vm5, %v1727_v37, %v1152_v2  ;;  %v6090_v2 = vld [vmem:[%s5705_s11 + $0xd8] sm:$0xff] }
  0xdb   : > { %913 = vrot.lane.b32.xlu0 %v5979_v0, %s5629_s14 }
  0xdc   : > { %v5999_v13 = vpop.permute.xlu1 %771 }
  0xdd   : > { %v6001_v14 = vpop.permute.xlu0 %645  ;;  %v1663_v8 = vsel %vm1656_vm2, %v1630_v7, %v5999_v13  ;;  %v5223_v7 = vld [vmem:[%s5705_s11 + $0xf1] sm:$0xff] }
  0xde   : > { %1547 = vrot.lane.b32.xlu1 %v5249_v11, %s5634_s7 }
  0xdf   : > { %1421 = vrot.lane.b32.xlu0 %v5218_v12, %s5633_s26 }
  0xe0   : > { %v1280_v15 = vpop.permute.xlu1 %1279 }
  0xe1   : > { %v1154_v16 = vpop.permute.xlu0 %1153  ;;  %v1793_v21 = vsel %vm1788_vm6, %v1760_v10, %v1280_v15 }
  0xe2   : > { %1041 = vrot.lane.b32.xlu1 %v5218_v12, %s5630_s15  ;;  %v1761_v50 = vsel %vm1755_vm5, %v1728_v36, %v1154_v16 }
  0xe3   : > { %659 = vrot.lane.b32.xlu0 %v5217_v62, %s5628_s13 }
  0xe4   : > { %v6008_v20 = vpop.permute.xlu1 %899 }
  0xe5   : > { %v6010_v22 = vpop.permute.xlu0 %773  ;;  %v1696_v9 = vsel %vm1689_vm3, %v1663_v8, %v6008_v20  ;;  %v6183_v8 = vld [vmem:[%s5705_s11 + $0xf8] sm:$0xff] }
  0xe6   : > { %1549 = vrot.lane.b32.xlu1 %v5250_v19, %s5634_s7 }
  0xe7   : > { %1167 = vrot.lane.b32.xlu0 %v5249_v11, %s5631_s16 }
  0xe8   : > { %v1408_v23 = vpop.permute.xlu1 %1407 }
  0xe9   : > { %v1282_v25 = vpop.permute.xlu0 %1281  ;;  %v1826_v35 = vsel %vm1821_vm7, %v1793_v21, %v1408_v23  ;;  %v1631_v23 = vsel %vm1623_vm1, %v5791_v26, %v6001_v14 }
  0xea   : > { %787 = vrot.lane.b32.xlu1 %v5249_v11, %s5627_s12  ;;  %v1794_v43 = vsel %vm1788_vm6, %v1761_v50, %v1282_v25  ;;  %v1664_v25 = vsel %vm1656_vm2, %v1631_v23, %v6010_v22 }
  0xeb   : > { %661 = vrot.lane.b32.xlu0 %v5218_v12, %s5628_s13 }
  0xec   : > { %v1028_v33 = vpop.permute.xlu1 %1027 }
  0xed   : > { %v6026_v34 = vpop.permute.xlu0 %901  ;;  %v1729_v15 = vsel %vm1722_vm4, %v1696_v9, %v1028_v33 }
  0xee   : > { %1295 = vrot.lane.b32.xlu1 %v6022_v29, %s5632_s21  ;;  %v1697_v31 = vsel %vm1689_vm3, %v1664_v25, %v6026_v34 }
  0xef   : > { %1169 = vrot.lane.b32.xlu0 %v5250_v19, %s5631_s16 }
  0xf0   : > { %v1536_v39 = vpop.permute.xlu1 %1535 }
  0xf1   : > { %v1410_v40 = vpop.permute.xlu0 %1409  ;;  %v1859_v41 = vsel %vm8594_vm8, %v1826_v35, %v1536_v39  ;;  %v5253_v39 = vld [vmem:[%s5705_s11 + $0xda] sm:$0xff] }
  0xf2   : > { %915 = vrot.lane.b32.xlu1 %v6022_v29, %s5629_s14  ;;  %5442 = vmatprep.mubr.msk.f32.mxu0 %vm1892_vm9, %v1859_v41  ;;  %v1827_v53 = vsel %vm1821_vm7, %v1794_v43, %v1410_v40  ;;  %v5222_v40 = vld [vmem:[%s5705_s11 + $0xe1] sm:$0xff] }
  0xf3   : > { %789 = vrot.lane.b32.xlu0 %v5250_v19, %s5627_s12 }
  0xf4   : > { %v1030_v48 = vpop.permute.xlu1 %1029 }
  0xf5   : > { %v6051_v18 = vpop.permute.xlu0 %647  ;;  %v1730_v14 = vsel %vm1722_vm4, %v1697_v31, %v1030_v48  ;;  %v5256_v31 = vld [vmem:[%s5705_s11 + $0xfa] sm:$0xff] }
  0xf6   : > { %1423 = vrot.lane.b32.xlu1 %v5219_v47, %s5633_s26 }
  0xf7   : > { %1297 = vrot.lane.b32.xlu0 %v6047_v6, %s5632_s21 }
  0xf8   : > { %v1538_v54 = vpop.permute.xlu1 %1537 }
  0xf9   : > { %v1156_v51 = vpop.permute.xlu0 %1155  ;;  %v1860_v55 = vsel %vm8594_vm8, %v1827_v53, %v1538_v54  ;;  %v1632_v53 = vsel %vm1623_vm1, %v5811_v30, %v6051_v18 }
  0xfa   : > { %1043 = vrot.lane.b32.xlu1 %v5219_v47, %s5630_s15  ;;  %5443 = vmatmul.mubr.msk.f32.gmra.mrb[4].mxu0 %vm1892_vm9, %v1860_v55  ;;  %v1762_v24 = vsel %vm1755_vm5, %v1729_v15, %v1156_v51  ;;  %v6158_v51 = vld [vmem:[%s5705_s11 + $0xf0] sm:$0xff] }
  0xfb   : > { %917 = vrot.lane.b32.xlu0 %v6047_v6, %s5629_s14 }
  0xfc   : > { %v6067_v59 = vpop.permute.xlu1 %775 }
  0xfd   : > { %v6069_v60 = vpop.permute.xlu0 %649  ;;  %v1665_v54 = vsel %vm1656_vm2, %v1632_v53, %v6067_v59  ;;  %v5225_v53 = vld [vmem:[%s5705_s11 + $0x109] sm:$0xff] }
  0xfe   : > { %1551 = vrot.lane.b32.xlu1 %v5251_v56, %s5634_s7 }
  0xff   : > { %1425 = vrot.lane.b32.xlu0 %v5220_v58, %s5633_s26 }
 0x100   : > { %v1284_v61 = vpop.permute.xlu1 %1283 }
 0x101   : > { %v1158_v62 = vpop.permute.xlu0 %1157  ;;  %v1795_v5 = vsel %vm1788_vm6, %v1762_v24, %v1284_v61 }
 0x102   : > { %1045 = vrot.lane.b32.xlu1 %v5220_v58, %s5630_s15  ;;  %v1763_v37 = vsel %vm1755_vm5, %v1730_v14, %v1158_v62 }
 0x103   : > { %663 = vrot.lane.b32.xlu0 %v5219_v47, %s5628_s13 }
 0x104   : > { %v6076_v3 = vpop.permute.xlu1 %903 }
 0x105   : > { %v6078_v52 = vpop.permute.xlu0 %777  ;;  %v1698_v55 = vsel %vm1689_vm3, %v1665_v54, %v6076_v3  ;;  %v6251_v54 = vld [vmem:[%s5705_s11 + $0x110] sm:$0xff] }
 0x106   : > { %1553 = vrot.lane.b32.xlu1 %v5252_v1, %s5634_s7 }
 0x107   : > { %1171 = vrot.lane.b32.xlu0 %v5251_v56, %s5631_s16 }
 0x108   : > { %v1412_v4 = vpop.permute.xlu1 %1411 }
 0x109   : > { %v1286_v57 = vpop.permute.xlu0 %1285  ;;  %v1828_v13 = vsel %vm1821_vm7, %v1795_v5, %v1412_v4  ;;  %v1633_v4 = vsel %vm1623_vm1, %v5821_v32, %v6069_v60 }
 0x10a   : > { %791 = vrot.lane.b32.xlu1 %v5251_v56, %s5627_s12  ;;  %v1796_v22 = vsel %vm1788_vm6, %v1763_v37, %v1286_v57  ;;  %v1666_v57 = vsel %vm1656_vm2, %v1633_v4, %v6078_v52 }
 0x10b   : > { %665 = vrot.lane.b32.xlu0 %v5220_v58, %s5628_s13 }
 0x10c   : > { %v1032_v11 = vpop.permute.xlu1 %1031 }
 0x10d   : > { %v6094_v12 = vpop.permute.xlu0 %905  ;;  %v1731_v61 = vsel %vm1722_vm4, %v1698_v55, %v1032_v11 }
 0x10e   : > { %1299 = vrot.lane.b32.xlu1 %v6090_v2, %s5632_s21  ;;  %v1699_v9 = vsel %vm1689_vm3, %v1666_v57, %v6094_v12 }
 0x10f   : > { %1173 = vrot.lane.b32.xlu0 %v5252_v1, %s5631_s16 }
 0x110   : > { %v1540_v16 = vpop.permute.xlu1 %1539 }
 0x111   : > { %v1414_v19 = vpop.permute.xlu0 %1413  ;;  %v1861_v20 = vsel %vm8594_vm8, %v1828_v13, %v1540_v16  ;;  %v5255_v16 = vld [vmem:[%s5705_s11 + $0xf2] sm:$0xff] }
 0x112   : > { %919 = vrot.lane.b32.xlu1 %v6090_v2, %s5629_s14  ;;  %5445 = vmatprep.mubr.msk.f32.mxu0 %vm1892_vm9, %v1861_v20  ;;  %v1829_v10 = vsel %vm1821_vm7, %v1796_v22, %v1414_v19  ;;  %v5224_v19 = vld [vmem:[%s5705_s11 + $0xf9] sm:$0xff] }
 0x113   : > { %793 = vrot.lane.b32.xlu0 %v5252_v1, %s5627_s12 }
 0x114   : > { %v1034_v33 = vpop.permute.xlu1 %1033 }
 0x115   : > { %v6119_v26 = vpop.permute.xlu0 %651  ;;  %v1732_v60 = vsel %vm1722_vm4, %v1699_v9, %v1034_v33  ;;  %v5258_v9 = vld [vmem:[%s5705_s11 + $0x112] sm:$0xff] }
 0x116   : > { %1427 = vrot.lane.b32.xlu1 %v5221_v27, %s5633_s26 }
 0x117   : > { %1301 = vrot.lane.b32.xlu0 %v6115_v28, %s5632_s21 }
 0x118   : > { %v1542_v21 = vpop.permute.xlu1 %1541 }
 0x119   : > { %v1160_v34 = vpop.permute.xlu0 %1159  ;;  %v1862_v35 = vsel %vm8594_vm8, %v1829_v10, %v1542_v21  ;;  %v1634_v10 = vsel %vm1623_vm1, %v5841_v38, %v6119_v26 }
 0x11a   : > { %1047 = vrot.lane.b32.xlu1 %v5221_v27, %s5630_s15  ;;  %5446 = vmatmul.mubr.msk.f32.gmra.mrb[6].mxu0 %vm1892_vm9, %v1862_v35  ;;  %v1764_v30 = vsel %vm1755_vm5, %v1731_v61, %v1160_v34  ;;  %v6226_v34 = vld [vmem:[%s5705_s11 + $0x108] sm:$0xff] }
 0x11b   : > { %921 = vrot.lane.b32.xlu0 %v6115_v28, %s5629_s14 }
 0x11c   : > { %v6135_v41 = vpop.permute.xlu1 %779 }
 0x11d   : > { %v6137_v42 = vpop.permute.xlu0 %653  ;;  %v1667_v21 = vsel %vm1656_vm2, %v1634_v10, %v6135_v41  ;;  %v5227_v10 = vld [vmem:[%s5705_s11 + $0x121] sm:$0xff] }
 0x11e   : > { %1555 = vrot.lane.b32.xlu1 %v5253_v39, %s5634_s7 }
 0x11f   : > { %1429 = vrot.lane.b32.xlu0 %v5222_v40, %s5633_s26 }
 0x120   : > { %v1288_v46 = vpop.permute.xlu1 %1287 }
 0x121   : > { %v1162_v47 = vpop.permute.xlu0 %1161  ;;  %v1797_v18 = vsel %vm1788_vm6, %v1764_v30, %v1288_v46 }
 0x122   : > { %1049 = vrot.lane.b32.xlu1 %v5222_v40, %s5630_s15  ;;  %v1765_v15 = vsel %vm1755_vm5, %v1732_v60, %v1162_v47 }
 0x123   : > { %667 = vrot.lane.b32.xlu0 %v5221_v27, %s5628_s13 }
 0x124   : > { %v6144_v48 = vpop.permute.xlu1 %907 }
 0x125   : > { %v6146_v36 = vpop.permute.xlu0 %781  ;;  %v1700_v35 = vsel %vm1689_vm3, %v1667_v21, %v6144_v48  ;;  %v6319_v21 = vld [vmem:[%s5705_s11 + $0x128] sm:$0xff] }
 0x126   : > { %1557 = vrot.lane.b32.xlu1 %v5254_v45, %s5634_s7 }
 0x127   : > { %1175 = vrot.lane.b32.xlu0 %v5253_v39, %s5631_s16 }
 0x128   : > { %v1416_v50 = vpop.permute.xlu1 %1415 }
 0x129   : > { %v1290_v43 = vpop.permute.xlu0 %1289  ;;  %v1830_v59 = vsel %vm1821_vm7, %v1797_v18, %v1416_v50  ;;  %v1635_v50 = vsel %vm1623_vm1, %v5855_v44, %v6137_v42 }
 0x12a   : > { %795 = vrot.lane.b32.xlu1 %v5253_v39, %s5627_s12  ;;  %v1798_v52 = vsel %vm1788_vm6, %v1765_v15, %v1290_v43  ;;  %v1668_v43 = vsel %vm1656_vm2, %v1635_v50, %v6146_v36 }
 0x12b   : > { %669 = vrot.lane.b32.xlu0 %v5222_v40, %s5628_s13 }
 0x12c   : > { %v1036_v56 = vpop.permute.xlu1 %1035 }
 0x12d   : > { %v6162_v58 = vpop.permute.xlu0 %909  ;;  %v1733_v46 = vsel %vm1722_vm4, %v1700_v35, %v1036_v56 }
 0x12e   : > { %1303 = vrot.lane.b32.xlu1 %v6158_v51, %s5632_s21  ;;  %v1701_v55 = vsel %vm1689_vm3, %v1668_v43, %v6162_v58 }
 0x12f   : > { %1177 = vrot.lane.b32.xlu0 %v5254_v45, %s5631_s16 }
 0x130   : > { %v1544_v62 = vpop.permute.xlu1 %1543 }
 0x131   : > { %v1418_v1 = vpop.permute.xlu0 %1417  ;;  %v1863_v3 = vsel %vm8594_vm8, %v1830_v59, %v1544_v62  ;;  %v5257_v62 = vld [vmem:[%s5705_s11 + $0x10a] sm:$0xff] }
 0x132   : > { %923 = vrot.lane.b32.xlu1 %v6158_v51, %s5629_s14  ;;  %5448 = vmatprep.mubr.msk.f32.mxu0 %vm1892_vm9, %v1863_v3  ;;  %v1831_v24 = vsel %vm1821_vm7, %v1798_v52, %v1418_v1  ;;  %v5226_v1 = vld [vmem:[%s5705_s11 + $0x111] sm:$0xff] }
 0x133   : > { %797 = vrot.lane.b32.xlu0 %v5254_v45, %s5627_s12 }
 0x134   : > { %v1038_v11 = vpop.permute.xlu1 %1037 }
 0x135   : > { %v6187_v32 = vpop.permute.xlu0 %655  ;;  %v1734_v42 = vsel %vm1722_vm4, %v1701_v55, %v1038_v11  ;;  %v5260_v55 = vld [vmem:[%s5705_s11 + $0x12a] sm:$0xff] }
 0x136   : > { %1431 = vrot.lane.b32.xlu1 %v5223_v7, %s5633_s26 }
 0x137   : > { %1305 = vrot.lane.b32.xlu0 %v6183_v8, %s5632_s21 }
 0x138   : > { %v1546_v5 = vpop.permute.xlu1 %1545 }
 0x139   : > { %v1164_v12 = vpop.permute.xlu0 %1163  ;;  %v1864_v13 = vsel %vm8594_vm8, %v1831_v24, %v1546_v5  ;;  %v1636_v24 = vsel %vm1623_vm1, %v5888_v63, %v6187_v32 }
 0x13a   : > { %1051 = vrot.lane.b32.xlu1 %v5223_v7, %s5630_s15  ;;  %5449 = vmatmul.mubr.msk.f32.gmra.mrb[8].mxu0 %vm1892_vm9, %v1864_v13  ;;  %v1766_v38 = vsel %vm1755_vm5, %v1733_v46, %v1164_v12  ;;  %v6294_v12 = vld [vmem:[%s5705_s11 + $0x120] sm:$0xff] }
 0x13b   : > { %925 = vrot.lane.b32.xlu0 %v6183_v8, %s5629_s14 }
 0x13c   : > { %v6203_v20 = vpop.permute.xlu1 %783 }
 0x13d   : > { %v6205_v23 = vpop.permute.xlu0 %657  ;;  %v1669_v5 = vsel %vm1656_vm2, %v1636_v24, %v6203_v20 }
 0x13e   : > { %1559 = vrot.lane.b32.xlu1 %v5255_v16, %s5634_s7 }
 0x13f   : > { %1433 = vrot.lane.b32.xlu0 %v5224_v19, %s5633_s26 }
 0x140   : > { %v1292_v25 = vpop.permute.xlu1 %1291 }
 0x141   : > { %v1166_v27 = vpop.permute.xlu0 %1165  ;;  %v1799_v26 = vsel %vm1788_vm6, %v1766_v38, %v1292_v25 }
 0x142   : > { %1053 = vrot.lane.b32.xlu1 %v5224_v19, %s5630_s15  ;;  %v1767_v61 = vsel %vm1755_vm5, %v1734_v42, %v1166_v27 }
 0x143   : > { %671 = vrot.lane.b32.xlu0 %v5223_v7, %s5628_s13 }
 0x144   : > { %v6212_v33 = vpop.permute.xlu1 %911 }
 0x145   : > { %v6214_v14 = vpop.permute.xlu0 %785  ;;  %v1702_v13 = vsel %vm1689_vm3, %v1669_v5, %v6212_v33 }
 0x146   : > { %1561 = vrot.lane.b32.xlu1 %v5256_v31, %s5634_s7 }
 0x147   : > { %1179 = vrot.lane.b32.xlu0 %v5255_v16, %s5631_s16 }
 0x148   : > { %v1420_v37 = vpop.permute.xlu1 %1419 }
 0x149   : > { %v1294_v22 = vpop.permute.xlu0 %1293  ;;  %v1832_v41 = vsel %vm1821_vm7, %v1799_v26, %v1420_v37  ;;  %v1637_v37 = vsel %vm1623_vm1, %v5911_v17, %v6205_v23 }
 0x14a   : > { %799 = vrot.lane.b32.xlu1 %v5255_v16, %s5627_s12  ;;  %v1800_v36 = vsel %vm1788_vm6, %v1767_v61, %v1294_v22  ;;  %v1670_v22 = vsel %vm1656_vm2, %v1637_v37, %v6214_v14  ;;  %v5261_v37 = vld [vmem:[%s5705_s11 + $0x13a] sm:$0xff] }
 0x14b   : > { %673 = vrot.lane.b32.xlu0 %v5224_v19, %s5628_s13 }
 0x14c   : > { %v1040_v39 = vpop.permute.xlu1 %1039 }
 0x14d   : > { %v6230_v40 = vpop.permute.xlu0 %913  ;;  %v1735_v25 = vsel %vm1722_vm4, %v1702_v13, %v1040_v39  ;;  %v5229_v13 = vld [vmem:[%s5705_s11 + $0x139] sm:$0xff] }
 0x14e   : > { %1307 = vrot.lane.b32.xlu1 %v6226_v34, %s5632_s21  ;;  %v1703_v35 = vsel %vm1689_vm3, %v1670_v22, %v6230_v40  ;;  %v5230_v22 = vld [vmem:[%s5705_s11 + $0x141] sm:$0xff] }
 0x14f   : > { %1181 = vrot.lane.b32.xlu0 %v5256_v31, %s5631_s16 }
 0x150   : > { %v1548_v47 = vpop.permute.xlu1 %1547 }
 0x151   : > { %v1422_v45 = vpop.permute.xlu0 %1421  ;;  %v1865_v48 = vsel %vm8594_vm8, %v1832_v41, %v1548_v47  ;;  %v5259_v47 = vld [vmem:[%s5705_s11 + $0x122] sm:$0xff] }
 0x152   : > { %927 = vrot.lane.b32.xlu1 %v6226_v34, %s5629_s14  ;;  %5451 = vmatprep.mubr.msk.f32.mxu0 %vm1892_vm9, %v1865_v48  ;;  %v1833_v30 = vsel %vm1821_vm7, %v1800_v36, %v1422_v45  ;;  %v5228_v45 = vld [vmem:[%s5705_s11 + $0x129] sm:$0xff] }
 0x153   : > { %801 = vrot.lane.b32.xlu0 %v5256_v31, %s5627_s12 }
 0x154   : > { %v1042_v56 = vpop.permute.xlu1 %1041 }
 0x155   : > { %v6255_v44 = vpop.permute.xlu0 %659  ;;  %v1736_v23 = vsel %vm1722_vm4, %v1703_v35, %v1042_v56 }
 0x156   : > { %1435 = vrot.lane.b32.xlu1 %v5225_v53, %s5633_s26 }
 0x157   : > { %1309 = vrot.lane.b32.xlu0 %v6251_v54, %s5632_s21 }
 0x158   : > { %v1550_v18 = vpop.permute.xlu1 %1549 }
 0x159   : > { %v1168_v58 = vpop.permute.xlu0 %1167  ;;  %v1866_v59 = vsel %vm8594_vm8, %v1833_v30, %v1550_v18  ;;  %v1638_v30 = vsel %vm1623_vm1, %v5957_v49, %v6255_v44 }
 0x15a   : > { %1055 = vrot.lane.b32.xlu1 %v5225_v53, %s5630_s15  ;;  %5452 = vmatmul.mubr.msk.f32.gmra.mrb[10].mxu0 %vm1892_vm9, %v1866_v59  ;;  %v1768_v63 = vsel %vm1755_vm5, %v1735_v25, %v1168_v58  ;;  %v6362_v58 = vld [vmem:[%s5705_s11 + $0x138] sm:$0xff] }
 0x15b   : > { %929 = vrot.lane.b32.xlu0 %v6251_v54, %s5629_s14 }
 0x15c   : > { %v6271_v3 = vpop.permute.xlu1 %787 }
 0x15d   : > { %v6273_v4 = vpop.permute.xlu0 %661  ;;  %v1671_v18 = vsel %vm1656_vm2, %v1638_v30, %v6271_v3 }
 0x15e   : > { %1563 = vrot.lane.b32.xlu1 %v5257_v62, %s5634_s7  ;;  %v1639_v24 = vsel %vm1623_vm1, %v5979_v0, %v6273_v4 }
 0x15f   : > { %1437 = vrot.lane.b32.xlu0 %v5226_v1, %s5633_s26 }
 0x160   : > { %v1296_v57 = vpop.permute.xlu1 %1295 }
 0x161   : > { %v1170_v7 = vpop.permute.xlu0 %1169  ;;  %v1801_v32 = vsel %vm1788_vm6, %v1768_v63, %v1296_v57 }
 0x162   : > { %1057 = vrot.lane.b32.xlu1 %v5226_v1, %s5630_s15  ;;  %v1769_v46 = vsel %vm1755_vm5, %v1736_v23, %v1170_v7 }
 0x163   : > { %675 = vrot.lane.b32.xlu0 %v5225_v53, %s5628_s13 }
 0x164   : > { %v6280_v11 = vpop.permute.xlu1 %915 }
 0x165   : > { %v6282_v60 = vpop.permute.xlu0 %789  ;;  %v1704_v59 = vsel %vm1689_vm3, %v1671_v18, %v6280_v11 }
 0x166   : > { %1565 = vrot.lane.b32.xlu1 %v5258_v9, %s5634_s7  ;;  %v1672_v5 = vsel %vm1656_vm2, %v1639_v24, %v6282_v60 }
 0x167   : > { %1183 = vrot.lane.b32.xlu0 %v5257_v62, %s5631_s16 }
 0x168   : > { %v1424_v15 = vpop.permute.xlu1 %1423 }
 0x169   : > { %v1298_v52 = vpop.permute.xlu0 %1297  ;;  %v1834_v20 = vsel %vm1821_vm7, %v1801_v32, %v1424_v15 }
 0x16a   : > { %803 = vrot.lane.b32.xlu1 %v5257_v62, %s5627_s12  ;;  %v1802_v14 = vsel %vm1788_vm6, %v1769_v46, %v1298_v52  ;;  %v5262_v46 = vld [vmem:[%s5705_s11 + $0x142] sm:$0xff] }
 0x16b   : > { %677 = vrot.lane.b32.xlu0 %v5226_v1, %s5628_s13 }
 0x16c   : > { %v1044_v16 = vpop.permute.xlu1 %1043 }
 0x16d   : > { %v6298_v19 = vpop.permute.xlu0 %917  ;;  %v1737_v57 = vsel %vm1722_vm4, %v1704_v59, %v1044_v16  ;;  %v6393_v16 = vld [vmem:[%s5705_s11 + $0x140] sm:$0xff] }
 0x16e   : > { %1311 = vrot.lane.b32.xlu1 %v6294_v12, %s5632_s21  ;;  %v1705_v25 = vsel %vm1689_vm3, %v1672_v5, %v6298_v19 }
 0x16f   : > { %1185 = vrot.lane.b32.xlu0 %v5258_v9, %s5631_s16 }
 0x170   : > { %v1552_v27 = vpop.permute.xlu1 %1551 }
 0x171   : > { %v1426_v31 = vpop.permute.xlu0 %1425  ;;  %v1867_v33 = vsel %vm8594_vm8, %v1834_v20, %v1552_v27  ;;  %v5635_v20 = vmov 0  }
 0x172   : > { %931 = vrot.lane.b32.xlu1 %v6294_v12, %s5629_s14  ;;  %5454 = vmatprep.mubr.msk.f32.mxu0 %vm1892_vm9, %v1867_v33  ;;  %v1835_v38 = vsel %vm1821_vm7, %v1802_v14, %v1426_v31 }
 0x173   : > { %805 = vrot.lane.b32.xlu0 %v5258_v9, %s5627_s12 }
 0x174   : > { %v1046_v39 = vpop.permute.xlu1 %1045  ;;  %5614 = vset.pattern.permute.xlu0 %v5635_v20  ;;  %v5264_v20 = vld [vmem:[%s5705_s11 + $0x15a] sm:$0xff] }
 0x175   : > { %v6323_v17 = vpop.permute.xlu0 %663  ;;  %v1738_v4 = vsel %vm1722_vm4, %v1705_v25, %v1046_v39  ;;  %v5232_v25 = vld [vmem:[%s5705_s11 + $0x159] sm:$0xff] }
 0x176   : > { %1439 = vrot.lane.b32.xlu1 %v5227_v10, %s5633_s26 }
 0x177   : > { %1313 = vrot.lane.b32.xlu0 %v6319_v21, %s5632_s21 }
 0x178   : > { %v1554_v26 = vpop.permute.xlu1 %1553 }
 0x179   : > { %v1172_v40 = vpop.permute.xlu0 %1171  ;;  %v1868_v41 = vsel %vm8594_vm8, %v1835_v38, %v1554_v26 }
 0x17a   : > { %1059 = vrot.lane.b32.xlu1 %v5227_v10, %s5630_s15  ;;  %5455 = vmatmul.mubr.msk.f32.gmra.mrb[12].mxu0 %vm1892_vm9, %v1868_v41  ;;  %v1770_v49 = vsel %vm1755_vm5, %v1737_v57, %v1172_v40  ;;  %v1640_v41 = vsel %vm1623_vm1, %v6022_v29, %v6323_v17 }
 0x17b   : > { %933 = vrot.lane.b32.xlu0 %v6319_v21, %s5629_s14 }
 0x17c   : > { %v6339_v48 = vpop.permute.xlu1 %791 }
 0x17d   : > { %v6341_v50 = vpop.permute.xlu0 %665 }
 0x17e   : > { %1567 = vrot.lane.b32.xlu1 %v5259_v47, %s5634_s7 }
 0x17f   : > { %1441 = vrot.lane.b32.xlu0 %v5228_v45, %s5633_s26 }
 0x180   : > { %v1300_v43 = vpop.permute.xlu1 %1299 }
 0x181   : > { %v1174_v53 = vpop.permute.xlu0 %1173  ;;  %v1803_v3 = vsel %vm1788_vm6, %v1770_v49, %v1300_v43  ;;  %v5231_v49 = vld [vmem:[%s5705_s11 + $0x151] sm:$0xff] }
 0x182   : > { %1061 = vrot.lane.b32.xlu1 %v5228_v45, %s5630_s15  ;;  %v1771_v32 = vsel %vm1755_vm5, %v1738_v4, %v1174_v53 }
 0x183   : > { %679 = vrot.lane.b32.xlu0 %v5227_v10, %s5628_s13 }
 0x184   : > { %v6348_v56 = vpop.permute.xlu1 %919 }
 0x185   : > { %v6350_v42 = vpop.permute.xlu0 %793 }
 0x186   : > { %1569 = vrot.lane.b32.xlu1 %v5260_v55, %s5634_s7 }
 0x187   : > { %1187 = vrot.lane.b32.xlu0 %v5259_v47, %s5631_s16 }
 0x188   : > { %v1428_v61 = vpop.permute.xlu1 %1427 }
 0x189   : > { %v1302_v36 = vpop.permute.xlu0 %1301  ;;  %v1836_v9 = vsel %vm1821_vm7, %v1803_v3, %v1428_v61  ;;  %v6468_v3 = vld [vmem:[%s5705_s11 + $0x158] sm:$0xff] }
 0x18a   : > { %807 = vrot.lane.b32.xlu1 %v5259_v47, %s5627_s12  ;;  %v1804_v60 = vsel %vm1788_vm6, %v1771_v32, %v1302_v36  ;;  %v1673_v47 = vsel %vm1656_vm2, %v1640_v41, %v6339_v48 }
 0x18b   : > { %681 = vrot.lane.b32.xlu0 %v5228_v45, %s5628_s13  ;;  %v6438_v45 = vld [vmem:[%s5705_s11 + $0x150] sm:$0xff]  ;;  %v1706_v43 = vsel %vm1689_vm3, %v1673_v47, %v6348_v56 }
 0x18c   : > { %v6366_v62 = vpop.permute.xlu1 %1047 }
 0x18d   : > { %v6368_v1 = vpop.permute.xlu0 %921  ;;  %v6372_v44 = vpop.f32.mrb[0].mxu0  ;;  %v1739_v61 = vsel %vm1722_vm4, %v1706_v43, %v6366_v62  ;;  %v1641_v62 = vsel %vm1623_vm1, %v6047_v6, %v6341_v50 }
 0x18e   : > { %1315 = vrot.lane.b32.xlu1 %v6362_v58, %s5632_s21  ;;  %v6378_v7 = vpop.f32.mrb[1].mxu0  ;;  %v1674_v57 = vsel %vm1656_vm2, %v1641_v62, %v6350_v42  ;;  %vm2219_vm12 = vcmp.gt.f32.partialorder %v6372_v44, 0.0 }
 0x18f   : > { %1189 = vrot.lane.b32.xlu0 %v5260_v55, %s5631_s16  ;;  %vm2218_vm13 = vcmp.gt.f32.partialorder %v6378_v7, 0.0 }
 0x190   : > { %v1556_v11 = vpop.permute.xlu1 %1555 }
 0x191   : > { %v1430_v15 = vpop.permute.xlu0 %1429  ;;  %v1869_v52 = vsel %vm8594_vm8, %v1836_v9, %v1556_v11  ;;  %v1707_v9 = vsel %vm1689_vm3, %v1674_v57, %v6368_v1 }
 0x192   : > { %935 = vrot.lane.b32.xlu1 %v6362_v58, %s5629_s14  ;;  %5457 = vmatprep.mubr.msk.f32.mxu0 %vm1892_vm9, %v1869_v52  ;;  %v1837_v19 = vsel %vm1821_vm7, %v1804_v60, %v1430_v15 }
 0x193   : > { %809 = vrot.lane.b32.xlu0 %v5260_v55, %s5627_s12 }
 0x194   : > { %v6397_v63 = vpop.permute.xlu1 %1049 }
 0x195   : > { %v6399_v0 = vpop.permute.xlu0 %667  ;;  %v1740_v50 = vsel %vm1722_vm4, %v1707_v9, %v6397_v63  ;;  %v5265_v9 = vld [vmem:[%s5705_s11 + $0x16a] sm:$0xff] }
 0x196   : > { %1443 = vrot.lane.b32.xlu1 %v5229_v13, %s5633_s26 }
 0x197   : > { %1317 = vrot.lane.b32.xlu0 %v6393_v16, %s5632_s21 }
 0x198   : > { %v1558_v27 = vpop.permute.xlu1 %1557 }
 0x199   : > { %v1176_v31 = vpop.permute.xlu0 %1175  ;;  %v1870_v33 = vsel %vm8594_vm8, %v1837_v19, %v1558_v27 }
 0x19a   : > { %1063 = vrot.lane.b32.xlu1 %v5229_v13, %s5630_s15  ;;  %5458 = vmatmul.mubr.msk.f32.gmra.mrb[14].mxu0 %vm1892_vm9, %v1870_v33  ;;  %v1772_v29 = vsel %vm1755_vm5, %v1739_v61, %v1176_v31 }
 0x19b   : > { %937 = vrot.lane.b32.xlu0 %v6393_v16, %s5629_s14 }
 0x19c   : > { %v6415_v10 = vpop.permute.xlu1 %795 }
 0x19d   : > { %v6417_v35 = vpop.permute.xlu0 %669 }
 0x19e   : > { %1571 = vrot.lane.b32.xlu1 %v5261_v37, %s5634_s7  ;;  %v1643_v61 = vsel %vm1623_vm1, %v6115_v28, %v6417_v35 }
 0x19f   : > { %1445 = vrot.lane.b32.xlu0 %v5230_v22, %s5633_s26 }
 0x1a0   : > { %v1304_v39 = vpop.permute.xlu1 %1303 }
 0x1a1   : > { %v1178_v23 = vpop.permute.xlu0 %1177  ;;  %v1805_v48 = vsel %vm1788_vm6, %v1772_v29, %v1304_v39  ;;  %v6512_v39 = vld [vmem:[%s5705_s11 + $0x168] sm:$0xff] }
 0x1a2   : > { %1065 = vrot.lane.b32.xlu1 %v5230_v22, %s5630_s15  ;;  %v1773_v15 = vsel %vm1755_vm5, %v1740_v50, %v1178_v23 }
 0x1a3   : > { %683 = vrot.lane.b32.xlu0 %v5229_v13, %s5628_s13  ;;  %v5263_v13 = vld [vmem:[%s5705_s11 + $0x152] sm:$0xff] }
 0x1a4   : > { %v6424_v14 = vpop.permute.xlu1 %923 }
 0x1a5   : > { %v6426_v38 = vpop.permute.xlu0 %797 }
 0x1a6   : > { %1573 = vrot.lane.b32.xlu1 %v5262_v46, %s5634_s7  ;;  %v1676_v29 = vsel %vm1656_vm2, %v1643_v61, %v6426_v38 }
 0x1a7   : > { %1191 = vrot.lane.b32.xlu0 %v5261_v37, %s5631_s16 }
 0x1a8   : > { %v1432_v26 = vpop.permute.xlu1 %1431 }
 0x1a9   : > { %v1306_v40 = vpop.permute.xlu0 %1305  ;;  %v1838_v36 = vsel %vm1821_vm7, %v1805_v48, %v1432_v26  ;;  %v5233_v48 = vld [vmem:[%s5705_s11 + $0x169] sm:$0xff] }
 0x1aa   : > { %811 = vrot.lane.b32.xlu1 %v5261_v37, %s5627_s12  ;;  %v1806_v42 = vsel %vm1788_vm6, %v1773_v15, %v1306_v40  ;;  %v1642_v37 = vsel %vm1623_vm1, %v6090_v2, %v6399_v0 }
 0x1ab   : > { %685 = vrot.lane.b32.xlu0 %v5230_v22, %s5628_s13  ;;  %v1675_v22 = vsel %vm1656_vm2, %v1642_v37, %v6415_v10 }
 0x1ac   : > { %v1052_v53 = vpop.permute.xlu1 %1051  ;;  %v1708_v23 = vsel %vm1689_vm3, %v1675_v22, %v6424_v14 }
 0x1ad   : > { %v6442_v55 = vpop.permute.xlu0 %925  ;;  %v6447_v17 = vpop.f32.mrb[2].mxu0  ;;  %v1741_v40 = vsel %vm1722_vm4, %v1708_v23, %v1052_v53 }
 0x1ae   : > { %8621 = vst [vmem:[#allocation4_spill] sm:$0xff] %v6447_v17  ;;  %1319 = vrot.lane.b32.xlu1 %v6438_v45, %s5632_s21  ;;  %v6453_v56 = vpop.f32.mrb[3].mxu0  ;;  %vm2221_vm14 = vcmp.gt.f32.partialorder %v6447_v17, 0.0 }
 0x1af   : > { %1193 = vrot.lane.b32.xlu0 %v5262_v46, %s5631_s16  ;;  %vm2220_vm15 = vcmp.gt.f32.partialorder %v6453_v56, 0.0 }
 0x1b0   : > { %v1560_v30 = vpop.permute.xlu1 %1559 }
 0x1b1   : > { %v1434_v18 = vpop.permute.xlu0 %1433  ;;  %v1871_v59 = vsel %vm8594_vm8, %v1838_v36, %v1560_v30  ;;  %v6541_v36 = vld [vmem:[%s5705_s11 + $0x170] sm:$0xff]  ;;  %v1709_v30 = vsel %vm1689_vm3, %v1676_v29, %v6442_v55 }
 0x1b2   : > { %939 = vrot.lane.b32.xlu1 %v6438_v45, %s5629_s14  ;;  %5460 = vmatprep.mubr.msk.f32.mxu0 %vm1892_vm9, %v1871_v59  ;;  %v1839_v52 = vsel %vm1821_vm7, %v1806_v42, %v1434_v18 }
 0x1b3   : > { %813 = vrot.lane.b32.xlu0 %v5262_v46, %s5627_s12 }
 0x1b4   : > { %v1054_v11 = vpop.permute.xlu1 %1053 }
 0x1b5   : > { %v6472_v6 = vpop.permute.xlu0 %671  ;;  %v1742_v35 = vsel %vm1722_vm4, %v1709_v30, %v1054_v11  ;;  %v5234_v11 = vld [vmem:[%s5705_s11 + $0x171] sm:$0xff] }
 0x1b6   : > { %1447 = vrot.lane.b32.xlu1 %v5231_v49, %s5633_s26 }
 0x1b7   : > { %1321 = vrot.lane.b32.xlu0 %v6468_v3, %s5632_s21 }
 0x1b8   : > { %v1562_v24 = vpop.permute.xlu1 %1561 }
 0x1b9   : > { %v1180_v1 = vpop.permute.xlu0 %1179  ;;  %v1872_v5 = vsel %vm8594_vm8, %v1839_v52, %v1562_v24  ;;  %v5266_v24 = vld [vmem:[%s5705_s11 + $0x172] sm:$0xff] }
 0x1ba   : > { %1067 = vrot.lane.b32.xlu1 %v5231_v49, %s5630_s15  ;;  %5461 = vmatmul.mubr.msk.f32.gmra.mrb[16].mxu0 %vm1892_vm9, %v1872_v5  ;;  %v1774_v2 = vsel %vm1755_vm5, %v1741_v40, %v1180_v1 }
 0x1bb   : > { %941 = vrot.lane.b32.xlu0 %v6468_v3, %s5629_s14 }
 0x1bc   : > { %v6489_v63 = vpop.permute.xlu1 %799 }
 0x1bd   : > { %v6491_v4 = vpop.permute.xlu0 %673 }
 0x1be   : > { %1575 = vrot.lane.b32.xlu1 %v5263_v13, %s5634_s7 }
 0x1bf   : > { %1449 = vrot.lane.b32.xlu0 %v5232_v25, %s5633_s26 }
 0x1c0   : > { %v1308_v32 = vpop.permute.xlu1 %1307 }
 0x1c1   : > { %v1182_v60 = vpop.permute.xlu0 %1181  ;;  %v1807_v10 = vsel %vm1788_vm6, %v1774_v2, %v1308_v32  ;;  %v1644_v32 = vsel %vm1623_vm1, %v6158_v51, %v6472_v6 }
 0x1c2   : > { %1069 = vrot.lane.b32.xlu1 %v5232_v25, %s5630_s15  ;;  %v1775_v59 = vsel %vm1755_vm5, %v1742_v35, %v1182_v60  ;;  %v1677_v60 = vsel %vm1656_vm2, %v1644_v32, %v6489_v63 }
 0x1c3   : > { %687 = vrot.lane.b32.xlu0 %v5231_v49, %s5628_s13 }
 0x1c4   : > { %v6498_v19 = vpop.permute.xlu1 %927 }
 0x1c5   : > { %v6500_v27 = vpop.permute.xlu0 %801 }
 0x1c6   : > { %1577 = vrot.lane.b32.xlu1 %v5264_v20, %s5634_s7 }
 0x1c7   : > { %1195 = vrot.lane.b32.xlu0 %v5263_v13, %s5631_s16 }
 0x1c8   : > { %v1436_v31 = vpop.permute.xlu1 %1435 }
 0x1c9   : > { %v1310_v33 = vpop.permute.xlu0 %1309  ;;  %v1840_v14 = vsel %vm1821_vm7, %v1807_v10, %v1436_v31  ;;  %v1710_v31 = vsel %vm1689_vm3, %v1677_v60, %v6498_v19  ;;  %v1645_v10 = vsel %vm1623_vm1, %v6183_v8, %v6491_v4  ;;  %v5238_v60 = vld [vmem:[%s5705_s11 + $0x1a1] sm:$0xff] }
 0x1ca   : > { %815 = vrot.lane.b32.xlu1 %v5263_v13, %s5627_s12  ;;  %v1808_v38 = vsel %vm1788_vm6, %v1775_v59, %v1310_v33  ;;  %v5236_v59 = vld [vmem:[%s5705_s11 + $0x189] sm:$0xff] }
 0x1cb   : > { %689 = vrot.lane.b32.xlu0 %v5232_v25, %s5628_s13 }
 0x1cc   : > { %v1056_v46 = vpop.permute.xlu1 %1055 }
 0x1cd   : > { %v6516_v26 = vpop.permute.xlu0 %929  ;;  %v6520_v0 = vpop.f32.mrb[4].mxu0  ;;  %v1743_v22 = vsel %vm1722_vm4, %v1710_v31, %v1056_v46 }
 0x1ce   : > { %8622 = vst [vmem:[#allocation5_spill] sm:$0xff] %v6520_v0  ;;  %1323 = vrot.lane.b32.xlu1 %v6512_v39, %s5632_s21  ;;  %v6526_v41 = vpop.f32.mrb[5].mxu0  ;;  %vm2223_vm0 = vcmp.gt.f32.partialorder %v6520_v0, 0.0 }
 0x1cf   : > { %1197 = vrot.lane.b32.xlu0 %v5264_v20, %s5631_s16  ;;  %8623 = vst [vmem:[#allocation6_spill] sm:$0xff] %v6526_v41 }
 0x1d0   : > { %v1564_v47 = vpop.permute.xlu1 %1563 }
 0x1d1   : > { %v1438_v43 = vpop.permute.xlu0 %1437  ;;  %v1873_v53 = vsel %vm8594_vm8, %v1840_v14, %v1564_v47  ;;  %v1678_v14 = vsel %vm1656_vm2, %v1645_v10, %v6500_v27  ;;  %v5235_v47 = vld [vmem:[%s5705_s11 + $0x181] sm:$0xff] }
 0x1d2   : > { %943 = vrot.lane.b32.xlu1 %v6512_v39, %s5629_s14  ;;  %5463 = vmatprep.mubr.msk.f32.mxu0 %vm1892_vm9, %v1873_v53  ;;  %v1841_v62 = vsel %vm1821_vm7, %v1808_v38, %v1438_v43  ;;  %v5204_v43 = vld [vmem:[%s5705_s11 + $0x188] sm:$0xff]  ;;  %v1711_v53 = vsel %vm1689_vm3, %v1678_v14, %v6516_v26 }
 0x1d3   : > { %817 = vrot.lane.b32.xlu0 %v5264_v20, %s5627_s12  ;;  %v5203_v20 = vld [vmem:[%s5705_s11 + $0x180] sm:$0xff] }
 0x1d4   : > { %v1058_v18 = vpop.permute.xlu1 %1057 }
 0x1d5   : > { %v6545_v28 = vpop.permute.xlu0 %675  ;;  %v1744_v8 = vsel %vm1722_vm4, %v1711_v53, %v1058_v18  ;;  %v5267_v18 = vld [vmem:[%s5705_s11 + $0x182] sm:$0xff]  ;;  %v5304_v53 = vld [vmem:[#allocation3] ss:$0 sm:$0xff] }
 0x1d6   : > { %1451 = vrot.lane.b32.xlu1 %v5233_v48, %s5633_s26 }
 0x1d7   : > { %1325 = vrot.lane.b32.xlu0 %v6541_v36, %s5632_s21 }
 0x1d8   : > { %v1566_v57 = vpop.permute.xlu1 %1565 }
 0x1d9   : > { %v1184_v55 = vpop.permute.xlu0 %1183  ;;  %v1874_v49 = vsel %vm8594_vm8, %v1841_v62, %v1566_v57 }
 0x1da   : > { %1071 = vrot.lane.b32.xlu1 %v5233_v48, %s5630_s15  ;;  %5464 = vmatmul.mubr.msk.f32.gmra.mrb[18].mxu0 %vm1892_vm9, %v1874_v49  ;;  %v1776_v51 = vsel %vm1755_vm5, %v1743_v22, %v1184_v55  ;;  %v5174_v49 = vld [vmem:[%s5705_s11 + $0x18a] sm:$0xff] }
 0x1db   : > { %945 = vrot.lane.b32.xlu0 %v6541_v36, %s5629_s14 }
 0x1dc   : > { %v6561_v50 = vpop.permute.xlu1 %803 }
 0x1dd   : > { %v6563_v15 = vpop.permute.xlu0 %677 }
 0x1de   : > { %1579 = vrot.lane.b32.xlu1 %v5265_v9, %s5634_s7 }
 0x1df   : > { %1453 = vrot.lane.b32.xlu0 %v5234_v11, %s5633_s26 }
 0x1e0   : > { %v1312_v42 = vpop.permute.xlu1 %1311 }
 0x1e1   : > { %v1186_v52 = vpop.permute.xlu0 %1185  ;;  %v1809_v63 = vsel %vm1788_vm6, %v1776_v51, %v1312_v42  ;;  %v5206_v42 = vld [vmem:[%s5705_s11 + $0x1a0] sm:$0xff] }
 0x1e2   : > { %1073 = vrot.lane.b32.xlu1 %v5234_v11, %s5630_s15  ;;  %v1777_v4 = vsel %vm1755_vm5, %v1744_v8, %v1186_v52  ;;  %v5205_v52 = vld [vmem:[%s5705_s11 + $0x198] sm:$0xff] }
 0x1e3   : > { %691 = vrot.lane.b32.xlu0 %v5233_v48, %s5628_s13 }
 0x1e4   : > { %v6570_v1 = vpop.permute.xlu1 %931 }
 0x1e5   : > { %v6572_v5 = vpop.permute.xlu0 %805 }
 0x1e6   : > { %1581 = vrot.lane.b32.xlu1 %v5266_v24, %s5634_s7 }
 0x1e7   : > { %1199 = vrot.lane.b32.xlu0 %v5265_v9, %s5631_s16 }
 0x1e8   : > { %v1440_v13 = vpop.permute.xlu1 %1439 }
 0x1e9   : > { %v1314_v25 = vpop.permute.xlu0 %1313  ;;  %v1842_v19 = vsel %vm1821_vm7, %v1809_v63, %v1440_v13  ;;  %v8595_v63 = vmov 0.0  }
 0x1ea   : > { %819 = vrot.lane.b32.xlu1 %v5265_v9, %s5627_s12  ;;  %v1810_v27 = vsel %vm1788_vm6, %v1777_v4, %v1314_v25  ;;  %v1646_v25 = vsel %vm1623_vm1, %v6226_v34, %v6545_v28  ;;  %2323 = vst.msk [vmem:[#allocation2] sm:$0xff] %vm1656_vm2, %v8595_v63  ;;  %2324 = vst.msk [vmem:[#allocation2 + $0x8] sm:$0xff] %vm1656_vm2, %v8595_v63  ;;  %5550 = vmatprep.subr.mxu0 %v8595_v63 }
 0x1eb   : > { %693 = vrot.lane.b32.xlu0 %v5234_v11, %s5628_s13  ;;  %v1679_v32 = vsel %vm1656_vm2, %v1646_v25, %v6561_v50  ;;  %2328 = vst.msk [vmem:[#allocation2 + $0x198] sm:$0xff] %vm1656_vm2, %v8595_v63  ;;  %2329 = vst.msk [vmem:[#allocation2 + $0x1a0] sm:$0xff] %vm1656_vm2, %v8595_v63 }
 0x1ec   : > { %v6586_v33 = vpop.permute.xlu1 %1059  ;;  %v1712_v31 = vsel %vm1689_vm3, %v1679_v32, %v6570_v1  ;;  %2326 = vst.msk [vmem:[#allocation2 + $0x10] sm:$0x3] %vm2325_vm10, %v8595_v63  ;;  %2330 = vst.msk [vmem:[#allocation2 + $0x1a8] sm:$0x3] %vm2325_vm10, %v8595_v63 }
 0x1ed   : > { %v6588_v37 = vpop.permute.xlu0 %933  ;;  %v6592_v6 = vpop.f32.mrb[6].mxu0  ;;  %v1745_v34 = vsel %vm1722_vm4, %v1712_v31, %v6586_v33  ;;  %2350 = vst.msk [vmem:[#allocation2 + $0x11] sm:$0x1] %vm2331_vm11, %v8595_v63  ;;  %2332 = vst.msk [vmem:[#allocation2] sm:$0x1] %vm2331_vm11, %v8595_v63 }
 0x1ee   : > { %8624 = vst [vmem:[#allocation7_spill] sm:$0xff] %v6592_v6  ;;  %1327 = vrot.lane.b32.xlu1 %v5203_v20, %s5632_s21  ;;  %v6597_v23 = vpop.f32.mrb[7].mxu0  ;;  %2333 = vst.msk [vmem:[#allocation2 + $0x18] sm:$0x1] %vm2331_vm11, %v8595_v63 }
 0x1ef   : > { %1201 = vrot.lane.b32.xlu0 %v5266_v24, %s5631_s16  ;;  %8625 = vst [vmem:[#allocation8_spill] sm:$0xff] %v6597_v23  ;;  %2334 = vst.msk [vmem:[#allocation2 + $0x30] sm:$0x1] %vm2331_vm11, %v8595_v63 }
 0x1f0   : > { %v1568_v40 = vpop.permute.xlu1 %1567  ;;  %2335 = vst.msk [vmem:[#allocation2 + $0x48] sm:$0x1] %vm2331_vm11, %v8595_v63  ;;  %2336 = vst.msk [vmem:[#allocation2 + $0x60] sm:$0x1] %vm2331_vm11, %v8595_v63 }
 0x1f1   : > { %v1442_v2 = vpop.permute.xlu0 %1441  ;;  %v1875_v46 = vsel %vm8594_vm8, %v1842_v19, %v1568_v40  ;;  %v5270_v40 = vld [vmem:[%s5705_s11 + $0x1a2] sm:$0xff]  ;;  %2337 = vst.msk [vmem:[#allocation2 + $0x78] sm:$0x1] %vm2331_vm11, %v8595_v63  ;;  %2338 = vst.msk [vmem:[#allocation2 + $0x90] sm:$0x1] %vm2331_vm11, %v8595_v63 }
 0x1f2   : > { %947 = vrot.lane.b32.xlu1 %v5203_v20, %s5629_s14  ;;  %5466 = vmatprep.mubr.msk.f32.mxu0 %vm1892_vm9, %v1875_v46  ;;  %v1843_v48 = vsel %vm1821_vm7, %v1810_v27, %v1442_v2  ;;  %v5237_v20 = vld [vmem:[%s5705_s11 + $0x199] sm:$0xff]  ;;  %v2433_v8 = vld [vmem:[#allocation2 + $0x1] sm:$0xff]  ;;  %2339 = vst.msk [vmem:[#allocation2 + $0xa8] sm:$0x1] %vm2331_vm11, %v8595_v63  ;;  %2340 = vst.msk [vmem:[#allocation2 + $0xc0] sm:$0x1] %vm2331_vm11, %v8595_v63 }
 0x1f3   : > { %821 = vrot.lane.b32.xlu0 %v5266_v24, %s5627_s12  ;;  %v5269_v2 = vld [vmem:[%s5705_s11 + $0x19a] sm:$0xff]  ;;  %2341 = vst.msk [vmem:[#allocation2 + $0xd8] sm:$0x1] %vm2331_vm11, %v8595_v63  ;;  %2342 = vst.msk [vmem:[#allocation2 + $0xf0] sm:$0x1] %vm2331_vm11, %v8595_v63  ;;  %s5639_s11 = smov 56  }
 0x1f4   : > { %v6613_v61 = vpop.permute.xlu1 %1061  ;;  %2343 = vst.msk [vmem:[#allocation2 + $0x108] sm:$0x1] %vm2331_vm11, %v8595_v63  ;;  %2344 = vst.msk [vmem:[#allocation2 + $0x120] sm:$0x1] %vm2331_vm11, %v8595_v63 }
 0x1f5   : > { %v6615_v29 = vpop.permute.xlu0 %679  ;;  %2345 = vst.msk [vmem:[#allocation2 + $0x138] sm:$0x1] %vm2331_vm11, %v8595_v63  ;;  %2346 = vst.msk [vmem:[#allocation2 + $0x150] sm:$0x1] %vm2331_vm11, %v8595_v63 }
 0x1f6   : > { %1455 = vrot.lane.b32.xlu1 %v5235_v47, %s5633_s26  ;;  %2347 = vst.msk [vmem:[#allocation2 + $0x168] sm:$0x1] %vm2331_vm11, %v8595_v63  ;;  %2348 = vst.msk [vmem:[#allocation2 + $0x180] sm:$0x1] %vm2331_vm11, %v8595_v63  ;;  %v1648_v32 = vsel %vm1623_vm1, %v6294_v12, %v6615_v29 }
 0x1f7   : > { %1329 = vrot.lane.b32.xlu0 %v5204_v43, %s5632_s21  ;;  %2349 = vst.msk [vmem:[#allocation2 + $0x198] sm:$0x1] %vm2331_vm11, %v8595_v63  ;;  %2351 = vst.msk [vmem:[#allocation2 + $0x29] sm:$0x1] %vm2331_vm11, %v8595_v63 }
 0x1f8   : > { %v1570_v30 = vpop.permute.xlu1 %1569  ;;  %2352 = vst.msk [vmem:[#allocation2 + $0x41] sm:$0x1] %vm2331_vm11, %v8595_v63  ;;  %2353 = vst.msk [vmem:[#allocation2 + $0x59] sm:$0x1] %vm2331_vm11, %v8595_v63 }
 0x1f9   : > { %v1188_v26 = vpop.permute.xlu0 %1187  ;;  %v1876_v35 = vsel %vm8594_vm8, %v1843_v48, %v1570_v30  ;;  %2354 = vst.msk [vmem:[#allocation2 + $0x71] sm:$0x1] %vm2331_vm11, %v8595_v63  ;;  %2355 = vst.msk [vmem:[#allocation2 + $0x89] sm:$0x1] %vm2331_vm11, %v8595_v63 }
 0x1fa   : > { %1075 = vrot.lane.b32.xlu1 %v5235_v47, %s5630_s15  ;;  %5467 = vmatmul.mubr.msk.f32.gmra.mrb[20].mxu0 %vm1892_vm9, %v1876_v35  ;;  %v1778_v28 = vsel %vm1755_vm5, %v1745_v34, %v1188_v26  ;;  %v1647_v47 = vsel %vm1623_vm1, %v6251_v54, %v6563_v15  ;;  %2356 = vst.msk [vmem:[#allocation2 + $0xa1] sm:$0x1] %vm2331_vm11, %v8595_v63  ;;  %2357 = vst.msk [vmem:[#allocation2 + $0xb9] sm:$0x1] %vm2331_vm11, %v8595_v63 }
 0x1fb   : > { %949 = vrot.lane.b32.xlu0 %v5204_v43, %s5629_s14  ;;  %v1680_v43 = vsel %vm1656_vm2, %v1647_v47, %v6572_v5  ;;  %2358 = vst.msk [vmem:[#allocation2 + $0xd1] sm:$0x1] %vm2331_vm11, %v8595_v63  ;;  %2359 = vst.msk [vmem:[#allocation2 + $0xe9] sm:$0x1] %vm2331_vm11, %v8595_v63 }
 0x1fc   : > { %v6629_v38 = vpop.permute.xlu1 %807  ;;  %v1713_v4 = vsel %vm1689_vm3, %v1680_v43, %v6588_v37  ;;  %2360 = vst.msk [vmem:[#allocation2 + $0x101] sm:$0x1] %vm2331_vm11, %v8595_v63  ;;  %2361 = vst.msk [vmem:[#allocation2 + $0x119] sm:$0x1] %vm2331_vm11, %v8595_v63  ;;  %v2434_v37 = vld [vmem:[#allocation2 + $0x9] sm:$0xff] }
 0x1fd   : > { %v6631_v62 = vpop.permute.xlu0 %681  ;;  %2362 = vst.msk [vmem:[#allocation2 + $0x131] sm:$0x1] %vm2331_vm11, %v8595_v63  ;;  %2363 = vst.msk [vmem:[#allocation2 + $0x149] sm:$0x1] %vm2331_vm11, %v8595_v63  ;;  %v1746_v54 = vsel %vm1722_vm4, %v1713_v4, %v6613_v61  ;;  %v2466_v61 = vld [vmem:[#allocation2 + $0xa] sm:$0xff] }
 0x1fe   : > { %1583 = vrot.lane.b32.xlu1 %v5267_v18, %s5634_s7  ;;  %2364 = vst.msk [vmem:[#allocation2 + $0x161] sm:$0x1] %vm2331_vm11, %v8595_v63  ;;  %2365 = vst.msk [vmem:[#allocation2 + $0x179] sm:$0x1] %vm2331_vm11, %v8595_v63 }
 0x1ff   : > { %1457 = vrot.lane.b32.xlu0 %v5236_v59, %s5633_s26  ;;  %2366 = vst.msk [vmem:[#allocation2 + $0x191] sm:$0x1] %vm2331_vm11, %v8595_v63  ;;  %2367 = vst.msk [vmem:[#allocation2 + $0x1a9] sm:$0x1] %vm2331_vm11, %v8595_v63 }
 0x200   : > { %v1316_v57 = vpop.permute.xlu1 %1315 }
 0x201   : > { %v6635_v55 = vpop.permute.xlu0 %1189  ;;  %v1811_v1 = vsel %vm1788_vm6, %v1778_v28, %v1316_v57 }
 0x202   : > { %1203 = vrot.lane.b32.xlu1 %v5267_v18, %s5631_s16  ;;  %v1779_v15 = vsel %vm1755_vm5, %v1746_v54, %v6635_v55  ;;  %v2465_v18 = vld [vmem:[#allocation2 + $0x2] sm:$0xff] }
 0x203   : > { %1077 = vrot.lane.b32.xlu0 %v5236_v59, %s5630_s15 }
 0x204   : > { %v6640_v9 = vpop.permute.xlu1 %935 }
 0x205   : > { %v6642_v11 = vpop.permute.xlu0 %809 }
 0x206   : > { %1205 = vrot.lane.b32.xlu1 %v5174_v49, %s5631_s16  ;;  %s5638_s16 = smov 48  }
 0x207   : > { %1585 = vrot.lane.b32.xlu0 %v5174_v49, %s5634_s7 }
 0x208   : > { %v1444_v24 = vpop.permute.xlu1 %1443 }
 0x209   : > { %v6648_v13 = vpop.permute.xlu0 %1317  ;;  %v1844_v46 = vsel %vm1821_vm7, %v1811_v1, %v1444_v24 }
 0x20a   : > { %1333 = vrot.lane.b32.xlu1 %v5206_v42, %s5632_s21  ;;  %v1812_v5 = vsel %vm1788_vm6, %v1779_v15, %v6648_v13 }
 0x20b   : > { %1331 = vrot.lane.b32.xlu0 %v5205_v52, %s5632_s21 }
 0x20c   : > { %v6661_v22 = vpop.permute.xlu1 %1063 }
 0x20d   : > { %v6663_v51 = vpop.permute.xlu0 %937  ;;  %v6677_v50 = vpop.f32.mrb[8].mxu0 }
 0x20e   : > { %8626 = vst [vmem:[#allocation9_spill] sm:$0xff] %v6677_v50  ;;  %1461 = vrot.lane.b32.xlu1 %v5238_v60, %s5633_s26  ;;  %v6682_v19 = vpop.f32.mrb[9].mxu0  ;;  %v1681_v60 = vsel %vm1656_vm2, %v1648_v32, %v6629_v38 }
 0x20f   : > { %1459 = vrot.lane.b32.xlu0 %v5237_v20, %s5633_s26  ;;  %8627 = vst [vmem:[#allocation10_spill] sm:$0xff] %v6682_v19  ;;  %v1714_v20 = vsel %vm1689_vm3, %v1681_v60, %v6640_v9  ;;  %v1649_v9 = vsel %vm1623_vm1, %v6319_v21, %v6631_v62  ;;  %s307_s26 = scalar_lea.vmem %s8593_s8, %s5342_s23 }
 0x210   : > { %v1572_v10 = vpop.permute.xlu1 %1571  ;;  %v1747_v28 = vsel %vm1722_vm4, %v1714_v20, %v6661_v22  ;;  %v1682_v22 = vsel %vm1656_vm2, %v1649_v9, %v6642_v11 }
 0x211   : > { %v1446_v14 = vpop.permute.xlu0 %1445  ;;  %v1877_v33 = vsel %vm8594_vm8, %v1844_v46, %v1572_v10 }
 0x212   : > { %1589 = vrot.lane.b32.xlu1 %v5270_v40, %s5634_s7  ;;  %5469 = vmatprep.mubr.msk.f32.mxu0 %vm1892_vm9, %v1877_v33  ;;  %v1845_v30 = vsel %vm1821_vm7, %v1812_v5, %v1446_v14  ;;  %v1715_v14 = vsel %vm1689_vm3, %v1682_v22, %v6663_v51 }
 0x213   : > { %1587 = vrot.lane.b32.xlu0 %v5269_v2, %s5634_s7 }
 0x214   : > { %v6700_v27 = vpop.permute.xlu1 %1065 }
 0x215   : > { %v6702_v48 = vpop.permute.xlu0 %683  ;;  %v1748_v43 = vsel %vm1722_vm4, %v1715_v14, %v6700_v27 }
 0x216   : > { %2722 = vrot.lane.b32.xlu1 %v2433_v8, %s5627_s12 }
 0x217   : > { %2256 = vperm.xlu0 %5614, %v5304_v53  }
 0x218   : > { %v1574_v26 = vpop.permute.xlu1 %1573 }
 0x219   : > { %v1192_v35 = vpop.permute.xlu0 %1191  ;;  %v1878_v59 = vsel %vm8594_vm8, %v1845_v30, %v1574_v26 }
 0x21a   : > { %5470 = vmatmul.mubr.msk.f32.gmra.mrb[22].mxu0 %vm1892_vm9, %v1878_v59  ;;  %2724 = vrot.lane.b32.xlu1 %v2434_v37, %s5627_s12  ;;  %v1780_v1 = vsel %vm1755_vm5, %v1747_v28, %v1192_v35  ;;  %v1650_v35 = vsel %vm1623_vm1, %v6362_v58, %v6702_v48 }
 0x21b   : > { %2850 = vrot.lane.b32.xlu0 %v2465_v18, %s5630_s15 }
 0x21c   : > { %v812_v57 = vpop.permute.xlu1 %811 }
 0x21d   : > { %v686_v55 = vpop.permute.xlu0 %685  ;;  %v1683_v18 = vsel %vm1656_vm2, %v1650_v35, %v812_v57 }
 0x21e   : > { %2852 = vrot.lane.b32.xlu1 %v2466_v61, %s5630_s15  ;;  %v1651_v57 = vsel %vm1623_vm1, %v6393_v16, %v686_v55 }
 0x220   : > { %v1320_v49 = vpop.permute.xlu1 %1319 }
 0x221   : > { %v1194_v42 = vpop.permute.xlu0 %1193  ;;  %v1813_v2 = vsel %vm1788_vm6, %v1780_v1, %v1320_v49 }
 0x222   : > { %v1781_v53 = vsel %vm1755_vm5, %v1748_v43, %v1194_v42 }
 0x224   : > { %v940_v52 = vpop.permute.xlu1 %939 }
 0x225   : > { %v814_v24 = vpop.permute.xlu0 %813  ;;  %v1716_v59 = vsel %vm1689_vm3, %v1683_v18, %v940_v52 }
 0x226   : > { %v1684_v52 = vsel %vm1656_vm2, %v1651_v57, %v814_v24 }
 0x228   : > { %v1448_v13 = vpop.permute.xlu1 %1447 }
 0x229   : > { %v1322_v25 = vpop.permute.xlu0 %1321  ;;  %v1846_v12 = vsel %vm1821_vm7, %v1813_v2, %v1448_v13 }
 0x22a   : > { %v1814_v8 = vsel %vm1788_vm6, %v1781_v53, %v1322_v25 }
 0x22c   : > { %v1068_v31 = vpop.permute.xlu1 %1067 }
 0x22d   : > { %v942_v34 = vpop.permute.xlu0 %941  ;;  %v6799_v40 = vpop.f32.mrb[10].mxu0  ;;  %v1749_v42 = vsel %vm1722_vm4, %v1716_v59, %v1068_v31 }
 0x22e   : > { %8628 = vst [vmem:[#allocation11_spill] sm:$0xff] %v6799_v40  ;;  %v6802_v46 = vpop.f32.mrb[11].mxu0  ;;  %v1717_v31 = vsel %vm1689_vm3, %v1684_v52, %v942_v34  ;;  %vm2229_vm10 = vcmp.gt.f32.partialorder %v6799_v40, 0.0 }
 0x22f   : > { %8629 = vst [vmem:[#allocation12_spill] sm:$0xff] %v6802_v46  ;;  %vm2228_vm11 = vcmp.gt.f32.partialorder %v6802_v46, 0.0 }
 0x230   : > { %v1576_v29 = vpop.permute.xlu1 %1575 }
 0x231   : > { %v1450_v38 = vpop.permute.xlu0 %1449  ;;  %v1879_v10 = vsel %vm8594_vm8, %v1846_v12, %v1576_v29 }
 0x232   : > { %5472 = vmatprep.mubr.msk.f32.mxu0 %vm1892_vm9, %v1879_v10  ;;  %v1847_v4 = vsel %vm1821_vm7, %v1814_v8, %v1450_v38 }
 0x234   : > { %v1070_v33 = vpop.permute.xlu1 %1069 }
 0x235   : > { %v688_v47 = vpop.permute.xlu0 %687  ;;  %v1750_v12 = vsel %vm1722_vm4, %v1717_v31, %v1070_v33 }
 0x238   : > { %v1578_v21 = vpop.permute.xlu1 %1577 }
 0x239   : > { %v1196_v62 = vpop.permute.xlu0 %1195  ;;  %v1880_v54 = vsel %vm8594_vm8, %v1847_v4, %v1578_v21  ;;  %v1652_v4 = vsel %vm1623_vm1, %v6438_v45, %v688_v47 }
 0x23a   : > { %5473 = vmatmul.mubr.msk.f32.gmra.mrb[24].mxu0 %vm1892_vm9, %v1880_v54  ;;  %v1782_v13 = vsel %vm1755_vm5, %v1749_v42, %v1196_v62 }
 0x23c   : > { %v816_v11 = vpop.permute.xlu1 %815 }
 0x23d   : > { %v690_v15 = vpop.permute.xlu0 %689  ;;  %v1685_v21 = vsel %vm1656_vm2, %v1652_v4, %v816_v11 }
 0x23e   : > { %v1653_v11 = vsel %vm1623_vm1, %v6468_v3, %v690_v15 }
 0x240   : > { %v1324_v51 = vpop.permute.xlu1 %1323 }
 0x241   : > { %v1198_v5 = vpop.permute.xlu0 %1197  ;;  %v1815_v32 = vsel %vm1788_vm6, %v1782_v13, %v1324_v51 }
 0x242   : > { %v1783_v29 = vsel %vm1755_vm5, %v1750_v12, %v1198_v5 }
 0x244   : > { %v944_v37 = vpop.permute.xlu1 %943 }
 0x245   : > { %v818_v30 = vpop.permute.xlu0 %817  ;;  %v1718_v62 = vsel %vm1689_vm3, %v1685_v21, %v944_v37 }
 0x246   : > { %v1686_v37 = vsel %vm1656_vm2, %v1653_v11, %v818_v30 }
 0x248   : > { %v1452_v26 = vpop.permute.xlu1 %1451 }
 0x249   : > { %v1326_v27 = vpop.permute.xlu0 %1325  ;;  %v1848_v20 = vsel %vm1821_vm7, %v1815_v32, %v1452_v26 }
 0x24a   : > { %v1816_v38 = vsel %vm1788_vm6, %v1783_v29, %v1326_v27 }
 0x24c   : > { %v1072_v61 = vpop.permute.xlu1 %1071 }
 0x24d   : > { %v946_v49 = vpop.permute.xlu0 %945  ;;  %v6828_v25 = vpop.f32.mrb[12].mxu0  ;;  %v1751_v5 = vsel %vm1722_vm4, %v1718_v62, %v1072_v61 }
 0x24e   : > { %8630 = vst [vmem:[#allocation13_spill] sm:$0xff] %v6828_v25  ;;  %v6831_v60 = vpop.f32.mrb[13].mxu0  ;;  %v1719_v61 = vsel %vm1689_vm3, %v1686_v37, %v946_v49 }
 0x24f   : > { %8631 = vst [vmem:[#allocation14_spill] sm:$0xff] %v6831_v60 }
 0x250   : > { %v1580_v28 = vpop.permute.xlu1 %1579 }
 0x251   : > { %v1454_v58 = vpop.permute.xlu0 %1453  ;;  %v1881_v48 = vsel %vm8594_vm8, %v1848_v20, %v1580_v28 }
 0x252   : > { %5475 = vmatprep.mubr.msk.f32.mxu0 %vm1892_vm9, %v1881_v48  ;;  %v1849_v10 = vsel %vm1821_vm7, %v1816_v38, %v1454_v58 }
 0x254   : > { %v1074_v1 = vpop.permute.xlu1 %1073 }
 0x255   : > { %v692_v2 = vpop.permute.xlu0 %691  ;;  %v1752_v20 = vsel %vm1722_vm4, %v1719_v61, %v1074_v1 }
 0x256   : > { %v1654_v49 = vsel %vm1623_vm1, %v6512_v39, %v692_v2 }
 0x258   : > { %v1582_v9 = vpop.permute.xlu1 %1581 }
 0x259   : > { %v1200_v22 = vpop.permute.xlu0 %1199  ;;  %v1882_v16 = vsel %vm8594_vm8, %v1849_v10, %v1582_v9 }
 0x25a   : > { %5476 = vmatmul.mubr.msk.f32.gmra.mrb[26].mxu0 %vm1892_vm9, %v1882_v16  ;;  %v1784_v26 = vsel %vm1755_vm5, %v1751_v5, %v1200_v22 }
 0x25c   : > { %v820_v55 = vpop.permute.xlu1 %819 }
 0x25d   : > { %v694_v24 = vpop.permute.xlu0 %693  ;;  %v1687_v1 = vsel %vm1656_vm2, %v1654_v49, %v820_v55 }
 0x25e   : > { %v1655_v31 = vsel %vm1623_vm1, %v6541_v36, %v694_v24  ;;  %vm2222_vm1 = vcmp.gt.f32.partialorder %v6526_v41, 0.0 }
 0x260   : > { %v1328_v14 = vpop.permute.xlu1 %1327 }
 0x261   : > { %v1202_v34 = vpop.permute.xlu0 %1201  ;;  %v1817_v35 = vsel %vm1788_vm6, %v1784_v26, %v1328_v14 }
 0x262   : > { %v1785_v28 = vsel %vm1755_vm5, %v1752_v20, %v1202_v34 }
 0x264   : > { %v948_v43 = vpop.permute.xlu1 %947 }
 0x265   : > { %v822_v53 = vpop.permute.xlu0 %821  ;;  %v1720_v29 = vsel %vm1689_vm3, %v1687_v1, %v948_v43 }
 0x266   : > { %v1688_v12 = vsel %vm1656_vm2, %v1655_v31, %v822_v53 }
 0x268   : > { %v1456_v8 = vpop.permute.xlu1 %1455 }
 0x269   : > { %v1330_v33 = vpop.permute.xlu0 %1329  ;;  %v1850_v59 = vsel %vm1821_vm7, %v1817_v35, %v1456_v8 }
 0x26a   : > { %v1818_v58 = vsel %vm1788_vm6, %v1785_v28, %v1330_v33 }
 0x26c   : > { %v1076_v54 = vpop.permute.xlu1 %1075 }
 0x26d   : > { %v950_v51 = vpop.permute.xlu0 %949  ;;  %v6852_v27 = vpop.f32.mrb[14].mxu0  ;;  %v1753_v22 = vsel %vm1722_vm4, %v1720_v29, %v1076_v54 }
 0x26e   : > { %8632 = vst [vmem:[#allocation15_spill] sm:$0xff] %v6852_v27  ;;  %v6855_v18 = vpop.f32.mrb[15].mxu0  ;;  %v1721_v38 = vsel %vm1689_vm3, %v1688_v12, %v950_v51  ;;  %vm2225_vm3 = vcmp.gt.f32.partialorder %v6592_v6, 0.0 }
 0x26f   : > { %8633 = vst [vmem:[#allocation16_spill] sm:$0xff] %v6855_v18 }
 0x270   : > { %v1584_v42 = vpop.permute.xlu1 %1583 }
 0x271   : > { %v1458_v45 = vpop.permute.xlu0 %1457  ;;  %v1883_v47 = vsel %vm8594_vm8, %v1850_v59, %v1584_v42 }
 0x272   : > { %5478 = vmatprep.mubr.msk.f32.mxu0 %vm1892_vm9, %v1883_v47  ;;  %v1851_v48 = vsel %vm1821_vm7, %v1818_v58, %v1458_v45 }
 0x274   : > { %v1204_v13 = vpop.permute.xlu1 %1203 }
 0x275   : > { %v1078_v32 = vpop.permute.xlu0 %1077  ;;  %v1786_v14 = vsel %vm1755_vm5, %v1753_v22, %v1204_v13 }
 0x276   : > { %v1754_v16 = vsel %vm1722_vm4, %v1721_v38, %v1078_v32 }
 0x278   : > { %v1206_v57 = vpop.permute.xlu1 %1205 }
 0x279   : > { %v1586_v52 = vpop.permute.xlu0 %1585  ;;  %v1787_v39 = vsel %vm1755_vm5, %v1754_v16, %v1206_v57  ;;  %vm2224_vm5 = vcmp.gt.f32.partialorder %v6597_v23, 0.0 }
 0x27a   : > { %v1884_v3 = vsel %vm8594_vm8, %v1851_v48, %v1586_v52 }
 0x27b   : > { %5479 = vmatmul.mubr.msk.f32.gmra.mrb[28].mxu0 %vm1892_vm9, %v1884_v3 }
 0x27c   : > { %v1334_v15 = vpop.permute.xlu1 %1333 }
 0x27d   : > { %v1332_v30 = vpop.permute.xlu0 %1331  ;;  %v1820_v36 = vsel %vm1788_vm6, %v1787_v39, %v1334_v15 }
 0x27e   : > { %v1819_v2 = vsel %vm1788_vm6, %v1786_v14, %v1332_v30 }
 0x280   : > { %v1462_v10 = vpop.permute.xlu1 %1461 }
 0x281   : > { %v1460_v9 = vpop.permute.xlu0 %1459  ;;  %v1853_v55 = vsel %vm1821_vm7, %v1820_v36, %v1462_v10 }
 0x282   : > { %v1852_v24 = vsel %vm1821_vm7, %v1819_v2, %v1460_v9  ;;  %vm2227_vm7 = vcmp.gt.f32.partialorder %v6677_v50, 0.0 }
 0x284   : > { %v1590_v34 = vpop.permute.xlu1 %1589 }
 0x285   : > { %v1588_v43 = vpop.permute.xlu0 %1587  ;;  %v1886_v53 = vsel %vm8594_vm8, %v1853_v55, %v1590_v34 }
 0x286   : > { %v1885_v8 = vsel %vm8594_vm8, %v1852_v24, %v1588_v43  ;;  %vm2231_vm8 = vcmp.gt.f32.partialorder %v6828_v25, 0.0  ;;  %v3974_v43 = vld [vmem:[%s8587_s2] sm:$0xff] }
 0x287   : > { %5481 = vmatprep.mubr.msk.f32.mxu0 %vm1892_vm9, %v1885_v8 }
 0x288   : > { %5482 = vmatmul.mubr.msk.f32.gmra.mrb[30].mxu0 %vm1892_vm9, %v1886_v53  ;;  %vm2226_vm9 = vcmp.gt.f32.partialorder %v6682_v19, 0.0  ;;  %v3975_v53 = vld [vmem:[%s8587_s2 + $0x8] sm:$0xff] }
 0x289   : > { %v5570_v8 = vpack.c.bf16 %v3975_v53, %v3974_v43 }
 0x28b   : > { %5571 = vmatprep.subr.bf16.mxu1 %v5570_v8 }
 0x28c   : > { %5573 = vmatpush3.bf16.msra.mxu1 %v5570_v8 }
 0x28d   : > { %v6890_v33 = vpop.f32.mrb[16].mxu0 }
 0x28e   : > { %v6892_v4 = vpop.f32.mrb[17].mxu0 }
 0x296   : > { %v6907_v21 = vpop.permute.xlu0 %2256 }
 0x297   : > { %v2259_v62 = vmul.f32 %v6907_v21, %v6378_v7  ;;  %v2260_v54 = vmul.f32 %v6372_v44, %v6907_v21  ;;  %v2261_v51 = vmul.f32 %v6907_v21, %v6453_v56  ;;  %v2262_v5 = vmul.f32 %v6447_v17, %v6907_v21 }
 0x298   : > { %v2263_v26 = vmul.f32 %v6907_v21, %v6526_v41  ;;  %v2264_v35 = vmul.f32 %v6520_v0, %v6907_v21  ;;  %v2265_v59 = vmul.f32 %v6907_v21, %v6597_v23  ;;  %v2266_v42 = vmul.f32 %v6592_v6, %v6907_v21 }
 0x299   : > { %v2291_v45 = vsel %vm2218_vm13, %v6378_v7, %v2259_v62  ;;  %v2292_v47 = vsel %vm2219_vm12, %v6372_v44, %v2260_v54  ;;  %v2293_v11 = vsel %vm2220_vm15, %v6453_v56, %v2261_v51  ;;  %v2294_v37 = vsel %vm2221_vm14, %v6447_v17, %v2262_v5 }
 0x29a   : > { %2369 = vst.msk [vmem:[#allocation2 + $0x19] sm:$0xff] %vm1656_vm2, %v2291_v45  ;;  %2370 = vst.msk [vmem:[#allocation2 + $0x21] sm:$0xff] %vm1656_vm2, %v2292_v47  ;;  %v2295_v61 = vsel %vm2222_vm1, %v6526_v41, %v2263_v26  ;;  %v2296_v13 = vsel %vm2223_vm0, %v6520_v0, %v2264_v35  ;;  %v2297_v32 = vsel %vm2224_vm5, %v6597_v23, %v2265_v59  ;;  %vm2230_vm12 = vcmp.gt.f32.partialorder %v6831_v60, 0.0  ;;  %v3976_v45 = vld [vmem:[%s8587_s2 + $0x10] sm:$0xff]  ;;  %v3977_v47 = vld [vmem:[%s8587_s2 + $0x18] sm:$0xff] }
 0x29b   : > { %2371 = vst.msk [vmem:[#allocation2 + $0x31] sm:$0xff] %vm1656_vm2, %v2293_v11  ;;  %2372 = vst.msk [vmem:[#allocation2 + $0x39] sm:$0xff] %vm1656_vm2, %v2294_v37  ;;  %v2298_v20 = vsel %vm2225_vm3, %v6592_v6, %v2266_v42  ;;  %v2267_v28 = vmul.f32 %v6907_v21, %v6682_v19  ;;  %v2268_v58 = vmul.f32 %v6677_v50, %v6907_v21  ;;  %vm2232_vm13 = vcmp.gt.f32.partialorder %v6855_v18, 0.0  ;;  %v3978_v11 = vld [vmem:[%s8587_s2 + $0x20] sm:$0xff] }
 0x29c   : > { %2373 = vst.msk [vmem:[#allocation2 + $0x49] sm:$0xff] %vm1656_vm2, %v2295_v61  ;;  %2374 = vst.msk [vmem:[#allocation2 + $0x51] sm:$0xff] %vm1656_vm2, %v2296_v13  ;;  %v2269_v48 = vmul.f32 %v6907_v21, %v6802_v46  ;;  %v2270_v57 = vmul.f32 %v6799_v40, %v6907_v21  ;;  %v2271_v52 = vmul.f32 %v6907_v21, %v6831_v60  ;;  %vm2235_vm14 = vcmp.gt.f32.partialorder %v6890_v33, 0.0  ;;  %v3979_v61 = vld [vmem:[%s8587_s2 + $0x28] sm:$0xff] }
 0x29d   : > { %2375 = vst.msk [vmem:[#allocation2 + $0x61] sm:$0xff] %vm1656_vm2, %v2297_v32  ;;  %2376 = vst.msk [vmem:[#allocation2 + $0x69] sm:$0xff] %vm1656_vm2, %v2298_v20  ;;  %v2272_v3 = vmul.f32 %v6828_v25, %v6907_v21  ;;  %v2273_v15 = vmul.f32 %v6907_v21, %v6855_v18  ;;  %v2299_v30 = vsel %vm2226_vm9, %v6682_v19, %v2267_v28  ;;  %vm2234_vm15 = vcmp.gt.f32.partialorder %v6892_v4, 0.0  ;;  %v3980_v32 = vld [vmem:[%s8587_s2 + $0x30] sm:$0xff]  ;;  %v3981_v20 = vld [vmem:[%s8587_s2 + $0x38] sm:$0xff] }
 0x29e   : > { %v2300_v49 = vsel %vm2227_vm7, %v6677_v50, %v2268_v58  ;;  %v2301_v31 = vsel %vm2228_vm11, %v6802_v46, %v2269_v48  ;;  %2377 = vst.msk [vmem:[#allocation2 + $0x79] sm:$0xff] %vm1656_vm2, %v2299_v30  ;;  %v2302_v1 = vsel %vm2229_vm10, %v6799_v40, %v2270_v57  ;;  %v2303_v12 = vsel %vm2230_vm12, %v6831_v60, %v2271_v52  ;;  %v3982_v57 = vld [vmem:[%s8587_s2 + $0x40] sm:$0xff] }
 0x29f   : > { %2378 = vst.msk [vmem:[#allocation2 + $0x81] sm:$0xff] %vm1656_vm2, %v2300_v49  ;;  %2379 = vst.msk [vmem:[#allocation2 + $0x91] sm:$0xff] %vm1656_vm2, %v2301_v31  ;;  %v2304_v29 = vsel %vm2231_vm8, %v6828_v25, %v2272_v3  ;;  %v2305_v38 = vsel %vm2232_vm13, %v6855_v18, %v2273_v15  ;;  %v2274_v10 = vmul.f32 %v6852_v27, %v6907_v21  ;;  %vm2233_vm8 = vcmp.gt.f32.partialorder %v6852_v27, 0.0 }
 0x2a0   : > { %2380 = vst.msk [vmem:[#allocation2 + $0x99] sm:$0xff] %vm1656_vm2, %v2302_v1  ;;  %2381 = vst.msk [vmem:[#allocation2 + $0xa9] sm:$0xff] %vm1656_vm2, %v2303_v12  ;;  %v2275_v9 = vmul.f32 %v6907_v21, %v6892_v4  ;;  %v2276_v22 = vmul.f32 %v6890_v33, %v6907_v21  ;;  %v5574_v37 = vpack.c.bf16 %v3977_v47, %v3976_v45  ;;  %vm3842_vm12 = vcmask 326656  }
 0x2a1   : > { %2382 = vst.msk [vmem:[#allocation2 + $0xb1] sm:$0xff] %vm1656_vm2, %v2304_v29  ;;  %2383 = vst.msk [vmem:[#allocation2 + $0xc1] sm:$0xff] %vm1656_vm2, %v2305_v38  ;;  %v7008_v16 = vld [vmem:[#allocation2 + $0x20] sm:$0xff]  ;;  %v7010_v14 = vld [vmem:[#allocation2 + $0x18] sm:$0xff]  ;;  %v2306_v39 = vsel %vm2233_vm8, %v6852_v27, %v2274_v10  ;;  %v5578_v13 = vpack.c.bf16 %v3979_v61, %v3978_v11  ;;  %v5582_v48 = vpack.c.bf16 %v3981_v20, %v3980_v32  ;;  %vm3875_vm8 = vcmask 392192  }
 0x2a2   : > { %v2307_v36 = vsel %vm2234_vm15, %v6892_v4, %v2275_v9  ;;  %v2308_v2 = vsel %vm2235_vm14, %v6890_v33, %v2276_v22  ;;  %2980 = vrot.lane.b32.xlu1 %v7008_v16, %s5632_s21  ;;  %2978 = vrot.lane.b32.xlu0 %v7010_v14, %s5632_s21  ;;  %2384 = vst.msk [vmem:[#allocation2 + $0xc9] sm:$0xff] %vm1656_vm2, %v2306_v39  ;;  %v2529_v55 = vld [vmem:[#allocation2 + $0x19] sm:$0xff]  ;;  %v2530_v24 = vld [vmem:[#allocation2 + $0x21] sm:$0xff]  ;;  %v7044_v35 = vld [vmem:[#allocation2 + $0x30] sm:$0xff]  ;;  %vm8643_vm15 = vcmask 261120  }
 0x2a3   : > { %2385 = vst.msk [vmem:[#allocation2 + $0xd9] sm:$0xff] %vm1656_vm2, %v2307_v36  ;;  %2386 = vst.msk [vmem:[#allocation2 + $0xe1] sm:$0xff] %vm1656_vm2, %v2308_v2  ;;  %v2561_v34 = vld [vmem:[#allocation2 + $0x1a] sm:$0xff]  ;;  %v2562_v26 = vld [vmem:[#allocation2 + $0x22] sm:$0xff]  ;;  %5575 = vmatprep.subr.bf16.mxu1 %v5574_v37 }
 0x2a4   : > { %5577 = vmatpush3.bf16.msra.mxu1 %v5574_v37  ;;  %v7074_v28 = vld [vmem:[#allocation2 + $0x38] sm:$0xff]  ;;  %v7103_v12 = vld [vmem:[#allocation2 + $0x48] sm:$0xff]  ;;  %v7115_v10 = vld [vmem:[#allocation2 + $0x50] sm:$0xff] }
 0x2a5   : > { %v2626_v58 = vld [vmem:[#allocation2 + $0x31] sm:$0xff]  ;;  %5579 = vmatprep.subr.bf16.mxu1 %v5578_v13  ;;  %v2627_v52 = vld [vmem:[#allocation2 + $0x39] sm:$0xff]  ;;  %v2628_v9 = vld [vmem:[#allocation2 + $0x49] sm:$0xff] }
 0x2a6   : > { %3106 = vrot.lane.b32.xlu0 %v2529_v55, %s5634_s7  ;;  %2726 = vrot.lane.b32.xlu1 %v2529_v55, %s5627_s12  ;;  %v2658_v3 = vld [vmem:[#allocation2 + $0x32] sm:$0xff]  ;;  %v2659_v15 = vld [vmem:[#allocation2 + $0x3a] sm:$0xff]  ;;  %v2660_v39 = vld [vmem:[#allocation2 + $0x4a] sm:$0xff] }
 0x2a7   : > { %v2629_v22 = vld [vmem:[#allocation2 + $0x51] sm:$0xff]  ;;  %v7142_v53 = vld [vmem:[#allocation2 + $0x60] sm:$0xff] }
 0x2a8   : > { %5581 = vmatpush3.bf16.msra.mxu1 %v5578_v13  ;;  %v2661_v36 = vld [vmem:[#allocation2 + $0x52] sm:$0xff]  ;;  %v2663_v45 = vld [vmem:[#allocation2 + $0x6a] sm:$0xff]  ;;  %v2851_v13 = vpop.permute.xlu0 %2850 }
 0x2a9   : > { %5583 = vmatprep.subr.bf16.mxu1 %v5582_v48  ;;  %v7244_v18 = vld [vmem:[#allocation2 + $0x90] sm:$0xff] }
 0x2aa   : > { %3108 = vrot.lane.b32.xlu0 %v2530_v24, %s5634_s7  ;;  %3234 = vrot.lane.b32.xlu1 %v2561_v34, %s5637_s9 }
 0x2ac   : > { %5585 = vmatpush3.bf16.msra.mxu1 %v5582_v48  ;;  %v7184_v48 = vld [vmem:[#allocation2 + $0x78] sm:$0xff] }
 0x2ad   : > { %v7034_v62 = vpop.f32.mrb[18].mxu0  ;;  %5500 = vmatprep.subr.mxu1 %v3982_v57 }
 0x2ae   : > { %2728 = vrot.lane.b32.xlu0 %v2530_v24, %s5627_s12  ;;  %2854 = vrot.lane.b32.xlu1 %v2561_v34, %s5630_s15  ;;  %8634 = vst [vmem:[#allocation17_spill] sm:$0xff] %v7034_v62  ;;  %vm2237_vm0 = vcmp.gt.f32.partialorder %v7034_v62, 0.0  ;;  %v2278_v54 = vmul.f32 %v7034_v62, %v6907_v21  ;;  %v7039_v51 = vpop.f32.mrb[19].mxu0 }
 0x2af   : > { %vm2236_vm1 = vcmp.gt.f32.partialorder %v7039_v51, 0.0  ;;  %v2277_v5 = vmul.f32 %v6907_v21, %v7039_v51 }
 0x2b0   : > { %v2310_v59 = vsel %vm2237_vm0, %v7034_v62, %v2278_v54  ;;  %5501 = vmatpush3.msra.mxu1 %v3982_v57  ;;  %v7153_v54 = vld [vmem:[#allocation2 + $0x68] sm:$0xff]  ;;  %vm3908_vm0 = vcmask 457728  }
 0x2b1   : > { %2388 = vst.msk [vmem:[#allocation2 + $0xf9] sm:$0xff] %vm1656_vm2, %v2310_v59  ;;  %v2309_v42 = vsel %vm2236_vm1, %v7039_v51, %v2277_v5  ;;  %v2630_v5 = vld [vmem:[#allocation2 + $0x61] sm:$0xff]  ;;  %vm3941_vm1 = vcmask 523264  }
 0x2b2   : > { %3236 = vrot.lane.b32.xlu0 %v2562_v26, %s5637_s9  ;;  %3362 = vrot.lane.b32.xlu1 %v7044_v35, %s5638_s16  ;;  %2387 = vst.msk [vmem:[#allocation2 + $0xf1] sm:$0xff] %vm1656_vm2, %v2309_v42  ;;  %v2662_v59 = vld [vmem:[#allocation2 + $0x62] sm:$0xff]  ;;  %v2723_v42 = vpop.permute.xlu1 %2722 }
 0x2b6   : > { %2856 = vrot.lane.b32.xlu0 %v2562_v26, %s5630_s15  ;;  %2982 = vrot.lane.b32.xlu1 %v7044_v35, %s5632_s21  ;;  %v2631_v26 = vld [vmem:[#allocation2 + $0x69] sm:$0xff]  ;;  %v7165_v47 = vpop.permute.xlu1 %2724 }
 0x2ba   : > { %3364 = vrot.lane.b32.xlu0 %v7074_v28, %s5638_s16  ;;  %3490 = vrot.lane.b32.xlu1 %v2626_v58, %s5639_s11  ;;  %v7178_v32 = vpop.permute.xlu1 %2852 }
 0x2be   : > { %2984 = vrot.lane.b32.xlu0 %v7074_v28, %s5632_s21  ;;  %3110 = vrot.lane.b32.xlu1 %v2626_v58, %s5634_s7 }
 0x2c2   : > { %3492 = vrot.lane.b32.xlu0 %v2627_v52, %s5639_s11  ;;  %3618 = vrot.lane.b32.xlu1 %v2658_v3, %s5640_s17 }
 0x2c6   : > { %3112 = vrot.lane.b32.xlu1 %v2627_v52, %s5634_s7  ;;  %2730 = vrot.lane.b32.xlu0 %v2626_v58, %s5627_s12 }
 0x2ca   : > { %3620 = vrot.lane.b32.xlu1 %v2659_v15, %s5640_s17  ;;  %3238 = vrot.lane.b32.xlu0 %v2658_v3, %s5637_s9 }
 0x2cd   : > { %v7093_v30 = vpop.f32.mrb[20].mxu0 }
 0x2ce   : > { %2858 = vrot.lane.b32.xlu1 %v2658_v3, %s5630_s15  ;;  %2732 = vrot.lane.b32.xlu0 %v2627_v52, %s5627_s12  ;;  %8635 = vst [vmem:[#allocation18_spill] sm:$0xff] %v7093_v30  ;;  %vm2239_vm3 = vcmp.gt.f32.partialorder %v7093_v30, 0.0  ;;  %v2280_v49 = vmul.f32 %v7093_v30, %v6907_v21  ;;  %v7098_v31 = vpop.f32.mrb[21].mxu0 }
 0x2cf   : > { %8636 = vst [vmem:[#allocation19_spill] sm:$0xff] %v7098_v31  ;;  %vm2238_vm5 = vcmp.gt.f32.partialorder %v7098_v31, 0.0  ;;  %v2279_v1 = vmul.f32 %v6907_v21, %v7098_v31 }
 0x2d0   : > { %v2312_v29 = vsel %vm2239_vm3, %v7093_v30, %v2280_v49  ;;  %vm3983_vm3 = vcmask 588800  }
 0x2d1   : > { %2390 = vst.msk [vmem:[#allocation2 + $0x111] sm:$0xff] %vm1656_vm2, %v2312_v29  ;;  %v2311_v38 = vsel %vm2238_vm5, %v7098_v31, %v2279_v1  ;;  %v7199_v1 = vld [vmem:[#allocation2 + $0x80] sm:$0xff]  ;;  %vm8644_vm5 = vmmov %vm8643_vm15 }
 0x2d2   : > { %3240 = vrot.lane.b32.xlu0 %v2659_v15, %s5637_s9  ;;  %3366 = vrot.lane.b32.xlu1 %v7103_v12, %s5638_s16  ;;  %2389 = vst.msk [vmem:[#allocation2 + $0x109] sm:$0xff] %vm1656_vm2, %v2311_v38  ;;  %v2632_v29 = vld [vmem:[#allocation2 + $0x79] sm:$0xff] }
 0x2d6   : > { %2860 = vrot.lane.b32.xlu0 %v2659_v15, %s5630_s15  ;;  %2986 = vrot.lane.b32.xlu1 %v7103_v12, %s5632_s21 }
 0x2da   : > { %3368 = vrot.lane.b32.xlu0 %v7115_v10, %s5638_s16  ;;  %3494 = vrot.lane.b32.xlu1 %v2628_v9, %s5639_s11 }
 0x2de   : > { %2988 = vrot.lane.b32.xlu0 %v7115_v10, %s5632_s21  ;;  %3114 = vrot.lane.b32.xlu1 %v2628_v9, %s5634_s7 }
 0x2e2   : > { %3496 = vrot.lane.b32.xlu0 %v2629_v22, %s5639_s11  ;;  %3622 = vrot.lane.b32.xlu1 %v2660_v39, %s5640_s17 }
 0x2e6   : > { %3116 = vrot.lane.b32.xlu1 %v2629_v22, %s5634_s7  ;;  %2734 = vrot.lane.b32.xlu0 %v2628_v9, %s5627_s12 }
 0x2ea   : > { %3624 = vrot.lane.b32.xlu1 %v2661_v36, %s5640_s17  ;;  %3242 = vrot.lane.b32.xlu0 %v2660_v39, %s5637_s9 }
 0x2ed   : > { %v7131_v2 = vpop.f32.mrb[22].mxu0 }
 0x2ee   : > { %2862 = vrot.lane.b32.xlu1 %v2660_v39, %s5630_s15  ;;  %2736 = vrot.lane.b32.xlu0 %v2629_v22, %s5627_s12  ;;  %8637 = vst [vmem:[#allocation20_spill] sm:$0xff] %v7131_v2  ;;  %vm2241_vm7 = vcmp.gt.f32.partialorder %v7131_v2, 0.0  ;;  %v2282_v55 = vmul.f32 %v7131_v2, %v6907_v21  ;;  %v7136_v24 = vpop.f32.mrb[23].mxu0 }
 0x2ef   : > { %8638 = vst [vmem:[#allocation21_spill] sm:$0xff] %v7136_v24  ;;  %vm2240_vm9 = vcmp.gt.f32.partialorder %v7136_v24, 0.0  ;;  %v2281_v34 = vmul.f32 %v6907_v21, %v7136_v24 }
 0x2f0   : > { %v2314_v43 = vsel %vm2241_vm7, %v7131_v2, %v2282_v55  ;;  %v2664_v55 = vld [vmem:[#allocation2 + $0x7a] sm:$0xff] }
 0x2f1   : > { %2392 = vst.msk [vmem:[#allocation2 + $0x129] sm:$0xff] %vm1656_vm2, %v2314_v43  ;;  %v2313_v8 = vsel %vm2240_vm9, %v7136_v24, %v2281_v34 }
 0x2f2   : > { %3244 = vrot.lane.b32.xlu0 %v2661_v36, %s5637_s9  ;;  %3370 = vrot.lane.b32.xlu1 %v7142_v53, %s5638_s16  ;;  %2391 = vst.msk [vmem:[#allocation2 + $0x121] sm:$0xff] %vm1656_vm2, %v2313_v8 }
 0x2f6   : > { %2864 = vrot.lane.b32.xlu0 %v2661_v36, %s5630_s15  ;;  %2990 = vrot.lane.b32.xlu1 %v7142_v53, %s5632_s21  ;;  %v2633_v36 = vld [vmem:[#allocation2 + $0x81] sm:$0xff] }
 0x2fa   : > { %3372 = vrot.lane.b32.xlu0 %v7153_v54, %s5638_s16  ;;  %3498 = vrot.lane.b32.xlu1 %v2630_v5, %s5639_s11 }
 0x2fe   : > { %2992 = vrot.lane.b32.xlu0 %v7153_v54, %s5632_s21  ;;  %3118 = vrot.lane.b32.xlu1 %v2630_v5, %s5634_s7 }
 0x302   : > { %3500 = vrot.lane.b32.xlu0 %v2631_v26, %s5639_s11  ;;  %3626 = vrot.lane.b32.xlu1 %v2662_v59, %s5640_s17 }
 0x306   : > { %3120 = vrot.lane.b32.xlu1 %v2631_v26, %s5634_s7  ;;  %2738 = vrot.lane.b32.xlu0 %v2630_v5, %s5627_s12 }
 0x30a   : > { %3628 = vrot.lane.b32.xlu1 %v2663_v45, %s5640_s17  ;;  %3246 = vrot.lane.b32.xlu0 %v2662_v59, %s5637_s9 }
 0x30d   : > { %v7171_v11 = vpop.f32.mrb[24].mxu0 }
 0x30e   : > { %2866 = vrot.lane.b32.xlu1 %v2662_v59, %s5630_s15  ;;  %2740 = vrot.lane.b32.xlu0 %v2631_v26, %s5627_s12  ;;  %8639 = vst [vmem:[#allocation22_spill] sm:$0xff] %v7171_v11  ;;  %vm2243_vm10 = vcmp.gt.f32.partialorder %v7171_v11, 0.0  ;;  %v2284_v37 = vmul.f32 %v7171_v11, %v6907_v21  ;;  %v7176_v61 = vpop.f32.mrb[25].mxu0  ;;  %v2401_v26 = vld [vmem:[#allocation2] sm:$0xff] }
 0x30f   : > { %8640 = vst [vmem:[#allocation23_spill] sm:$0xff] %v7176_v61  ;;  %vm2242_vm11 = vcmp.gt.f32.partialorder %v7176_v61, 0.0  ;;  %v2283_v20 = vmul.f32 %v6907_v21, %v7176_v61  ;;  %v2665_v59 = vld [vmem:[#allocation2 + $0x82] sm:$0xff] }
 0x310   : > { %v2316_v58 = vsel %vm2243_vm10, %v7171_v11, %v2284_v37  ;;  %vm8647_vm10 = vmmov %vm8644_vm5 }
 0x311   : > { %2394 = vst.msk [vmem:[#allocation2 + $0x141] sm:$0xff] %vm1656_vm2, %v2316_v58  ;;  %v2315_v57 = vsel %vm2242_vm11, %v7176_v61, %v2283_v20  ;;  %vm8648_vm11 = vmmov %vm8644_vm5 }
 0x312   : > { %3248 = vrot.lane.b32.xlu0 %v2663_v45, %s5637_s9  ;;  %3374 = vrot.lane.b32.xlu1 %v7184_v48, %s5638_s16  ;;  %2393 = vst.msk [vmem:[#allocation2 + $0x139] sm:$0xff] %vm1656_vm2, %v2315_v57 }
 0x314   : > { %v7192_v52 = vpop.permute.xlu1 %2980  ;;  %v2979_v3 = vpop.permute.xlu0 %2978 }
 0x316   : > { %2868 = vrot.lane.b32.xlu0 %v2663_v45, %s5630_s15  ;;  %2994 = vrot.lane.b32.xlu1 %v7184_v48, %s5632_s21  ;;  %v3714_v45 = vsel %vm1656_vm2, %v2401_v26, %v2723_v42 }
 0x317   : > { %v3746_v57 = vsel %vm1722_vm4, %v3714_v45, %v2851_v13  ;;  %v2402_v13 = vld [vmem:[#allocation2 + $0x8] sm:$0xff] }
 0x318   : > { %v3107_v15 = vpop.permute.xlu0 %3106  ;;  %v7197_v49 = vpop.permute.xlu1 %2726  ;;  %v3778_v42 = vsel %vm1788_vm6, %v3746_v57, %v2979_v3 }
 0x319   : > { %v3810_v45 = vsel %vm8643_vm15, %v3778_v42, %v3107_v15  ;;  %v3715_v15 = vsel %vm1656_vm2, %v2402_v13, %v7165_v47  ;;  %v7272_v13 = vld [vmem:[#allocation2 + $0x98] sm:$0xff]  ;;  %vm8649_vm15 = vmmov %vm8644_vm5 }
 0x31a   : > { %3376 = vrot.lane.b32.xlu0 %v7199_v1, %s5638_s16  ;;  %3502 = vrot.lane.b32.xlu1 %v2632_v29, %s5639_s11 }
 0x31c   : > { %v7204_v38 = vpop.permute.xlu0 %3108  ;;  %v3235_v9 = vpop.permute.xlu1 %3234 }
 0x31d   : > { %v3843_v3 = vsel %vm3842_vm12, %v3810_v45, %v3235_v9 }
 0x31e   : > { %2996 = vrot.lane.b32.xlu0 %v7199_v1, %s5632_s21  ;;  %3122 = vrot.lane.b32.xlu1 %v2632_v29, %s5634_s7 }
 0x320   : > { %v7209_v22 = vpop.permute.xlu0 %2728  ;;  %v7211_v39 = vpop.permute.xlu1 %2854 }
 0x322   : > { %3504 = vrot.lane.b32.xlu0 %v2633_v36, %s5639_s11  ;;  %3630 = vrot.lane.b32.xlu1 %v2664_v55, %s5640_s17 }
 0x324   : > { %v3237_v34 = vpop.permute.xlu0 %3236  ;;  %v3363_v43 = vpop.permute.xlu1 %3362 }
 0x325   : > { %v3876_v25 = vsel %vm3875_vm8, %v3843_v3, %v3363_v43 }
 0x326   : > { %3124 = vrot.lane.b32.xlu1 %v2633_v36, %s5634_s7  ;;  %2742 = vrot.lane.b32.xlu0 %v2632_v29, %s5627_s12 }
 0x328   : > { %v7217_v8 = vpop.permute.xlu0 %2856  ;;  %v7219_v5 = vpop.permute.xlu1 %2982 }
 0x32a   : > { %3632 = vrot.lane.b32.xlu1 %v2665_v59, %s5640_s17  ;;  %3250 = vrot.lane.b32.xlu0 %v2664_v55, %s5637_s9 }
 0x32c   : > { %v3365_v37 = vpop.permute.xlu0 %3364  ;;  %v3491_v20 = vpop.permute.xlu1 %3490 }
 0x32d   : > { %v7226_v58 = vpop.f32.mrb[26].mxu0  ;;  %v3909_v9 = vsel %vm3908_vm0, %v3876_v25, %v3491_v20 }
 0x32e   : > { %2870 = vrot.lane.b32.xlu1 %v2664_v55, %s5630_s15  ;;  %2744 = vrot.lane.b32.xlu0 %v2633_v36, %s5627_s12  ;;  %8641 = vst [vmem:[#allocation24_spill] sm:$0xff] %v7226_v58  ;;  %vm2245_vm13 = vcmp.gt.f32.partialorder %v7226_v58, 0.0  ;;  %v2286_v29 = vmul.f32 %v7226_v58, %v6907_v21  ;;  %v7232_v63 = vpop.f32.mrb[27].mxu0 }
 0x32f   : > { %8642 = vst [vmem:[#allocation25_spill] sm:$0xff] %v7232_v63  ;;  %vm2244_vm14 = vcmp.gt.f32.partialorder %v7232_v63, 0.0  ;;  %v2285_v36 = vmul.f32 %v6907_v21, %v7232_v63 }
 0x330   : > { %v7238_v55 = vpop.permute.xlu0 %2984  ;;  %v7240_v26 = vpop.permute.xlu1 %3110  ;;  %v2318_v27 = vsel %vm2245_vm13, %v7226_v58, %v2286_v29 }
 0x331   : > { %2396 = vst.msk [vmem:[#allocation2 + $0x159] sm:$0xff] %vm1656_vm2, %v2318_v27  ;;  %v2317_v57 = vsel %vm2244_vm14, %v7232_v63, %v2285_v36  ;;  %v3747_v36 = vsel %vm1722_vm4, %v3715_v15, %v7178_v32  ;;  %v2634_v32 = vld [vmem:[#allocation2 + $0x91] sm:$0xff] }
 0x332   : > { %3252 = vrot.lane.b32.xlu0 %v2665_v59, %s5637_s9  ;;  %3378 = vrot.lane.b32.xlu1 %v7244_v18, %s5638_s16  ;;  %2395 = vst.msk [vmem:[#allocation2 + $0x151] sm:$0xff] %vm1656_vm2, %v2317_v57  ;;  %v3779_v43 = vsel %vm1788_vm6, %v3747_v36, %v7192_v52 }
 0x333   : > { %v3811_v20 = vsel %vm8644_vm5, %v3779_v43, %v7204_v38  ;;  %v2667_v43 = vld [vmem:[#allocation2 + $0x9a] sm:$0xff] }
 0x334   : > { %v3493_v29 = vpop.permute.xlu0 %3492  ;;  %v3619_v27 = vpop.permute.xlu1 %3618 }
 0x335   : > { %v3942_v42 = vsel %vm3941_vm1, %v3909_v9, %v3619_v27  ;;  %v2666_v9 = vld [vmem:[#allocation2 + $0x92] sm:$0xff] }
 0x336   : > { %5502 = vmatprep.mubr.msk.f32.mxu1 %vm3983_vm3, %v3942_v42  ;;  %2872 = vrot.lane.b32.xlu0 %v2665_v59, %s5630_s15  ;;  %v3844_v59 = vsel %vm3842_vm12, %v3811_v20, %v3237_v34 }
 0x337   : > { %2998 = vrot.lane.b32.xlu1 %v7244_v18, %s5632_s21  ;;  %v3877_v45 = vsel %vm3875_vm8, %v3844_v59, %v3365_v37  ;;  %v2635_v37 = vld [vmem:[#allocation2 + $0x99] sm:$0xff] }
 0x338   : > { %v7266_v47 = vpop.permute.xlu1 %3112  ;;  %v7268_v25 = vpop.permute.xlu0 %2730  ;;  %v3910_v52 = vsel %vm3908_vm0, %v3877_v45, %v3493_v29  ;;  %v3716_v45 = vsel %vm1656_vm2, %v7010_v14, %v7197_v49 }
 0x33a   : > { %3380 = vrot.lane.b32.xlu0 %v7272_v13, %s5638_s16 }
 0x33b   : > { %3506 = vrot.lane.b32.xlu1 %v2634_v32, %s5639_s11 }
 0x33c   : > { %v3621_v3 = vpop.permute.xlu1 %3620  ;;  %v3239_v57 = vpop.permute.xlu0 %3238 }
 0x33d   : > { %v3943_v15 = vsel %vm3941_vm1, %v3910_v52, %v3621_v3  ;;  %v3748_v52 = vsel %vm1722_vm4, %v3716_v45, %v7211_v39 }
 0x33e   : > { %5503 = vmatmul.mubr.msk.f32.vlgmr.msra.gmra.mrb[0].mxu1 %vm3983_vm3, %v3943_v15  ;;  %3000 = vrot.lane.b32.xlu0 %v7272_v13, %s5632_s21  ;;  %v3780_v60 = vsel %vm1788_vm6, %v3748_v52, %v7219_v5  ;;  %v7329_v52 = vld [vmem:[#allocation2 + $0xa8] sm:$0xff] }
 0x33f   : > { %3126 = vrot.lane.b32.xlu1 %v2634_v32, %s5634_s7 }
 0x340   : > { %v7285_v38 = vpop.permute.xlu1 %2858  ;;  %v7287_v34 = vpop.permute.xlu0 %2732 }
 0x342   : > { %3508 = vrot.lane.b32.xlu0 %v2635_v37, %s5639_s11 }
 0x343   : > { %3634 = vrot.lane.b32.xlu1 %v2666_v9, %s5640_s17 }
 0x344   : > { %v3241_v29 = vpop.permute.xlu0 %3240  ;;  %v3367_v27 = vpop.permute.xlu1 %3366 }
 0x346   : > { %2746 = vrot.lane.b32.xlu0 %v2634_v32, %s5627_s12 }
 0x347   : > { %3128 = vrot.lane.b32.xlu1 %v2635_v37, %s5634_s7 }
 0x348   : > { %v7293_v42 = vpop.permute.xlu0 %2860  ;;  %v7295_v36 = vpop.permute.xlu1 %2986 }
 0x34a   : > { %3254 = vrot.lane.b32.xlu0 %v2666_v9, %s5637_s9 }
 0x34b   : > { %3636 = vrot.lane.b32.xlu1 %v2667_v43, %s5640_s17 }
 0x34c   : > { %v3369_v20 = vpop.permute.xlu0 %3368  ;;  %v3495_v59 = vpop.permute.xlu1 %3494 }
 0x34e   : > { %2748 = vrot.lane.b32.xlu0 %v2635_v37, %s5627_s12  ;;  %v7303_v32 = vpop.f32.mrb[28].mxu0  ;;  %v3812_v37 = vsel %vm8647_vm10, %v3780_v60, %v7240_v26  ;;  %vm8652_vm10 = vmmov %vm8644_vm5 }
 0x34f   : > { %8645 = vst [vmem:[#allocation26_spill] sm:$0xff] %v7303_v32  ;;  %2874 = vrot.lane.b32.xlu1 %v2666_v9, %s5630_s15  ;;  %vm2247_vm7 = vcmp.gt.f32.partialorder %v7303_v32, 0.0  ;;  %v2288_v3 = vmul.f32 %v7303_v32, %v6907_v21  ;;  %v7311_v15 = vpop.f32.mrb[29].mxu0  ;;  %v3845_v45 = vsel %vm3842_vm12, %v3812_v37, %v3239_v57 }
 0x350   : > { %8646 = vst [vmem:[#allocation27_spill] sm:$0xff] %v7311_v15  ;;  %vm2246_vm9 = vcmp.gt.f32.partialorder %v7311_v15, 0.0  ;;  %v2287_v14 = vmul.f32 %v6907_v21, %v7311_v15  ;;  %v7318_v49 = vpop.permute.xlu0 %2988  ;;  %v7320_v39 = vpop.permute.xlu1 %3114  ;;  %v3878_v58 = vsel %vm3875_vm8, %v3845_v45, %v3367_v27 }
 0x351   : > { %v2320_v9 = vsel %vm2247_vm7, %v7303_v32, %v2288_v3  ;;  %v3911_v60 = vsel %vm3908_vm0, %v3878_v58, %v3495_v59  ;;  %vm8650_vm7 = vmmov %vm8644_vm5 }
 0x352   : > { %2398 = vst.msk [vmem:[#allocation2 + $0x171] sm:$0xff] %vm1656_vm2, %v2320_v9  ;;  %v2319_v5 = vsel %vm2246_vm9, %v7311_v15, %v2287_v14  ;;  %3256 = vrot.lane.b32.xlu0 %v2667_v43, %s5637_s9  ;;  %v3717_v14 = vsel %vm1656_vm2, %v7008_v16, %v7209_v22  ;;  %v7354_v22 = vld [vmem:[#allocation2 + $0xb0] sm:$0xff]  ;;  %vm8651_vm9 = vmmov %vm8644_vm5 }
 0x353   : > { %2397 = vst.msk [vmem:[#allocation2 + $0x169] sm:$0xff] %vm1656_vm2, %v2319_v5  ;;  %3382 = vrot.lane.b32.xlu1 %v7329_v52, %s5638_s16  ;;  %v3749_v27 = vsel %vm1722_vm4, %v3717_v14, %v7217_v8  ;;  %v2636_v8 = vld [vmem:[#allocation2 + $0xa9] sm:$0xff] }
 0x354   : > { %v3497_v26 = vpop.permute.xlu0 %3496  ;;  %v3623_v3 = vpop.permute.xlu1 %3622  ;;  %v3781_v58 = vsel %vm1788_vm6, %v3749_v27, %v7238_v55 }
 0x355   : > { %v3944_v57 = vsel %vm3941_vm1, %v3911_v60, %v3623_v3  ;;  %v3813_v16 = vsel %vm8648_vm11, %v3781_v58, %v7266_v47  ;;  %v2637_v58 = vld [vmem:[#allocation2 + $0xb1] sm:$0xff]  ;;  %vm8653_vm11 = vmmov %vm8644_vm5 }
 0x356   : > { %5505 = vmatprep.mubr.msk.f32.mxu1 %vm3983_vm3, %v3944_v57  ;;  %2876 = vrot.lane.b32.xlu0 %v2667_v43, %s5630_s15  ;;  %v3846_v43 = vsel %vm3842_vm12, %v3813_v16, %v3241_v29  ;;  %v2668_v16 = vld [vmem:[#allocation2 + $0xaa] sm:$0xff] }
 0x357   : > { %3002 = vrot.lane.b32.xlu1 %v7329_v52, %s5632_s21  ;;  %v3879_v9 = vsel %vm3875_vm8, %v3846_v43, %v3369_v20 }
 0x358   : > { %v7348_v59 = vpop.permute.xlu1 %3116  ;;  %v7350_v37 = vpop.permute.xlu0 %2734  ;;  %v3912_v45 = vsel %vm3908_vm0, %v3879_v9, %v3497_v26 }
 0x35a   : > { %3384 = vrot.lane.b32.xlu0 %v7354_v22, %s5638_s16 }
 0x35b   : > { %3510 = vrot.lane.b32.xlu1 %v2636_v8, %s5639_s11  ;;  %v7361_v55 = vpop.f32.mrb[30].mxu0 }
 0x35c   : > { %vm2249_vm13 = vcmp.gt.f32.partialorder %v7361_v55, 0.0  ;;  %v2290_v47 = vmul.f32 %v7361_v55, %v6907_v21  ;;  %v3625_v5 = vpop.permute.xlu1 %3624  ;;  %v3243_v60 = vpop.permute.xlu0 %3242 }
 0x35d   : > { %v3945_v29 = vsel %vm3941_vm1, %v3912_v45, %v3625_v5  ;;  %v7368_v3 = vpop.f32.mrb[31].mxu0  ;;  %v2669_v5 = vld [vmem:[#allocation2 + $0xb2] sm:$0xff] }
 0x35e   : > { %v2322_v57 = vsel %vm2249_vm13, %v7361_v55, %v2290_v47  ;;  %vm2248_vm14 = vcmp.gt.f32.partialorder %v7368_v3, 0.0  ;;  %v2289_v20 = vmul.f32 %v6907_v21, %v7368_v3  ;;  %5506 = vmatmul.mubr.msk.f32.gmra.mrb[2].mxu1 %vm3983_vm3, %v3945_v29  ;;  %3004 = vrot.lane.b32.xlu0 %v7354_v22, %s5632_s21  ;;  %vm8654_vm13 = vmmov %vm8644_vm5 }
 0x35f   : > { %2400 = vst.msk [vmem:[#allocation2 + $0x189] sm:$0xff] %vm1656_vm2, %v2322_v57  ;;  %3130 = vrot.lane.b32.xlu1 %v2636_v8, %s5634_s7 }
 0x360   : > { %v2321_v26 = vsel %vm2248_vm14, %v7368_v3, %v2289_v20  ;;  %v7380_v14 = vpop.permute.xlu1 %2862  ;;  %v7382_v27 = vpop.permute.xlu0 %2736  ;;  %v3718_v20 = vsel %vm1656_vm2, %v7044_v35, %v7268_v25  ;;  %v7410_v35 = vld [vmem:[#allocation2 + $0xc0] sm:$0xff]  ;;  %vm8655_vm14 = vmmov %vm8644_vm5 }
 0x361   : > { %2399 = vst.msk [vmem:[#allocation2 + $0x181] sm:$0xff] %vm1656_vm2, %v2321_v26 }
 0x362   : > { %3512 = vrot.lane.b32.xlu0 %v2637_v58, %s5639_s11 }
 0x363   : > { %3638 = vrot.lane.b32.xlu1 %v2668_v16, %s5640_s17 }
 0x364   : > { %v3245_v43 = vpop.permute.xlu0 %3244  ;;  %v3371_v9 = vpop.permute.xlu1 %3370 }
 0x366   : > { %2750 = vrot.lane.b32.xlu0 %v2636_v8, %s5627_s12  ;;  %v3750_v8 = vsel %vm1722_vm4, %v3718_v20, %v7285_v38 }
 0x367   : > { %3132 = vrot.lane.b32.xlu1 %v2637_v58, %s5634_s7  ;;  %v3782_v26 = vsel %vm1788_vm6, %v3750_v8, %v7295_v36 }
 0x368   : > { %v7389_v45 = vpop.permute.xlu0 %2864  ;;  %v7391_v47 = vpop.permute.xlu1 %2990  ;;  %v3814_v63 = vsel %vm8649_vm15, %v3782_v26, %v7320_v39  ;;  %v3719_v39 = vsel %vm1656_vm2, %v7074_v28, %v7287_v34  ;;  %v7432_v28 = vld [vmem:[#allocation2 + $0xc8] sm:$0xff]  ;;  %vm8656_vm15 = vmmov %vm8644_vm5 }
 0x369   : > { %v3847_v40 = vsel %vm3842_vm12, %v3814_v63, %v3243_v60  ;;  %v3751_v63 = vsel %vm1722_vm4, %v3719_v39, %v7293_v42  ;;  %v2638_v42 = vld [vmem:[#allocation2 + $0xc1] sm:$0xff]  ;;  %v2671_v39 = vld [vmem:[#allocation2 + $0xca] sm:$0xff] }
 0x36a   : > { %3258 = vrot.lane.b32.xlu0 %v2668_v16, %s5637_s9  ;;  %v3880_v25 = vsel %vm3875_vm8, %v3847_v40, %v3371_v9  ;;  %v3783_v40 = vsel %vm1788_vm6, %v3751_v63, %v7318_v49 }
 0x36b   : > { %3640 = vrot.lane.b32.xlu1 %v2669_v5, %s5640_s17 }
 0x36c   : > { %v3373_v29 = vpop.permute.xlu0 %3372  ;;  %v3499_v57 = vpop.permute.xlu1 %3498 }
 0x36d   : > { %v3913_v38 = vsel %vm3908_vm0, %v3880_v25, %v3499_v57  ;;  %v3815_v57 = vsel %vm8644_vm5, %v3783_v40, %v7348_v59  ;;  %v2670_v25 = vld [vmem:[#allocation2 + $0xc2] sm:$0xff] }
 0x36e   : > { %2752 = vrot.lane.b32.xlu0 %v2637_v58, %s5627_s12  ;;  %v3848_v34 = vsel %vm3842_vm12, %v3815_v57, %v3245_v43  ;;  %v3720_v57 = vsel %vm1656_vm2, %v7103_v12, %v7350_v37  ;;  %v7473_v12 = vld [vmem:[#allocation2 + $0xd8] sm:$0xff] }
 0x36f   : > { %2878 = vrot.lane.b32.xlu1 %v2668_v16, %s5630_s15 }
 0x370   : > { %v7404_v32 = vpop.permute.xlu0 %2992  ;;  %v3119_v15 = vpop.permute.xlu1 %3118 }
 0x372   : > { %3260 = vrot.lane.b32.xlu0 %v2669_v5, %s5637_s9 }
 0x373   : > { %3386 = vrot.lane.b32.xlu1 %v7410_v35, %s5638_s16 }
 0x374   : > { %v3501_v36 = vpop.permute.xlu0 %3500  ;;  %v3627_v58 = vpop.permute.xlu1 %3626 }
 0x375   : > { %v3946_v16 = vsel %vm3941_vm1, %v3913_v38, %v3627_v58 }
 0x376   : > { %5508 = vmatprep.mubr.msk.f32.mxu1 %vm3983_vm3, %v3946_v16  ;;  %2880 = vrot.lane.b32.xlu0 %v2669_v5, %s5630_s15  ;;  %v3881_v5 = vsel %vm3875_vm8, %v3848_v34, %v3373_v29  ;;  %v2639_v29 = vld [vmem:[#allocation2 + $0xc9] sm:$0xff]  ;;  %v3752_v34 = vsel %vm1722_vm4, %v3720_v57, %v7380_v14 }
 0x377   : > { %3006 = vrot.lane.b32.xlu1 %v7410_v35, %s5632_s21  ;;  %v3914_v49 = vsel %vm3908_vm0, %v3881_v5, %v3501_v36 }
 0x378   : > { %v3121_v60 = vpop.permute.xlu1 %3120  ;;  %v7428_v9 = vpop.permute.xlu0 %2738 }
 0x37a   : > { %3388 = vrot.lane.b32.xlu0 %v7432_v28, %s5638_s16 }
 0x37b   : > { %3514 = vrot.lane.b32.xlu1 %v2638_v42, %s5639_s11 }
 0x37c   : > { %v3629_v20 = vpop.permute.xlu1 %3628  ;;  %v3247_v8 = vpop.permute.xlu0 %3246 }
 0x37d   : > { %v3947_v26 = vsel %vm3941_vm1, %v3914_v49, %v3629_v20 }
 0x37e   : > { %5509 = vmatmul.mubr.msk.f32.gmra.mrb[4].mxu1 %vm3983_vm3, %v3947_v26  ;;  %3008 = vrot.lane.b32.xlu0 %v7432_v28, %s5632_s21 }
 0x37f   : > { %3134 = vrot.lane.b32.xlu1 %v2638_v42, %s5634_s7 }
 0x380   : > { %v7445_v59 = vpop.permute.xlu1 %2866  ;;  %v7447_v43 = vpop.permute.xlu0 %2740 }
 0x382   : > { %3516 = vrot.lane.b32.xlu0 %v2639_v29, %s5639_s11 }
 0x383   : > { %3642 = vrot.lane.b32.xlu1 %v2670_v25, %s5640_s17 }
 0x384   : > { %v3249_v38 = vpop.permute.xlu0 %3248  ;;  %v3375_v36 = vpop.permute.xlu1 %3374 }
 0x386   : > { %2754 = vrot.lane.b32.xlu0 %v2638_v42, %s5627_s12  ;;  %v3784_v42 = vsel %vm1788_vm6, %v3752_v34, %v7391_v47 }
 0x387   : > { %3136 = vrot.lane.b32.xlu1 %v2639_v29, %s5634_s7  ;;  %v3816_v20 = vsel %vm8650_vm7, %v3784_v42, %v3119_v15  ;;  %v3721_v15 = vsel %vm1656_vm2, %v7115_v10, %v7382_v27  ;;  %v7494_v42 = vld [vmem:[#allocation2 + $0xe0] sm:$0xff]  ;;  %vm8657_vm7 = vmmov %vm8644_vm5 }
 0x388   : > { %v7453_v58 = vpop.permute.xlu0 %2868  ;;  %v7455_v16 = vpop.permute.xlu1 %2994  ;;  %v3849_v26 = vsel %vm3842_vm12, %v3816_v20, %v3247_v8  ;;  %v3753_v8 = vsel %vm1722_vm4, %v3721_v15, %v7389_v45  ;;  %v2640_v27 = vld [vmem:[#allocation2 + $0xd9] sm:$0xff]  ;;  %v2673_v15 = vld [vmem:[#allocation2 + $0xe2] sm:$0xff] }
 0x389   : > { %v3882_v37 = vsel %vm3875_vm8, %v3849_v26, %v3375_v36  ;;  %v3785_v36 = vsel %vm1788_vm6, %v3753_v8, %v7404_v32 }
 0x38a   : > { %3262 = vrot.lane.b32.xlu0 %v2670_v25, %s5637_s9  ;;  %v3817_v34 = vsel %vm8651_vm9, %v3785_v36, %v3121_v60  ;;  %vm4335_vm9 = vcmask 1046528  }
 0x38b   : > { %3644 = vrot.lane.b32.xlu1 %v2671_v39, %s5640_s17  ;;  %v3850_v10 = vsel %vm3842_vm12, %v3817_v34, %v3249_v38  ;;  %v3722_v34 = vsel %vm1656_vm2, %v7142_v53, %v7428_v9 }
 0x38c   : > { %v3377_v63 = vpop.permute.xlu0 %3376  ;;  %v3503_v40 = vpop.permute.xlu1 %3502 }
 0x38d   : > { %v3915_v14 = vsel %vm3908_vm0, %v3882_v37, %v3503_v40  ;;  %v3883_v45 = vsel %vm3875_vm8, %v3850_v10, %v3377_v63  ;;  %v2641_v63 = vld [vmem:[#allocation2 + $0xe1] sm:$0xff]  ;;  %v3754_v10 = vsel %vm1722_vm4, %v3722_v34, %v7445_v59 }
 0x38e   : > { %2756 = vrot.lane.b32.xlu0 %v2639_v29, %s5627_s12  ;;  %v2672_v37 = vld [vmem:[#allocation2 + $0xda] sm:$0xff] }
 0x38f   : > { %2882 = vrot.lane.b32.xlu1 %v2670_v25, %s5630_s15 }
 0x390   : > { %v7468_v5 = vpop.permute.xlu0 %2996  ;;  %v3123_v49 = vpop.permute.xlu1 %3122 }
 0x392   : > { %3264 = vrot.lane.b32.xlu0 %v2671_v39, %s5637_s9 }
 0x393   : > { %3390 = vrot.lane.b32.xlu1 %v7473_v12, %s5638_s16 }
 0x394   : > { %v3505_v29 = vpop.permute.xlu0 %3504  ;;  %v3631_v47 = vpop.permute.xlu1 %3630 }
 0x395   : > { %v3948_v25 = vsel %vm3941_vm1, %v3915_v14, %v3631_v47 }
 0x396   : > { %5511 = vmatprep.mubr.msk.f32.mxu1 %vm3983_vm3, %v3948_v25  ;;  %2884 = vrot.lane.b32.xlu0 %v2671_v39, %s5630_s15  ;;  %v3916_v39 = vsel %vm3908_vm0, %v3883_v45, %v3505_v29  ;;  %v3786_v45 = vsel %vm1788_vm6, %v3754_v10, %v7455_v16  ;;  %v7555_v10 = vld [vmem:[#allocation2 + $0xf8] sm:$0xff] }
 0x397   : > { %3010 = vrot.lane.b32.xlu1 %v7473_v12, %s5632_s21 }
 0x398   : > { %v3125_v40 = vpop.permute.xlu1 %3124  ;;  %v7491_v57 = vpop.permute.xlu0 %2742 }
 0x39a   : > { %3392 = vrot.lane.b32.xlu0 %v7494_v42, %s5638_s16 }
 0x39b   : > { %3518 = vrot.lane.b32.xlu1 %v2640_v27, %s5639_s11 }
 0x39c   : > { %v3633_v32 = vpop.permute.xlu1 %3632  ;;  %v3251_v20 = vpop.permute.xlu0 %3250 }
 0x39d   : > { %v3949_v26 = vsel %vm3941_vm1, %v3916_v39, %v3633_v32  ;;  %v3818_v32 = vsel %vm8652_vm10, %v3786_v45, %v3123_v49  ;;  %v3723_v49 = vsel %vm1656_vm2, %v7153_v54, %v7447_v43  ;;  %v2642_v54 = vld [vmem:[#allocation2 + $0xf1] sm:$0xff]  ;;  %vm8658_vm10 = vmmov %vm8644_vm5 }
 0x39e   : > { %5512 = vmatmul.mubr.msk.f32.gmra.mrb[6].mxu1 %vm3983_vm3, %v3949_v26  ;;  %3012 = vrot.lane.b32.xlu0 %v7494_v42, %s5632_s21  ;;  %v7534_v26 = vld [vmem:[#allocation2 + $0xf0] sm:$0xff] }
 0x39f   : > { %3138 = vrot.lane.b32.xlu1 %v2640_v27, %s5634_s7 }
 0x3a0   : > { %v7507_v60 = vpop.permute.xlu1 %2870  ;;  %v7509_v38 = vpop.permute.xlu0 %2744 }
 0x3a2   : > { %3520 = vrot.lane.b32.xlu0 %v2641_v63, %s5639_s11 }
 0x3a3   : > { %3646 = vrot.lane.b32.xlu1 %v2672_v37, %s5640_s17 }
 0x3a4   : > { %v3253_v14 = vpop.permute.xlu0 %3252  ;;  %v3379_v29 = vpop.permute.xlu1 %3378 }
 0x3a6   : > { %2758 = vrot.lane.b32.xlu0 %v2640_v27, %s5627_s12 }
 0x3a7   : > { %3140 = vrot.lane.b32.xlu1 %v2641_v63, %s5634_s7 }
 0x3a8   : > { %v7515_v47 = vpop.permute.xlu0 %2872 }
 0x3a9   : > { %v7517_v25 = vpop.permute.xlu1 %2998 }
 0x3aa   : > { %3266 = vrot.lane.b32.xlu0 %v2672_v37, %s5637_s9 }
 0x3ab   : > { %3648 = vrot.lane.b32.xlu1 %v2673_v15, %s5640_s17 }
 0x3ac   : > { %v3381_v8 = vpop.permute.xlu0 %3380 }
 0x3ad   : > { %v3507_v36 = vpop.permute.xlu1 %3506 }
 0x3ae   : > { %2760 = vrot.lane.b32.xlu0 %v2641_v63, %s5627_s12  ;;  %v3851_v63 = vsel %vm3842_vm12, %v3818_v32, %v3251_v20  ;;  %v3755_v20 = vsel %vm1722_vm4, %v3723_v49, %v7453_v58  ;;  %v2675_v49 = vld [vmem:[#allocation2 + $0xfa] sm:$0xff] }
 0x3af   : > { %2886 = vrot.lane.b32.xlu1 %v2672_v37, %s5630_s15  ;;  %v3884_v53 = vsel %vm3875_vm8, %v3851_v63, %v3379_v29 }
 0x3b0   : > { %v7528_v27 = vpop.permute.xlu0 %3000  ;;  %v3917_v59 = vsel %vm3908_vm0, %v3884_v53, %v3507_v36  ;;  %v3787_v36 = vsel %vm1788_vm6, %v3755_v20, %v7468_v5  ;;  %v2643_v53 = vld [vmem:[#allocation2 + $0xf9] sm:$0xff] }
 0x3b1   : > { %v3127_v39 = vpop.permute.xlu1 %3126 }
 0x3b2   : > { %3268 = vrot.lane.b32.xlu0 %v2673_v15, %s5637_s9 }
 0x3b3   : > { %3394 = vrot.lane.b32.xlu1 %v7534_v26, %s5638_s16 }
 0x3b4   : > { %v3509_v9 = vpop.permute.xlu0 %3508 }
 0x3b5   : > { %v3635_v37 = vpop.permute.xlu1 %3634 }
 0x3b6   : > { %v3950_v16 = vsel %vm3941_vm1, %v3917_v59, %v3635_v37  ;;  %2888 = vrot.lane.b32.xlu0 %v2673_v15, %s5630_s15  ;;  %v3819_v15 = vsel %vm8653_vm11, %v3787_v36, %v3125_v40  ;;  %vm8659_vm11 = vmmov %vm8644_vm5 }
 0x3b7   : > { %5514 = vmatprep.mubr.msk.f32.mxu1 %vm3983_vm3, %v3950_v16  ;;  %3014 = vrot.lane.b32.xlu1 %v7534_v26, %s5632_s21  ;;  %v3852_v43 = vsel %vm3842_vm12, %v3819_v15, %v3253_v14  ;;  %v3724_v15 = vsel %vm1656_vm2, %v7184_v48, %v7491_v57 }
 0x3b8   : > { %v7551_v29 = vpop.permute.xlu0 %2746  ;;  %v3885_v58 = vsel %vm3875_vm8, %v3852_v43, %v3381_v8  ;;  %v2674_v8 = vld [vmem:[#allocation2 + $0xf2] sm:$0xff] }
 0x3b9   : > { %v3129_v34 = vpop.permute.xlu1 %3128  ;;  %v3918_v32 = vsel %vm3908_vm0, %v3885_v58, %v3509_v9 }
 0x3ba   : > { %3396 = vrot.lane.b32.xlu0 %v7555_v10, %s5638_s16 }
 0x3bb   : > { %3522 = vrot.lane.b32.xlu1 %v2642_v54, %s5639_s11 }
 0x3bc   : > { %v3255_v45 = vpop.permute.xlu0 %3254 }
 0x3bd   : > { %v3637_v63 = vpop.permute.xlu1 %3636 }
 0x3be   : > { %v3951_v5 = vsel %vm3941_vm1, %v3918_v32, %v3637_v63  ;;  %3016 = vrot.lane.b32.xlu0 %v7555_v10, %s5632_s21 }
 0x3bf   : > { %5515 = vmatmul.mubr.msk.f32.gmra.mrb[8].mxu1 %vm3983_vm3, %v3951_v5  ;;  %3142 = vrot.lane.b32.xlu1 %v2642_v54, %s5634_s7  ;;  %v7596_v5 = vld [vmem:[#allocation2 + $0x108] sm:$0xff] }
 0x3c0   : > { %v7569_v40 = vpop.permute.xlu0 %2748 }
 0x3c1   : > { %v7571_v14 = vpop.permute.xlu1 %2874 }
 0x3c2   : > { %3524 = vrot.lane.b32.xlu0 %v2643_v53, %s5639_s11 }
 0x3c3   : > { %3650 = vrot.lane.b32.xlu1 %v2674_v8, %s5640_s17 }
 0x3c4   : > { %v3257_v9 = vpop.permute.xlu0 %3256 }
 0x3c5   : > { %v3383_v59 = vpop.permute.xlu1 %3382 }
 0x3c6   : > { %2762 = vrot.lane.b32.xlu0 %v2642_v54, %s5627_s12  ;;  %v3756_v54 = vsel %vm1722_vm4, %v3724_v15, %v7507_v60 }
 0x3c7   : > { %3144 = vrot.lane.b32.xlu1 %v2643_v53, %s5634_s7  ;;  %v3788_v58 = vsel %vm1788_vm6, %v3756_v54, %v7517_v25  ;;  %v7617_v54 = vld [vmem:[#allocation2 + $0x110] sm:$0xff] }
 0x3c8   : > { %v7577_v37 = vpop.permute.xlu0 %2876  ;;  %v3820_v63 = vsel %vm8654_vm13, %v3788_v58, %v3127_v39  ;;  %v3725_v39 = vsel %vm1656_vm2, %v7199_v1, %v7509_v38  ;;  %v2644_v1 = vld [vmem:[#allocation2 + $0x109] sm:$0xff]  ;;  %vm4562_vm13 = vcmask 63488  }
 0x3c9   : > { %v7579_v16 = vpop.permute.xlu1 %3002 }
 0x3ca   : > { %3270 = vrot.lane.b32.xlu0 %v2674_v8, %s5637_s9 }
 0x3cb   : > { %3652 = vrot.lane.b32.xlu1 %v2675_v49, %s5640_s17 }
 0x3cc   : > { %v3385_v20 = vpop.permute.xlu0 %3384 }
 0x3cd   : > { %v3511_v36 = vpop.permute.xlu1 %3510 }
 0x3ce   : > { %2764 = vrot.lane.b32.xlu0 %v2643_v53, %s5627_s12  ;;  %v3853_v53 = vsel %vm3842_vm12, %v3820_v63, %v3255_v45  ;;  %v3757_v45 = vsel %vm1722_vm4, %v3725_v39, %v7515_v47  ;;  %v2677_v39 = vld [vmem:[#allocation2 + $0x112] sm:$0xff] }
 0x3cf   : > { %2890 = vrot.lane.b32.xlu1 %v2674_v8, %s5630_s15  ;;  %v3886_v48 = vsel %vm3875_vm8, %v3853_v53, %v3383_v59 }
 0x3d0   : > { %v7590_v43 = vpop.permute.xlu0 %3004  ;;  %v3919_v60 = vsel %vm3908_vm0, %v3886_v48, %v3511_v36  ;;  %v3789_v36 = vsel %vm1788_vm6, %v3757_v45, %v7528_v27  ;;  %v2645_v48 = vld [vmem:[#allocation2 + $0x111] sm:$0xff] }
 0x3d1   : > { %v3131_v32 = vpop.permute.xlu1 %3130 }
 0x3d2   : > { %3272 = vrot.lane.b32.xlu0 %v2675_v49, %s5637_s9 }
 0x3d3   : > { %3398 = vrot.lane.b32.xlu1 %v7596_v5, %s5638_s16 }
 0x3d4   : > { %v3513_v57 = vpop.permute.xlu0 %3512 }
 0x3d5   : > { %v3639_v8 = vpop.permute.xlu1 %3638 }
 0x3d6   : > { %v3952_v25 = vsel %vm3941_vm1, %v3919_v60, %v3639_v8  ;;  %2892 = vrot.lane.b32.xlu0 %v2675_v49, %s5630_s15  ;;  %v3821_v49 = vsel %vm8655_vm14, %v3789_v36, %v3129_v34  ;;  %vm8661_vm14 = vmmov %vm8644_vm5 }
 0x3d7   : > { %5517 = vmatprep.mubr.msk.f32.mxu1 %vm3983_vm3, %v3952_v25  ;;  %3018 = vrot.lane.b32.xlu1 %v7596_v5, %s5632_s21  ;;  %v3854_v38 = vsel %vm3842_vm12, %v3821_v49, %v3257_v9  ;;  %v3726_v49 = vsel %vm1656_vm2, %v7244_v18, %v7551_v29 }
 0x3d8   : > { %v7613_v59 = vpop.permute.xlu0 %2750  ;;  %v3887_v47 = vsel %vm3875_vm8, %v3854_v38, %v3385_v20  ;;  %v2676_v20 = vld [vmem:[#allocation2 + $0x10a] sm:$0xff] }
 0x3d9   : > { %v3133_v15 = vpop.permute.xlu1 %3132  ;;  %v3920_v63 = vsel %vm3908_vm0, %v3887_v47, %v3513_v57 }
 0x3da   : > { %3400 = vrot.lane.b32.xlu0 %v7617_v54, %s5638_s16 }
 0x3db   : > { %3526 = vrot.lane.b32.xlu1 %v2644_v1, %s5639_s11 }
 0x3dc   : > { %v3259_v58 = vpop.permute.xlu0 %3258 }
 0x3dd   : > { %v3641_v53 = vpop.permute.xlu1 %3640 }
 0x3de   : > { %v3953_v27 = vsel %vm3941_vm1, %v3920_v63, %v3641_v53  ;;  %3020 = vrot.lane.b32.xlu0 %v7617_v54, %s5632_s21 }
 0x3df   : > { %5518 = vmatmul.mubr.msk.f32.gmra.mrb[10].mxu1 %vm3983_vm3, %v3953_v27  ;;  %3146 = vrot.lane.b32.xlu1 %v2644_v1, %s5634_s7  ;;  %v7658_v27 = vld [vmem:[#allocation2 + $0x120] sm:$0xff] }
 0x3e0   : > { %v7631_v34 = vpop.permute.xlu0 %2752 }
 0x3e1   : > { %v7633_v9 = vpop.permute.xlu1 %2878 }
 0x3e2   : > { %3528 = vrot.lane.b32.xlu0 %v2645_v48, %s5639_s11 }
 0x3e3   : > { %3654 = vrot.lane.b32.xlu1 %v2676_v20, %s5640_s17 }
 0x3e4   : > { %v3261_v57 = vpop.permute.xlu0 %3260 }
 0x3e5   : > { %v3387_v60 = vpop.permute.xlu1 %3386 }
 0x3e6   : > { %2766 = vrot.lane.b32.xlu0 %v2644_v1, %s5627_s12  ;;  %v3758_v1 = vsel %vm1722_vm4, %v3726_v49, %v7571_v14 }
 0x3e7   : > { %3148 = vrot.lane.b32.xlu1 %v2645_v48, %s5634_s7  ;;  %v3790_v47 = vsel %vm1788_vm6, %v3758_v1, %v7579_v16 }
 0x3e8   : > { %v7639_v8 = vpop.permute.xlu0 %2880  ;;  %v3822_v53 = vsel %vm8656_vm15, %v3790_v47, %v3131_v32  ;;  %v3727_v32 = vsel %vm1656_vm2, %v7272_v13, %v7569_v40  ;;  %v2646_v13 = vld [vmem:[#allocation2 + $0x121] sm:$0xff]  ;;  %vm8663_vm15 = vmmov %vm8644_vm5 }
 0x3e9   : > { %v7641_v25 = vpop.permute.xlu1 %3006 }
 0x3ea   : > { %3274 = vrot.lane.b32.xlu0 %v2676_v20, %s5637_s9 }
 0x3eb   : > { %3656 = vrot.lane.b32.xlu1 %v2677_v39, %s5640_s17 }
 0x3ec   : > { %v3389_v45 = vpop.permute.xlu0 %3388 }
 0x3ed   : > { %v3515_v36 = vpop.permute.xlu1 %3514 }
 0x3ee   : > { %2768 = vrot.lane.b32.xlu0 %v2645_v48, %s5627_s12  ;;  %v3855_v48 = vsel %vm3842_vm12, %v3822_v53, %v3259_v58  ;;  %v3759_v58 = vsel %vm1722_vm4, %v3727_v32, %v7577_v37  ;;  %v2679_v32 = vld [vmem:[#allocation2 + $0x12a] sm:$0xff] }
 0x3ef   : > { %2894 = vrot.lane.b32.xlu1 %v2676_v20, %s5630_s15  ;;  %v3888_v18 = vsel %vm3875_vm8, %v3855_v48, %v3387_v60 }
 0x3f0   : > { %v7652_v38 = vpop.permute.xlu0 %3008  ;;  %v3921_v14 = vsel %vm3908_vm0, %v3888_v18, %v3515_v36  ;;  %v3791_v36 = vsel %vm1788_vm6, %v3759_v58, %v7590_v43  ;;  %v2647_v18 = vld [vmem:[#allocation2 + $0x129] sm:$0xff] }
 0x3f1   : > { %v3135_v63 = vpop.permute.xlu1 %3134  ;;  %v3823_v1 = vsel %vm8644_vm5, %v3791_v36, %v3133_v15 }
 0x3f2   : > { %3276 = vrot.lane.b32.xlu0 %v2677_v39, %s5637_s9  ;;  %v3856_v40 = vsel %vm3842_vm12, %v3823_v1, %v3261_v57  ;;  %v3728_v1 = vsel %vm1656_vm2, %v7329_v52, %v7613_v59  ;;  %v7729_v52 = vld [vmem:[#allocation2 + $0x138] sm:$0xff] }
 0x3f3   : > { %3402 = vrot.lane.b32.xlu1 %v7658_v27, %s5638_s16  ;;  %v3889_v37 = vsel %vm3875_vm8, %v3856_v40, %v3389_v45  ;;  %v2678_v45 = vld [vmem:[#allocation2 + $0x122] sm:$0xff] }
 0x3f4   : > { %v3517_v29 = vpop.permute.xlu0 %3516 }
 0x3f5   : > { %v3643_v20 = vpop.permute.xlu1 %3642  ;;  %v3922_v53 = vsel %vm3908_vm0, %v3889_v37, %v3517_v29 }
 0x3f6   : > { %v3954_v16 = vsel %vm3941_vm1, %v3921_v14, %v3643_v20  ;;  %2896 = vrot.lane.b32.xlu0 %v2677_v39, %s5630_s15  ;;  %v7681_v39 = vld [vmem:[#allocation2 + $0x128] sm:$0xff] }
 0x3f7   : > { %5520 = vmatprep.mubr.msk.f32.mxu1 %vm3983_vm3, %v3954_v16  ;;  %3022 = vrot.lane.b32.xlu1 %v7658_v27, %s5632_s21 }
 0x3f8   : > { %v7675_v60 = vpop.permute.xlu0 %2754 }
 0x3f9   : > { %v7679_v49 = vpop.permute.xlu1 %3136 }
 0x3fa   : > { %3404 = vrot.lane.b32.xlu0 %v7681_v39, %s5638_s16 }
 0x3fb   : > { %3530 = vrot.lane.b32.xlu1 %v2646_v13, %s5639_s11 }
 0x3fc   : > { %v3263_v47 = vpop.permute.xlu0 %3262 }
 0x3fd   : > { %v3645_v43 = vpop.permute.xlu1 %3644 }
 0x3fe   : > { %v3955_v48 = vsel %vm3941_vm1, %v3922_v53, %v3645_v43  ;;  %3024 = vrot.lane.b32.xlu0 %v7681_v39, %s5632_s21 }
 0x3ff   : > { %5521 = vmatmul.mubr.msk.f32.gmra.mrb[12].mxu1 %vm3983_vm3, %v3955_v48  ;;  %3150 = vrot.lane.b32.xlu1 %v2646_v13, %s5634_s7 }
 0x400   : > { %v7695_v15 = vpop.permute.xlu0 %2756 }
 0x401   : > { %v7697_v57 = vpop.permute.xlu1 %2882 }
 0x402   : > { %3532 = vrot.lane.b32.xlu0 %v2647_v18, %s5639_s11 }
 0x403   : > { %3658 = vrot.lane.b32.xlu1 %v2678_v45, %s5640_s17 }
 0x404   : > { %v3265_v29 = vpop.permute.xlu0 %3264 }
 0x405   : > { %v3391_v14 = vpop.permute.xlu1 %3390 }
 0x406   : > { %2770 = vrot.lane.b32.xlu0 %v2646_v13, %s5627_s12  ;;  %v3760_v13 = vsel %vm1722_vm4, %v3728_v1, %v7633_v9 }
 0x407   : > { %3152 = vrot.lane.b32.xlu1 %v2647_v18, %s5634_s7  ;;  %v3792_v37 = vsel %vm1788_vm6, %v3760_v13, %v7641_v25 }
 0x408   : > { %v7703_v20 = vpop.permute.xlu0 %2884  ;;  %v3824_v48 = vsel %vm8657_vm7, %v3792_v37, %v3135_v63  ;;  %vm8664_vm7 = vmmov %vm8644_vm5 }
 0x409   : > { %v7705_v16 = vpop.permute.xlu1 %3010  ;;  %v3857_v59 = vsel %vm3842_vm12, %v3824_v48, %v3263_v47  ;;  %v3729_v47 = vsel %vm1656_vm2, %v7354_v22, %v7631_v34 }
 0x40a   : > { %3278 = vrot.lane.b32.xlu0 %v2678_v45, %s5637_s9  ;;  %v3890_v25 = vsel %vm3875_vm8, %v3857_v59, %v3391_v14  ;;  %v3761_v14 = vsel %vm1722_vm4, %v3729_v47, %v7639_v8 }
 0x40b   : > { %3660 = vrot.lane.b32.xlu1 %v2679_v32, %s5640_s17  ;;  %v3793_v48 = vsel %vm1788_vm6, %v3761_v14, %v7652_v38 }
 0x40c   : > { %v3393_v58 = vpop.permute.xlu0 %3392  ;;  %v3825_v22 = vsel %vm8658_vm10, %v3793_v48, %v7679_v49  ;;  %v2681_v48 = vld [vmem:[#allocation2 + $0x142] sm:$0xff]  ;;  %vm8665_vm10 = vmmov %vm8644_vm5 }
 0x40d   : > { %v3519_v36 = vpop.permute.xlu1 %3518  ;;  %v3858_v34 = vsel %vm3842_vm12, %v3825_v22, %v3265_v29 }
 0x40e   : > { %2772 = vrot.lane.b32.xlu0 %v2647_v18, %s5627_s12  ;;  %v3923_v63 = vsel %vm3908_vm0, %v3890_v25, %v3519_v36  ;;  %v3891_v8 = vsel %vm3875_vm8, %v3858_v34, %v3393_v58  ;;  %v2680_v58 = vld [vmem:[#allocation2 + $0x13a] sm:$0xff] }
 0x40f   : > { %2898 = vrot.lane.b32.xlu1 %v2678_v45, %s5630_s15 }
 0x410   : > { %v7716_v40 = vpop.permute.xlu0 %3012 }
 0x411   : > { %v7720_v53 = vpop.permute.xlu1 %3138  ;;  %v7722_v43 = vpop.f32.mrb[0].mxu1 }
 0x412   : > { %v4337_v18 = vrot.slane %v7722_v43, 1  ;;  %v7726_v11 = vpop.f32.mrb[1].mxu1  ;;  %3280 = vrot.lane.b32.xlu0 %v2679_v32, %s5637_s9 }
 0x413   : > { %v4336_v9 = vrot.slane %v7726_v11, 1  ;;  %3406 = vrot.lane.b32.xlu1 %v7729_v52, %s5638_s16 }
 0x414   : > { %v3521_v45 = vpop.permute.xlu0 %3520 }
 0x415   : > { %v4338_v1 = vsel %vm4335_vm9, %v4336_v9, %v4337_v18  ;;  %v3647_v13 = vpop.permute.xlu1 %3646  ;;  %v3924_v38 = vsel %vm3908_vm0, %v3891_v8, %v3521_v45  ;;  %v3730_v8 = vsel %vm1656_vm2, %v7410_v35, %v7675_v60 }
 0x416   : > { %v7739_v37 = vsub.f32 %v7726_v11, %v4338_v1  ;;  %v3956_v46 = vsel %vm3941_vm1, %v3923_v63, %v3647_v13  ;;  %2900 = vrot.lane.b32.xlu0 %v2679_v32, %s5630_s15  ;;  %v7757_v32 = vld [vmem:[#allocation2 + $0x140] sm:$0xff] }
 0x417   : > { %5523 = vmatprep.mubr.msk.f32.mxu1 %vm3983_vm3, %v3956_v46  ;;  %3026 = vrot.lane.b32.xlu1 %v7729_v52, %s5632_s21  ;;  %v2648_v46 = vld [vmem:[#allocation2 + $0x139] sm:$0xff]  ;;  %v2649_v1 = vld [vmem:[#allocation2 + $0x141] sm:$0xff] }
 0x418   : > { %v7751_v36 = vpop.permute.xlu0 %2758  ;;  %v4441_v61 = vmul.f32 %v7739_v37, %v7739_v37  ;;  %v3731_v37 = vsel %vm1656_vm2, %v7432_v28, %v7695_v15 }
 0x419   : > { %v7755_v59 = vpop.permute.xlu1 %3140 }
 0x41a   : > { %3408 = vrot.lane.b32.xlu0 %v7757_v32, %s5638_s16 }
 0x41b   : > { %3534 = vrot.lane.b32.xlu1 %v2648_v46, %s5639_s11 }
 0x41c   : > { %v3267_v9 = vpop.permute.xlu0 %3266 }
 0x41d   : > { %v3649_v25 = vpop.permute.xlu1 %3648 }
 0x41e   : > { %v3957_v63 = vsel %vm3941_vm1, %v3924_v38, %v3649_v25  ;;  %3028 = vrot.lane.b32.xlu0 %v7757_v32, %s5632_s21  ;;  %v4412_v38 = vsub.f32 %v7722_v43, %v4337_v18  ;;  %v7810_v18 = vld [vmem:[#allocation2 + $0x150] sm:$0xff] }
 0x41f   : > { %5524 = vmatmul.mubr.msk.f32.gmra.mrb[14].mxu1 %vm3983_vm3, %v3957_v63  ;;  %3154 = vrot.lane.b32.xlu1 %v2648_v46, %s5634_s7 }
 0x420   : > { %v7772_v49 = vpop.permute.xlu0 %2760 }
 0x421   : > { %v7774_v29 = vpop.permute.xlu1 %2886 }
 0x422   : > { %3536 = vrot.lane.b32.xlu0 %v2649_v1, %s5639_s11 }
 0x423   : > { %3662 = vrot.lane.b32.xlu1 %v2680_v58, %s5640_s17 }
 0x424   : > { %v3269_v45 = vpop.permute.xlu0 %3268 }
 0x425   : > { %v3395_v13 = vpop.permute.xlu1 %3394 }
 0x426   : > { %2774 = vrot.lane.b32.xlu0 %v2648_v46, %s5627_s12  ;;  %v3762_v46 = vsel %vm1722_vm4, %v3730_v8, %v7697_v57 }
 0x427   : > { %3156 = vrot.lane.b32.xlu1 %v2649_v1, %s5634_s7  ;;  %v3794_v63 = vsel %vm1788_vm6, %v3762_v46, %v7705_v16 }
 0x428   : > { %v7780_v47 = vpop.permute.xlu0 %2888 }
 0x429   : > { %v7782_v14 = vpop.permute.xlu1 %3014 }
 0x42a   : > { %3282 = vrot.lane.b32.xlu0 %v2680_v58, %s5637_s9 }
 0x42b   : > { %3664 = vrot.lane.b32.xlu1 %v2681_v48, %s5640_s17 }
 0x42c   : > { %v3397_v22 = vpop.permute.xlu0 %3396 }
 0x42d   : > { %v3523_v34 = vpop.permute.xlu1 %3522 }
 0x42e   : > { %2776 = vrot.lane.b32.xlu0 %v2649_v1, %s5627_s12  ;;  %v3826_v1 = vsel %vm8659_vm11, %v3794_v63, %v7720_v53  ;;  %v4442_v53 = vmul.f32 %v4412_v38, %v4412_v38  ;;  %vm8666_vm11 = vmmov %vm8644_vm5 }
 0x42f   : > { %2902 = vrot.lane.b32.xlu1 %v2680_v58, %s5630_s15  ;;  %v3859_v16 = vsel %vm3842_vm12, %v3826_v1, %v3267_v9 }
 0x430   : > { %v7794_v25 = vpop.permute.xlu0 %3016  ;;  %v3892_v46 = vsel %vm3875_vm8, %v3859_v16, %v3395_v13 }
 0x431   : > { %v7798_v50 = vpop.permute.xlu1 %3142  ;;  %v7800_v19 = vpop.f32.mrb[2].mxu1  ;;  %v3925_v2 = vsel %vm3908_vm0, %v3892_v46, %v3523_v34  ;;  %v3763_v34 = vsel %vm1722_vm4, %v3731_v37, %v7703_v20  ;;  %v2651_v46 = vld [vmem:[#allocation2 + $0x159] sm:$0xff] }
 0x432   : > { %v4472_v60 = vsub.f32 %v7722_v43, %v7800_v19  ;;  %v7807_v57 = vpop.f32.mrb[3].mxu1  ;;  %3284 = vrot.lane.b32.xlu0 %v2681_v48, %s5637_s9  ;;  %v8660_v9 = vrot.slane %v7800_v19, 1 }
 0x433   : > { %v4339_v58 = vrot.slane %v7807_v57, 1  ;;  %v4471_v8 = vsub.f32 %v7726_v11, %v7807_v57  ;;  %3410 = vrot.lane.b32.xlu1 %v7810_v18, %s5638_s16 }
 0x434   : > { %v4502_v63 = vmul.f32 %v4472_v60, %v4472_v60  ;;  %v3525_v35 = vpop.permute.xlu0 %3524 }
 0x435   : > { %v4341_v1 = vsel %vm4335_vm9, %v4339_v58, %v8660_v9  ;;  %v4501_v24 = vmul.f32 %v4471_v8, %v4471_v8  ;;  %v3651_v6 = vpop.permute.xlu1 %3650 }
 0x436   : > { %v4532_v23 = vadd.f32 %v4502_v63, %v4442_v53  ;;  %v7826_v30 = vsub.f32 %v7807_v57, %v4341_v1  ;;  %v3958_v13 = vsel %vm3941_vm1, %v3925_v2, %v3651_v6  ;;  %2904 = vrot.lane.b32.xlu0 %v2681_v48, %s5630_s15  ;;  %v3795_v6 = vsel %vm1788_vm6, %v3763_v34, %v7716_v40 }
 0x437   : > { %v4531_v38 = vadd.f32 %v4501_v24, %v4441_v61  ;;  %5526 = vmatprep.mubr.msk.f32.mxu1 %vm3983_vm3, %v3958_v13  ;;  %3030 = vrot.lane.b32.xlu1 %v7810_v18, %s5632_s21  ;;  %v7846_v24 = vld [vmem:[#allocation2 + $0x158] sm:$0xff]  ;;  %v3827_v61 = vsel %vm8661_vm14, %v3795_v6, %v7755_v59  ;;  %v3732_v34 = vsel %vm1656_vm2, %v7473_v12, %v7751_v36  ;;  %v8662_v6 = vrot.slane %v7800_v19, 1  ;;  %vm8667_vm14 = vmmov %vm8644_vm5 }
 0x438   : > { %v4563_v60 = vsel %vm4562_vm13, %v4532_v23, 0.0  ;;  %v7839_v16 = vpop.permute.xlu0 %2762  ;;  %v2650_v23 = vld [vmem:[#allocation2 + $0x151] sm:$0xff]  ;;  %v3860_v15 = vsel %vm3842_vm12, %v3827_v61, %v3269_v45  ;;  %v2683_v13 = vld [vmem:[#allocation2 + $0x15a] sm:$0xff] }
 0x439   : > { %v4561_v2 = vsel %vm1656_vm2, %v4531_v38, 0.0  ;;  %v7844_v48 = vpop.permute.xlu1 %3144  ;;  %v3893_v20 = vsel %vm3875_vm8, %v3860_v15, %v3397_v22  ;;  %v2682_v22 = vld [vmem:[#allocation2 + $0x152] sm:$0xff] }
 0x43a   : > { %v7850_v28 = vadd.f32 %v4563_v60, %v4561_v2  ;;  %3412 = vrot.lane.b32.xlu0 %v7846_v24, %s5638_s16  ;;  %v3926_v58 = vsel %vm3908_vm0, %v3893_v20, %v3525_v35  ;;  %v3764_v60 = vsel %vm1722_vm4, %v3732_v34, %v7774_v29  ;;  %v4414_v2 = vsub.f32 %v7800_v19, %v8662_v6 }
 0x43b   : > { %3538 = vrot.lane.b32.xlu1 %v2650_v23, %s5639_s11  ;;  %v4443_v6 = vmul.f32 %v7826_v30, %v7826_v30  ;;  %v3733_v30 = vsel %vm1656_vm2, %v7494_v42, %v7772_v49 }
 0x43c   : > { %v3271_v40 = vpop.permute.xlu0 %3270 }
 0x43d   : > { %v3653_v8 = vpop.permute.xlu1 %3652 }
 0x43e   : > { %v3959_v53 = vsel %vm3941_vm1, %v3926_v58, %v3653_v8  ;;  %3032 = vrot.lane.b32.xlu0 %v7846_v24, %s5632_s21  ;;  %v7903_v8 = vld [vmem:[#allocation2 + $0x168] sm:$0xff] }
 0x43f   : > { %5527 = vmatmul.mubr.msk.f32.gmra.mrb[16].mxu1 %vm3983_vm3, %v3959_v53  ;;  %3158 = vrot.lane.b32.xlu1 %v2650_v23, %s5634_s7 }
 0x440   : > { %v7863_v59 = vpop.permute.xlu0 %2764 }
 0x441   : > { %v7865_v45 = vpop.permute.xlu1 %2890 }
 0x442   : > { %3540 = vrot.lane.b32.xlu0 %v2651_v46, %s5639_s11 }
 0x443   : > { %3666 = vrot.lane.b32.xlu1 %v2682_v22, %s5640_s17 }
 0x444   : > { %v3273_v35 = vpop.permute.xlu0 %3272 }
 0x445   : > { %v3399_v63 = vpop.permute.xlu1 %3398 }
 0x446   : > { %2778 = vrot.lane.b32.xlu0 %v2650_v23, %s5627_s12  ;;  %v3796_v23 = vsel %vm1788_vm6, %v3764_v60, %v7782_v14 }
 0x447   : > { %3160 = vrot.lane.b32.xlu1 %v2651_v46, %s5634_s7  ;;  %v3828_v12 = vsel %vm8663_vm15, %v3796_v23, %v7798_v50  ;;  %v4444_v50 = vmul.f32 %v4414_v2, %v4414_v2  ;;  %vm8668_vm15 = vmmov %vm8644_vm5 }
 0x448   : > { %v7871_v9 = vpop.permute.xlu0 %2892  ;;  %v3861_v14 = vsel %vm3842_vm12, %v3828_v12, %v3271_v40 }
 0x449   : > { %v7873_v1 = vpop.permute.xlu1 %3018 }
 0x44a   : > { %3286 = vrot.lane.b32.xlu0 %v2682_v22, %s5637_s9 }
 0x44b   : > { %3668 = vrot.lane.b32.xlu1 %v2683_v13, %s5640_s17 }
 0x44c   : > { %v3401_v37 = vpop.permute.xlu0 %3400 }
 0x44d   : > { %v3527_v38 = vpop.permute.xlu1 %3526 }
 0x44e   : > { %2780 = vrot.lane.b32.xlu0 %v2651_v46, %s5627_s12 }
 0x44f   : > { %2906 = vrot.lane.b32.xlu1 %v2682_v22, %s5630_s15  ;;  %v3894_v22 = vsel %vm3875_vm8, %v3861_v14, %v3399_v63 }
 0x450   : > { %v7887_v61 = vpop.permute.xlu0 %3020  ;;  %v3927_v23 = vsel %vm3908_vm0, %v3894_v22, %v3527_v38  ;;  %v3765_v38 = vsel %vm1722_vm4, %v3733_v30, %v7780_v47  ;;  %v2652_v47 = vld [vmem:[#allocation2 + $0x169] sm:$0xff]  ;;  %v2685_v30 = vld [vmem:[#allocation2 + $0x172] sm:$0xff] }
 0x451   : > { %v7891_v15 = vpop.permute.xlu1 %3146  ;;  %v7893_v20 = vpop.f32.mrb[4].mxu1 }
 0x452   : > { %v4343_v36 = vrot.slane %v7893_v20, 1  ;;  %v4474_v29 = vsub.f32 %v7800_v19, %v7893_v20  ;;  %v7900_v58 = vpop.f32.mrb[5].mxu1  ;;  %3288 = vrot.lane.b32.xlu0 %v2683_v13, %s5637_s9 }
 0x453   : > { %v4342_v53 = vrot.slane %v7900_v58, 1  ;;  %v4473_v46 = vsub.f32 %v7807_v57, %v7900_v58  ;;  %3414 = vrot.lane.b32.xlu1 %v7903_v8, %s5638_s16 }
 0x454   : > { %v4504_v34 = vmul.f32 %v4474_v29, %v4474_v29  ;;  %v3529_v60 = vpop.permute.xlu0 %3528 }
 0x455   : > { %v4344_v40 = vsel %vm4335_vm9, %v4342_v53, %v4343_v36  ;;  %v4503_v12 = vmul.f32 %v4473_v46, %v4473_v46  ;;  %v3655_v31 = vpop.permute.xlu1 %3654  ;;  %v7938_v53 = vld [vmem:[#allocation2 + $0x170] sm:$0xff] }
 0x456   : > { %v4534_v0 = vadd.f32 %v4504_v34, %v4444_v50  ;;  %v7919_v62 = vsub.f32 %v7900_v58, %v4344_v40  ;;  %v3960_v2 = vsel %vm3941_vm1, %v3927_v23, %v3655_v31  ;;  %2908 = vrot.lane.b32.xlu0 %v2683_v13, %s5630_s15  ;;  %v3797_v31 = vsel %vm1788_vm6, %v3765_v38, %v7794_v25  ;;  %v2684_v23 = vld [vmem:[#allocation2 + $0x16a] sm:$0xff] }
 0x457   : > { %v4533_v63 = vadd.f32 %v4503_v12, %v4443_v6  ;;  %5529 = vmatprep.mubr.msk.f32.mxu1 %vm3983_vm3, %v3960_v2  ;;  %3034 = vrot.lane.b32.xlu1 %v7903_v8, %s5632_s21  ;;  %v3829_v42 = vsel %vm8644_vm5, %v3797_v31, %v7844_v48  ;;  %v3734_v31 = vsel %vm1656_vm2, %v7534_v26, %v7839_v16 }
 0x458   : > { %v7931_v29 = vpop.permute.xlu0 %2766  ;;  %v3862_v46 = vsel %vm3842_vm12, %v3829_v42, %v3273_v35  ;;  %v4567_v50 = vsel %vm4562_vm13, %v4534_v0, 0.0  ;;  %v4416_v42 = vsub.f32 %v7893_v20, %v4343_v36  ;;  %v2622_v36 = vld [vmem:[#allocation2 + $0x180] sm:$0xff] }
 0x459   : > { %v4565_v13 = vsel %vm1656_vm2, %v4533_v63, 0.0  ;;  %v7936_v14 = vpop.permute.xlu1 %3148  ;;  %v3895_v25 = vsel %vm3875_vm8, %v3862_v46, %v3401_v37  ;;  %v2653_v37 = vld [vmem:[#allocation2 + $0x171] sm:$0xff] }
 0x45a   : > { %v4566_v49 = vadd.f32 %v4565_v13, %v7850_v28  ;;  %3416 = vrot.lane.b32.xlu0 %v7938_v53, %s5638_s16  ;;  %v3928_v6 = vsel %vm3908_vm0, %v3895_v25, %v3529_v60  ;;  %v3766_v13 = vsel %vm1722_vm4, %v3734_v31, %v7865_v45  ;;  %v4445_v31 = vmul.f32 %v7919_v62, %v7919_v62 }
 0x45b   : > { %3542 = vrot.lane.b32.xlu1 %v2652_v47, %s5639_s11  ;;  %v3735_v62 = vsel %vm1656_vm2, %v7555_v10, %v7863_v59 }
 0x45c   : > { %v3275_v22 = vpop.permute.xlu0 %3274  ;;  %v7949_v34 = vadd.f32 %v4567_v50, %v4566_v49 }
 0x45d   : > { %v3657_v48 = vpop.permute.xlu1 %3656 }
 0x45e   : > { %v3961_v28 = vsel %vm3941_vm1, %v3928_v6, %v3657_v48  ;;  %3036 = vrot.lane.b32.xlu0 %v7938_v53, %s5632_s21 }
 0x45f   : > { %5530 = vmatmul.mubr.msk.f32.gmra.mrb[18].mxu1 %vm3983_vm3, %v3961_v28  ;;  %3162 = vrot.lane.b32.xlu1 %v2652_v47, %s5634_s7 }
 0x460   : > { %v7957_v0 = vpop.permute.xlu0 %2768 }
 0x461   : > { %v7959_v35 = vpop.permute.xlu1 %2894 }
 0x462   : > { %3544 = vrot.lane.b32.xlu0 %v2653_v37, %s5639_s11 }
 0x463   : > { %3670 = vrot.lane.b32.xlu1 %v2684_v23, %s5640_s17 }
 0x464   : > { %v3277_v60 = vpop.permute.xlu0 %3276 }
 0x465   : > { %v3403_v40 = vpop.permute.xlu1 %3402 }
 0x466   : > { %2782 = vrot.lane.b32.xlu0 %v2652_v47, %s5627_s12  ;;  %v3798_v47 = vsel %vm1788_vm6, %v3766_v13, %v7873_v1 }
 0x467   : > { %3164 = vrot.lane.b32.xlu1 %v2653_v37, %s5634_s7  ;;  %v3830_v26 = vsel %vm8664_vm7, %v3798_v47, %v7891_v15  ;;  %v4446_v15 = vmul.f32 %v4416_v42, %v4416_v42  ;;  %vm8669_vm7 = vmmov %vm8644_vm5 }
 0x468   : > { %v7965_v12 = vpop.permute.xlu0 %2896  ;;  %v3863_v6 = vsel %vm3842_vm12, %v3830_v26, %v3275_v22 }
 0x469   : > { %v7967_v2 = vpop.permute.xlu1 %3022  ;;  %v3896_v28 = vsel %vm3875_vm8, %v3863_v6, %v3403_v40 }
 0x46a   : > { %3290 = vrot.lane.b32.xlu0 %v2684_v23, %s5637_s9 }
 0x46b   : > { %3672 = vrot.lane.b32.xlu1 %v2685_v30, %s5640_s17 }
 0x46c   : > { %v3405_v63 = vpop.permute.xlu0 %3404 }
 0x46d   : > { %v3531_v38 = vpop.permute.xlu1 %3530 }
 0x46e   : > { %2784 = vrot.lane.b32.xlu0 %v2653_v37, %s5627_s12  ;;  %v3929_v13 = vsel %vm3908_vm0, %v3896_v28, %v3531_v38  ;;  %v3767_v38 = vsel %vm1722_vm4, %v3735_v62, %v7871_v9  ;;  %v2624_v62 = vld [vmem:[#allocation2 + $0x198] sm:$0xff] }
 0x46f   : > { %2910 = vrot.lane.b32.xlu1 %v2684_v23, %s5630_s15  ;;  %v3799_v6 = vsel %vm1788_vm6, %v3767_v38, %v7887_v61  ;;  %v2625_v38 = vld [vmem:[#allocation2 + $0x1a0] sm:$0xff] }
 0x470   : > { %v7981_v49 = vpop.permute.xlu0 %3024  ;;  %v3831_v10 = vsel %vm8665_vm10, %v3799_v6, %v7936_v14  ;;  %vm8670_vm10 = vmmov %vm8644_vm5 }
 0x471   : > { %v7985_v46 = vpop.permute.xlu1 %3150  ;;  %v7987_v50 = vpop.f32.mrb[6].mxu1  ;;  %v3864_v9 = vsel %vm3842_vm12, %v3831_v10, %v3277_v60  ;;  %v2655_v60 = vld [vmem:[#allocation2 + $0x189] sm:$0xff] }
 0x472   : > { %v4346_v16 = vrot.slane %v7987_v50, 1  ;;  %v4476_v45 = vsub.f32 %v7893_v20, %v7987_v50  ;;  %v7994_v25 = vpop.f32.mrb[7].mxu1  ;;  %3292 = vrot.lane.b32.xlu0 %v2685_v30, %s5637_s9  ;;  %v3897_v61 = vsel %vm3875_vm8, %v3864_v9, %v3405_v63  ;;  %v2686_v63 = vld [vmem:[#allocation2 + $0x182] sm:$0xff] }
 0x473   : > { %v4345_v1 = vrot.slane %v7994_v25, 1  ;;  %v4475_v48 = vsub.f32 %v7900_v58, %v7994_v25  ;;  %3418 = vrot.lane.b32.xlu1 %v2622_v36, %s5638_s16 }
 0x474   : > { %v4506_v37 = vmul.f32 %v4476_v45, %v4476_v45  ;;  %v3533_v23 = vpop.permute.xlu0 %3532 }
 0x475   : > { %v4347_v22 = vsel %vm4335_vm9, %v4345_v1, %v4346_v16  ;;  %v4505_v47 = vmul.f32 %v4475_v48, %v4475_v48  ;;  %v3659_v26 = vpop.permute.xlu1 %3658  ;;  %v2623_v48 = vld [vmem:[#allocation2 + $0x188] sm:$0xff] }
 0x476   : > { %v4536_v41 = vadd.f32 %v4506_v37, %v4446_v15  ;;  %v8010_v17 = vsub.f32 %v7994_v25, %v4347_v22  ;;  %v3962_v42 = vsel %vm3941_vm1, %v3929_v13, %v3659_v26  ;;  %2912 = vrot.lane.b32.xlu0 %v2685_v30, %s5630_s15 }
 0x477   : > { %v4535_v40 = vadd.f32 %v4505_v47, %v4445_v31  ;;  %5532 = vmatprep.mubr.msk.f32.mxu1 %vm3983_vm3, %v3962_v42  ;;  %3038 = vrot.lane.b32.xlu1 %v2622_v36, %s5632_s21  ;;  %v2654_v36 = vld [vmem:[#allocation2 + $0x181] sm:$0xff]  ;;  %v3930_v31 = vsel %vm3908_vm0, %v3897_v61, %v3533_v23  ;;  %v2687_v42 = vld [vmem:[#allocation2 + $0x18a] sm:$0xff] }
 0x478   : > { %v8021_v45 = vpop.permute.xlu0 %2770  ;;  %v4571_v15 = vsel %vm4562_vm13, %v4536_v41, 0.0 }
 0x479   : > { %v4569_v1 = vsel %vm1656_vm2, %v4535_v40, 0.0  ;;  %v8026_v30 = vpop.permute.xlu1 %3152 }
 0x47a   : > { %v4570_v59 = vadd.f32 %v4569_v1, %v7949_v34  ;;  %3420 = vrot.lane.b32.xlu0 %v2623_v48, %s5638_s16  ;;  %v3736_v1 = vsel %vm1656_vm2, %v7596_v5, %v7931_v29 }
 0x47b   : > { %3546 = vrot.lane.b32.xlu1 %v2654_v36, %s5639_s11  ;;  %v3768_v10 = vsel %vm1722_vm4, %v3736_v1, %v7959_v35 }
 0x47c   : > { %v3279_v28 = vpop.permute.xlu0 %3278  ;;  %v8036_v37 = vadd.f32 %v4571_v15, %v4570_v59  ;;  %v3800_v9 = vsel %vm1788_vm6, %v3768_v10, %v7967_v2  ;;  %v4418_v15 = vsub.f32 %v7987_v50, %v4346_v16  ;;  %v2688_v16 = vld [vmem:[#allocation2 + $0x19a] sm:$0xff] }
 0x47d   : > { %v3661_v13 = vpop.permute.xlu1 %3660  ;;  %v3832_v5 = vsel %vm8666_vm11, %v3800_v9, %v7985_v46  ;;  %v3737_v9 = vsel %vm1656_vm2, %v7617_v54, %v7957_v0  ;;  %vm8671_vm11 = vmmov %vm8644_vm5 }
 0x47e   : > { %v3963_v14 = vsel %vm3941_vm1, %v3930_v31, %v3661_v13  ;;  %3040 = vrot.lane.b32.xlu0 %v2623_v48, %s5632_s21  ;;  %v2656_v48 = vld [vmem:[#allocation2 + $0x199] sm:$0xff]  ;;  %v3865_v35 = vsel %vm3842_vm12, %v3832_v5, %v3279_v28  ;;  %v4448_v28 = vmul.f32 %v4418_v15, %v4418_v15 }
 0x47f   : > { %5533 = vmatmul.mubr.msk.f32.gmra.mrb[20].mxu1 %vm3983_vm3, %v3963_v14  ;;  %3166 = vrot.lane.b32.xlu1 %v2654_v36, %s5634_s7  ;;  %v2657_v36 = vld [vmem:[#allocation2 + $0x1a1] sm:$0xff] }
 0x480   : > { %v8043_v34 = vpop.permute.xlu0 %2772 }
 0x481   : > { %v8045_v41 = vpop.permute.xlu1 %2898 }
 0x482   : > { %3548 = vrot.lane.b32.xlu0 %v2655_v60, %s5639_s11 }
 0x483   : > { %3674 = vrot.lane.b32.xlu1 %v2686_v63, %s5640_s17 }
 0x484   : > { %v3281_v23 = vpop.permute.xlu0 %3280 }
 0x485   : > { %v3407_v22 = vpop.permute.xlu1 %3406 }
 0x486   : > { %3168 = vrot.lane.b32.xlu0 %v2655_v60, %s5634_s7  ;;  %v3898_v14 = vsel %vm3875_vm8, %v3865_v35, %v3407_v22 }
 0x487   : > { %3294 = vrot.lane.b32.xlu1 %v2686_v63, %s5637_s9 }
 0x488   : > { %v8051_v47 = vpop.permute.xlu0 %2900 }
 0x489   : > { %v8053_v26 = vpop.permute.xlu1 %3026 }
 0x48a   : > { %3676 = vrot.lane.b32.xlu0 %v2687_v42, %s5640_s17 }
 0x48b   : > { %3296 = vrot.lane.b32.xlu1 %v2687_v42, %s5637_s9  ;;  %v2689_v42 = vld [vmem:[#allocation2 + $0x1a2] sm:$0xff] }
 0x48c   : > { %v3409_v40 = vpop.permute.xlu0 %3408 }
 0x48d   : > { %v3535_v6 = vpop.permute.xlu1 %3534 }
 0x48e   : > { %3422 = vrot.lane.b32.xlu0 %v2624_v62, %s5638_s16  ;;  %v3931_v62 = vsel %vm3908_vm0, %v3898_v14, %v3535_v6 }
 0x48f   : > { %3424 = vrot.lane.b32.xlu1 %v2625_v38, %s5638_s16 }
 0x490   : > { %v8064_v59 = vpop.permute.xlu0 %3028 }
 0x491   : > { %v3155_v61 = vpop.permute.xlu1 %3154 }
 0x492   : > { %v8073_v29 = vpop.f32.mrb[8].mxu1  ;;  %3550 = vrot.lane.b32.xlu0 %v2656_v48, %s5639_s11  ;;  %v4447_v48 = vmul.f32 %v8010_v17, %v8010_v17  ;;  %v3769_v17 = vsel %vm1722_vm4, %v3737_v9, %v7965_v12 }
 0x493   : > { %v4349_v31 = vrot.slane %v8073_v29, 1  ;;  %v4478_v13 = vsub.f32 %v7987_v50, %v8073_v29  ;;  %v8080_v2 = vpop.f32.mrb[9].mxu1  ;;  %3552 = vrot.lane.b32.xlu1 %v2657_v36, %s5639_s11 }
 0x494   : > { %v4348_v46 = vrot.slane %v8080_v2, 1  ;;  %v4477_v60 = vsub.f32 %v7994_v25, %v8080_v2  ;;  %v3537_v63 = vpop.permute.xlu0 %3536 }
 0x495   : > { %v4508_v38 = vmul.f32 %v4478_v13, %v4478_v13  ;;  %v3663_v1 = vpop.permute.xlu1 %3662  ;;  %v3801_v13 = vsel %vm1788_vm6, %v3769_v17, %v7981_v49  ;;  %v4420_v17 = vsub.f32 %v8073_v29, %v4349_v31 }
 0x496   : > { %v4350_v10 = vsel %vm4335_vm9, %v4348_v46, %v4349_v31  ;;  %v4507_v36 = vmul.f32 %v4477_v60, %v4477_v60  ;;  %v3964_v22 = vsel %vm3941_vm1, %v3931_v62, %v3663_v1  ;;  %3678 = vrot.lane.b32.xlu0 %v2688_v16, %s5640_s17  ;;  %v3833_v54 = vsel %vm8667_vm14, %v3801_v13, %v8026_v30  ;;  %vm8672_vm14 = vmmov %vm8644_vm5 }
 0x497   : > { %v4538_v5 = vadd.f32 %v4508_v38, %v4448_v28  ;;  %v4419_v15 = vsub.f32 %v8080_v2, %v4350_v10  ;;  %5535 = vmatprep.mubr.msk.f32.mxu1 %vm3983_vm3, %v3964_v22  ;;  %3680 = vrot.lane.b32.xlu1 %v2689_v42, %s5640_s17  ;;  %v3866_v14 = vsel %vm3842_vm12, %v3833_v54, %v3281_v23 }
 0x498   : > { %v4537_v6 = vadd.f32 %v4507_v36, %v4447_v48  ;;  %v8101_v35 = vpop.permute.xlu0 %2774  ;;  %v3899_v60 = vsel %vm3875_vm8, %v3866_v14, %v3409_v40 }
 0x499   : > { %v3157_v16 = vpop.permute.xlu1 %3156  ;;  %v4575_v12 = vsel %vm4562_vm13, %v4538_v5, 0.0  ;;  %v3932_v28 = vsel %vm3908_vm0, %v3899_v60, %v3537_v63  ;;  %v3738_v63 = vsel %vm1656_vm2, %v7658_v27, %v8021_v45 }
 0x49a   : > { %v4573_v0 = vsel %vm1656_vm2, %v4537_v6, 0.0  ;;  %v3770_v22 = vsel %vm1722_vm4, %v3738_v63, %v8045_v41 }
 0x49b   : > { %v4574_v46 = vadd.f32 %v4573_v0, %v8036_v37  ;;  %v3802_v5 = vsel %vm1788_vm6, %v3770_v22, %v8053_v26 }
 0x49c   : > { %v3283_v42 = vpop.permute.xlu0 %3282  ;;  %v3834_v13 = vsel %vm8668_vm15, %v3802_v5, %v3155_v61  ;;  %v4450_v61 = vmul.f32 %v4420_v17, %v4420_v17  ;;  %vm8673_vm15 = vmmov %vm8644_vm5 }
 0x49d   : > { %v3665_v62 = vpop.permute.xlu1 %3664  ;;  %v4576_v38 = vadd.f32 %v4575_v12, %v4574_v46  ;;  %v3867_v0 = vsel %vm3842_vm12, %v3834_v13, %v3283_v42 }
 0x49e   : > { %v3965_v49 = vsel %vm3941_vm1, %v3932_v28, %v3665_v62  ;;  %v4449_v28 = vmul.f32 %v4419_v15, %v4419_v15 }
 0x49f   : > { %5536 = vmatmul.mubr.msk.f32.gmra.mrb[22].mxu1 %vm3983_vm3, %v3965_v49 }
 0x4a0   : > { %v8115_v30 = vpop.permute.xlu0 %2776 }
 0x4a1   : > { %v2903_v1 = vpop.permute.xlu1 %2902 }
 0x4a4   : > { %v3285_v48 = vpop.permute.xlu0 %3284 }
 0x4a5   : > { %v3411_v23 = vpop.permute.xlu1 %3410 }
 0x4a6   : > { %v3900_v41 = vsel %vm3875_vm8, %v3867_v0, %v3411_v23  ;;  %v3739_v23 = vsel %vm1656_vm2, %v7681_v39, %v8043_v34 }
 0x4a8   : > { %v8117_v10 = vpop.permute.xlu0 %2904 }
 0x4a9   : > { %v3031_v37 = vpop.permute.xlu1 %3030 }
 0x4ac   : > { %v3413_v40 = vpop.permute.xlu0 %3412 }
 0x4ad   : > { %v3539_v36 = vpop.permute.xlu1 %3538 }
 0x4ae   : > { %v3933_v60 = vsel %vm3908_vm0, %v3900_v41, %v3539_v36  ;;  %v3771_v36 = vsel %vm1722_vm4, %v3739_v23, %v8051_v47 }
 0x4af   : > { %v3803_v15 = vsel %vm1788_vm6, %v3771_v36, %v8064_v59 }
 0x4b0   : > { %v8124_v9 = vpop.permute.xlu0 %3032 }
 0x4b1   : > { %v3159_v6 = vpop.permute.xlu1 %3158 }
 0x4b2   : > { %v8130_v54 = vpop.f32.mrb[10].mxu1 }
 0x4b3   : > { %v4352_v14 = vrot.slane %v8130_v54, 1  ;;  %v4480_v27 = vsub.f32 %v8073_v29, %v8130_v54  ;;  %v8136_v45 = vpop.f32.mrb[11].mxu1 }
 0x4b4   : > { %v4351_v26 = vrot.slane %v8136_v45, 1  ;;  %v4479_v31 = vsub.f32 %v8080_v2, %v8136_v45  ;;  %v3541_v46 = vpop.permute.xlu0 %3540 }
 0x4b5   : > { %v4510_v12 = vmul.f32 %v4480_v27, %v4480_v27  ;;  %v3667_v42 = vpop.permute.xlu1 %3666  ;;  %v3835_v27 = vsel %vm8644_vm5, %v3803_v15, %v3157_v16  ;;  %v4422_v36 = vsub.f32 %v8130_v54, %v4352_v14 }
 0x4b6   : > { %v4353_v62 = vsel %vm4335_vm9, %v4351_v26, %v4352_v14  ;;  %v4509_v49 = vmul.f32 %v4479_v31, %v4479_v31  ;;  %v3966_v63 = vsel %vm3941_vm1, %v3933_v60, %v3667_v42  ;;  %v3868_v39 = vsel %vm3842_vm12, %v3835_v27, %v3285_v48 }
 0x4b7   : > { %v4540_v22 = vadd.f32 %v4510_v12, %v4450_v61  ;;  %v4421_v5 = vsub.f32 %v8136_v45, %v4353_v62  ;;  %5538 = vmatprep.mubr.msk.f32.mxu1 %vm3983_vm3, %v3966_v63  ;;  %v3901_v26 = vsel %vm3875_vm8, %v3868_v39, %v3413_v40 }
 0x4b8   : > { %v4539_v17 = vadd.f32 %v4509_v49, %v4449_v28  ;;  %v8152_v13 = vpop.permute.xlu0 %2778  ;;  %v3934_v47 = vsel %vm3908_vm0, %v3901_v26, %v3541_v46  ;;  %v3740_v46 = vsel %vm1656_vm2, %v7729_v52, %v8101_v35 }
 0x4b9   : > { %v3161_v0 = vpop.permute.xlu1 %3160  ;;  %v4579_v31 = vsel %vm4562_vm13, %v4540_v22, 0.0  ;;  %v3772_v63 = vsel %vm1722_vm4, %v3740_v46, %v2903_v1 }
 0x4ba   : > { %v4577_v41 = vsel %vm1656_vm2, %v4539_v17, 0.0  ;;  %v3804_v22 = vsel %vm1788_vm6, %v3772_v63, %v3031_v37 }
 0x4bb   : > { %v4578_v34 = vadd.f32 %v4577_v41, %v4576_v38  ;;  %v3836_v15 = vsel %vm8669_vm7, %v3804_v22, %v3159_v6  ;;  %v4452_v6 = vmul.f32 %v4422_v36, %v4422_v36 }
 0x4bc   : > { %v3287_v61 = vpop.permute.xlu0 %3286 }
 0x4bd   : > { %v3669_v60 = vpop.permute.xlu1 %3668  ;;  %v4580_v12 = vadd.f32 %v4579_v31, %v4578_v34  ;;  %v3869_v41 = vsel %vm3842_vm12, %v3836_v15, %v3287_v61 }
 0x4be   : > { %v3967_v42 = vsel %vm3941_vm1, %v3934_v47, %v3669_v60  ;;  %v4451_v47 = vmul.f32 %v4421_v5, %v4421_v5 }
 0x4bf   : > { %5539 = vmatmul.mubr.msk.f32.gmra.mrb[24].mxu1 %vm3983_vm3, %v3967_v42 }
 0x4c0   : > { %v8164_v59 = vpop.permute.xlu0 %2780 }
 0x4c1   : > { %v2907_v16 = vpop.permute.xlu1 %2906 }
 0x4c4   : > { %v3289_v28 = vpop.permute.xlu0 %3288 }
 0x4c5   : > { %v3415_v62 = vpop.permute.xlu1 %3414 }
 0x4c6   : > { %v3902_v1 = vsel %vm3875_vm8, %v3869_v41, %v3415_v62  ;;  %v3741_v62 = vsel %vm1656_vm2, %v7757_v32, %v8115_v30 }
 0x4c8   : > { %v8166_v48 = vpop.permute.xlu0 %2908 }
 0x4c9   : > { %v3035_v38 = vpop.permute.xlu1 %3034 }
 0x4cc   : > { %v3417_v40 = vpop.permute.xlu0 %3416 }
 0x4cd   : > { %v3543_v49 = vpop.permute.xlu1 %3542 }
 0x4ce   : > { %v3935_v26 = vsel %vm3908_vm0, %v3902_v1, %v3543_v49  ;;  %v3773_v49 = vsel %vm1722_vm4, %v3741_v62, %v8117_v10 }
 0x4cf   : > { %v3805_v5 = vsel %vm1788_vm6, %v3773_v49, %v8124_v9 }
 0x4d0   : > { %v8172_v23 = vpop.permute.xlu0 %3036 }
 0x4d1   : > { %v3163_v17 = vpop.permute.xlu1 %3162 }
 0x4d2   : > { %v8177_v27 = vpop.f32.mrb[12].mxu1 }
 0x4d3   : > { %v4355_v39 = vrot.slane %v8177_v27, 1  ;;  %v4482_v52 = vsub.f32 %v8130_v54, %v8177_v27  ;;  %v8183_v35 = vpop.f32.mrb[13].mxu1 }
 0x4d4   : > { %v4354_v37 = vrot.slane %v8183_v35, 1  ;;  %v4481_v14 = vsub.f32 %v8136_v45, %v8183_v35  ;;  %v3545_v34 = vpop.permute.xlu0 %3544 }
 0x4d5   : > { %v4512_v31 = vmul.f32 %v4482_v52, %v4482_v52  ;;  %v3671_v61 = vpop.permute.xlu1 %3670  ;;  %v3837_v52 = vsel %vm8670_vm10, %v3805_v5, %v3161_v0  ;;  %v4424_v49 = vsub.f32 %v8177_v27, %v4355_v39 }
 0x4d6   : > { %v4356_v60 = vsel %vm4335_vm9, %v4354_v37, %v4355_v39  ;;  %v4511_v42 = vmul.f32 %v4481_v14, %v4481_v14  ;;  %v3968_v46 = vsel %vm3941_vm1, %v3935_v26, %v3671_v61  ;;  %v3870_v32 = vsel %vm3842_vm12, %v3837_v52, %v3289_v28 }
 0x4d7   : > { %v4542_v63 = vadd.f32 %v4512_v31, %v4452_v6  ;;  %v4423_v22 = vsub.f32 %v8183_v35, %v4356_v60  ;;  %5541 = vmatprep.mubr.msk.f32.mxu1 %vm3983_vm3, %v3968_v46  ;;  %v3903_v37 = vsel %vm3875_vm8, %v3870_v32, %v3417_v40  ;;  %v3742_v40 = vsel %vm1656_vm2, %v7810_v18, %v8152_v13 }
 0x4d8   : > { %v4541_v36 = vadd.f32 %v4511_v42, %v4451_v47  ;;  %v8199_v15 = vpop.permute.xlu0 %2782  ;;  %v3936_v10 = vsel %vm3908_vm0, %v3903_v37, %v3545_v34  ;;  %v3774_v34 = vsel %vm1722_vm4, %v3742_v40, %v2907_v16  ;;  %v4454_v37 = vmul.f32 %v4424_v49, %v4424_v49 }
 0x4d9   : > { %v3165_v41 = vpop.permute.xlu1 %3164  ;;  %v4583_v14 = vsel %vm4562_vm13, %v4542_v63, 0.0  ;;  %v3806_v63 = vsel %vm1788_vm6, %v3774_v34, %v3035_v38 }
 0x4da   : > { %v4581_v1 = vsel %vm1656_vm2, %v4541_v36, 0.0  ;;  %v3838_v5 = vsel %vm8671_vm11, %v3806_v63, %v3163_v17  ;;  %v3743_v17 = vsel %vm1656_vm2, %v7846_v24, %v8164_v59 }
 0x4db   : > { %v4582_v30 = vadd.f32 %v4581_v1, %v4580_v12  ;;  %v3775_v34 = vsel %vm1722_vm4, %v3743_v17, %v8166_v48 }
 0x4dc   : > { %v3291_v6 = vpop.permute.xlu0 %3290  ;;  %v3807_v24 = vsel %vm1788_vm6, %v3775_v34, %v8172_v23 }
 0x4dd   : > { %v3673_v26 = vpop.permute.xlu1 %3672  ;;  %v4584_v31 = vadd.f32 %v4583_v14, %v4582_v30  ;;  %v3871_v1 = vsel %vm3842_vm12, %v3838_v5, %v3291_v6 }
 0x4de   : > { %v3969_v61 = vsel %vm3941_vm1, %v3936_v10, %v3673_v26  ;;  %v4453_v26 = vmul.f32 %v4423_v22, %v4423_v22  ;;  %v3839_v22 = vsel %vm8672_vm14, %v3807_v24, %v3165_v41 }
 0x4df   : > { %5542 = vmatmul.mubr.msk.f32.gmra.mrb[26].mxu1 %vm3983_vm3, %v3969_v61 }
 0x4e0   : > { %v2785_v9 = vpop.permute.xlu0 %2784 }
 0x4e1   : > { %v2911_v0 = vpop.permute.xlu1 %2910 }
 0x4e4   : > { %v3293_v47 = vpop.permute.xlu0 %3292 }
 0x4e5   : > { %v3419_v60 = vpop.permute.xlu1 %3418 }
 0x4e6   : > { %v3904_v13 = vsel %vm3875_vm8, %v3871_v1, %v3419_v60  ;;  %v3872_v1 = vsel %vm3842_vm12, %v3839_v22, %v3293_v47  ;;  %v3744_v47 = vsel %vm1656_vm2, %v7903_v8, %v8199_v15 }
 0x4e8   : > { %v2913_v42 = vpop.permute.xlu0 %2912 }
 0x4e9   : > { %v3039_v28 = vpop.permute.xlu1 %3038 }
 0x4ec   : > { %v3421_v12 = vpop.permute.xlu0 %3420 }
 0x4ed   : > { %v3547_v46 = vpop.permute.xlu1 %3546 }
 0x4ee   : > { %v3937_v14 = vsel %vm3908_vm0, %v3904_v13, %v3547_v46  ;;  %v3905_v13 = vsel %vm3875_vm8, %v3872_v1, %v3421_v12  ;;  %v3776_v12 = vsel %vm1722_vm4, %v3744_v47, %v2911_v0 }
 0x4f0   : > { %v3041_v62 = vpop.permute.xlu0 %3040 }
 0x4f1   : > { %v3167_v36 = vpop.permute.xlu1 %3166 }
 0x4f2   : > { %v8218_v52 = vpop.f32.mrb[14].mxu1 }
 0x4f3   : > { %v4358_v32 = vrot.slane %v8218_v52, 1  ;;  %v4484_v30 = vsub.f32 %v8177_v27, %v8218_v52  ;;  %v8224_v18 = vpop.f32.mrb[15].mxu1 }
 0x4f4   : > { %v4357_v16 = vrot.slane %v8224_v18, 1  ;;  %v4483_v38 = vsub.f32 %v8183_v35, %v8224_v18  ;;  %v3549_v39 = vpop.permute.xlu0 %3548 }
 0x4f5   : > { %v4514_v6 = vmul.f32 %v4484_v30, %v4484_v30  ;;  %v3675_v10 = vpop.permute.xlu1 %3674  ;;  %v4426_v24 = vsub.f32 %v8218_v52, %v4358_v32 }
 0x4f6   : > { %v4359_v61 = vsel %vm4335_vm9, %v4357_v16, %v4358_v32  ;;  %v4513_v40 = vmul.f32 %v4483_v38, %v4483_v38  ;;  %v3970_v60 = vsel %vm3941_vm1, %v3937_v14, %v3675_v10  ;;  %v3938_v38 = vsel %vm3908_vm0, %v3905_v13, %v3549_v39 }
 0x4f7   : > { %v4544_v63 = vadd.f32 %v4514_v6, %v4454_v37  ;;  %v4425_v5 = vsub.f32 %v8224_v18, %v4359_v61  ;;  %5544 = vmatprep.mubr.msk.f32.mxu1 %vm3983_vm3, %v3970_v60  ;;  %v3808_v10 = vsel %vm1788_vm6, %v3776_v12, %v3039_v28  ;;  %v4456_v13 = vmul.f32 %v4426_v24, %v4426_v24 }
 0x4f8   : > { %v4543_v59 = vadd.f32 %v4513_v40, %v4453_v26  ;;  %v3169_v46 = vpop.permute.xlu0 %3168  ;;  %v3840_v40 = vsel %vm8673_vm15, %v3808_v10, %v3167_v36 }
 0x4f9   : > { %v3295_v49 = vpop.permute.xlu1 %3294  ;;  %v4587_v16 = vsel %vm4562_vm13, %v4544_v63, 0.0 }
 0x4fa   : > { %v4585_v30 = vsel %vm1656_vm2, %v4543_v59, 0.0  ;;  %v3873_v63 = vsel %vm3842_vm12, %v3840_v40, %v3295_v49 }
 0x4fb   : > { %v4586_v48 = vadd.f32 %v4585_v30, %v4584_v31  ;;  %v3745_v31 = vsel %vm1656_vm2, %v7938_v53, %v2785_v9 }
 0x4fc   : > { %v3677_v17 = vpop.permute.xlu0 %3676  ;;  %v3777_v39 = vsel %vm1722_vm4, %v3745_v31, %v2913_v42 }
 0x4fd   : > { %v3971_v37 = vsel %vm3941_vm1, %v3938_v38, %v3677_v17  ;;  %v3297_v23 = vpop.permute.xlu1 %3296  ;;  %v4588_v14 = vadd.f32 %v4587_v16, %v4586_v48  ;;  %v3809_v61 = vsel %vm1788_vm6, %v3777_v39, %v3041_v62  ;;  %v4455_v16 = vmul.f32 %v4425_v5, %v4425_v5 }
 0x4fe   : > { %5545 = vmatmul.mubr.msk.f32.gmra.mrb[28].mxu1 %vm3983_vm3, %v3971_v37  ;;  %v3841_v34 = vsel %vm8644_vm5, %v3809_v61, %v3169_v46  ;;  %vm5641_vm6 = vmmov 0  }
 0x4ff   : > { %v3874_v8 = vsel %vm3842_vm12, %v3841_v34, %v3297_v23 }
 0x500   : > { %v3423_v41 = vpop.permute.xlu0 %3422 }
 0x501   : > { %v3425_v6 = vpop.permute.xlu1 %3424  ;;  %v3906_v15 = vsel %vm3875_vm8, %v3873_v63, %v3423_v41 }
 0x502   : > { %v3907_v53 = vsel %vm3875_vm8, %v3874_v8, %v3425_v6 }
 0x504   : > { %v3551_v26 = vpop.permute.xlu0 %3550 }
 0x505   : > { %v3553_v60 = vpop.permute.xlu1 %3552  ;;  %v3939_v9 = vsel %vm3908_vm0, %v3906_v15, %v3551_v26 }
 0x506   : > { %v3940_v42 = vsel %vm3908_vm0, %v3907_v53, %v3553_v60 }
 0x508   : > { %v3679_v0 = vpop.permute.xlu0 %3678 }
 0x509   : > { %v3972_v28 = vsel %vm3941_vm1, %v3939_v9, %v3679_v0  ;;  %v3681_v62 = vpop.permute.xlu1 %3680 }
 0x50a   : > { %v3973_v36 = vsel %vm3941_vm1, %v3940_v42, %v3681_v62  ;;  %5547 = vmatprep.mubr.msk.f32.mxu1 %vm3983_vm3, %v3972_v28  ;;  %v4628_v42 = vld [vmem:[%s8588_s3] sm:$0xff] }
 0x50b   : > { %5548 = vmatmul.mubr.msk.f32.gmra.mrb[30].mxu1 %vm3983_vm3, %v3973_v36  ;;  %5551 = vmatpush3.msra.mxu0 %v4628_v42 }
 0x512   : > { %v8272_v59 = vpop.f32.mrb[16].mxu1 }
 0x513   : > { %v4361_v46 = vrot.slane %v8272_v59, 1  ;;  %v4486_v22 = vsub.f32 %v8218_v52, %v8272_v59  ;;  %v8277_v49 = vpop.f32.mrb[17].mxu1 }
 0x514   : > { %v4360_v1 = vrot.slane %v8277_v49, 1  ;;  %v4485_v30 = vsub.f32 %v8224_v18, %v8277_v49 }
 0x515   : > { %v4516_v48 = vmul.f32 %v4486_v22, %v4486_v22  ;;  %v4428_v31 = vsub.f32 %v8272_v59, %v4361_v46 }
 0x516   : > { %v4362_v38 = vsel %vm4335_vm9, %v4360_v1, %v4361_v46  ;;  %v4515_v32 = vmul.f32 %v4485_v30, %v4485_v30 }
 0x517   : > { %v4546_v17 = vadd.f32 %v4516_v48, %v4456_v13  ;;  %v4427_v37 = vsub.f32 %v8277_v49, %v4362_v38 }
 0x518   : > { %v4545_v23 = vadd.f32 %v4515_v32, %v4455_v16 }
 0x519   : > { %v4591_v47 = vsel %vm4562_vm13, %v4546_v17, 0.0  ;;  %v4457_v34 = vmul.f32 %v4427_v37, %v4427_v37 }
 0x51a   : > { %v4589_v41 = vsel %vm1656_vm2, %v4545_v23, 0.0 }
 0x51b   : > { %v4590_v6 = vadd.f32 %v4589_v41, %v4588_v14  ;;  %v4458_v14 = vmul.f32 %v4428_v31, %v4428_v31 }
 0x51d   : > { %v4592_v12 = vadd.f32 %v4591_v47, %v4590_v6 }
 0x532   : > { %v8287_v39 = vpop.f32.mrb[18].mxu1 }
 0x533   : > { %v4364_v10 = vrot.slane %v8287_v39, 1  ;;  %v4488_v5 = vsub.f32 %v8272_v59, %v8287_v39  ;;  %v8292_v26 = vpop.f32.mrb[19].mxu1 }
 0x534   : > { %v4363_v61 = vrot.slane %v8292_v26, 1  ;;  %v4487_v40 = vsub.f32 %v8277_v49, %v8292_v26 }
 0x535   : > { %v4518_v60 = vmul.f32 %v4488_v5, %v4488_v5  ;;  %v4430_v24 = vsub.f32 %v8287_v39, %v4364_v10 }
 0x536   : > { %v4365_v63 = vsel %vm4335_vm9, %v4363_v61, %v4364_v10  ;;  %v4517_v8 = vmul.f32 %v4487_v40, %v4487_v40 }
 0x537   : > { %v4548_v15 = vadd.f32 %v4518_v60, %v4458_v14  ;;  %v4429_v53 = vsub.f32 %v8292_v26, %v4365_v63  ;;  %v4460_v16 = vmul.f32 %v4430_v24, %v4430_v24 }
 0x538   : > { %v4547_v9 = vadd.f32 %v4517_v8, %v4457_v34 }
 0x539   : > { %v4595_v62 = vsel %vm4562_vm13, %v4548_v15, 0.0  ;;  %v4459_v32 = vmul.f32 %v4429_v53, %v4429_v53 }
 0x53a   : > { %v4593_v0 = vsel %vm1656_vm2, %v4547_v9, 0.0 }
 0x53b   : > { %v4594_v28 = vadd.f32 %v4593_v0, %v4592_v12 }
 0x53d   : > { %v4596_v36 = vadd.f32 %v4595_v62, %v4594_v28 }
 0x552   : > { %v8305_v46 = vpop.f32.mrb[20].mxu1 }
 0x553   : > { %v4367_v22 = vrot.slane %v8305_v46, 1  ;;  %v4490_v1 = vsub.f32 %v8287_v39, %v8305_v46  ;;  %v8310_v30 = vpop.f32.mrb[21].mxu1 }
 0x554   : > { %v4366_v13 = vrot.slane %v8310_v30, 1  ;;  %v4489_v48 = vsub.f32 %v8292_v26, %v8310_v30 }
 0x555   : > { %v4520_v38 = vmul.f32 %v4490_v1, %v4490_v1  ;;  %v4432_v5 = vsub.f32 %v8305_v46, %v4367_v22 }
 0x556   : > { %v4368_v17 = vsel %vm4335_vm9, %v4366_v13, %v4367_v22  ;;  %v4519_v37 = vmul.f32 %v4489_v48, %v4489_v48 }
 0x557   : > { %v4550_v23 = vadd.f32 %v4520_v38, %v4460_v16  ;;  %v4431_v41 = vsub.f32 %v8310_v30, %v4368_v17  ;;  %v4462_v8 = vmul.f32 %v4432_v5, %v4432_v5 }
 0x558   : > { %v4549_v6 = vadd.f32 %v4519_v37, %v4459_v32 }
 0x559   : > { %v4599_v31 = vsel %vm4562_vm13, %v4550_v23, 0.0  ;;  %v4461_v53 = vmul.f32 %v4431_v41, %v4431_v41 }
 0x55a   : > { %v4597_v47 = vsel %vm1656_vm2, %v4549_v6, 0.0 }
 0x55b   : > { %v4598_v12 = vadd.f32 %v4597_v47, %v4596_v36  ;;  %v8674_v36 = vmov 0.0  }
 0x55c   : > { %5552 = vmatprep.mubr.msk.f32.mxu0 %vm5641_vm6, %v8674_v36 }
 0x55d   : > { %v4600_v10 = vadd.f32 %v4599_v31, %v4598_v12 }
 0x572   : > { %v8320_v61 = vpop.f32.mrb[22].mxu1 }
 0x573   : > { %v4370_v40 = vrot.slane %v8320_v61, 1  ;;  %v4492_v14 = vsub.f32 %v8305_v46, %v8320_v61  ;;  %v8325_v60 = vpop.f32.mrb[23].mxu1 }
 0x574   : > { %v4369_v34 = vrot.slane %v8325_v60, 1  ;;  %v4491_v63 = vsub.f32 %v8310_v30, %v8325_v60 }
 0x575   : > { %v4522_v15 = vmul.f32 %v4492_v14, %v4492_v14  ;;  %v4434_v48 = vsub.f32 %v8320_v61, %v4370_v40 }
 0x576   : > { %v4371_v9 = vsel %vm4335_vm9, %v4369_v34, %v4370_v40  ;;  %v4521_v0 = vmul.f32 %v4491_v63, %v4491_v63 }
 0x577   : > { %v4552_v42 = vadd.f32 %v4522_v15, %v4462_v8  ;;  %v4433_v28 = vsub.f32 %v8325_v60, %v4371_v9  ;;  %v4464_v41 = vmul.f32 %v4434_v48, %v4434_v48 }
 0x578   : > { %v4551_v62 = vadd.f32 %v4521_v0, %v4461_v53 }
 0x579   : > { %v4603_v1 = vsel %vm4562_vm13, %v4552_v42, 0.0  ;;  %v4463_v47 = vmul.f32 %v4433_v28, %v4433_v28 }
 0x57a   : > { %v4601_v24 = vsel %vm1656_vm2, %v4551_v62, 0.0 }
 0x57b   : > { %v4602_v22 = vadd.f32 %v4601_v24, %v4600_v10 }
 0x57d   : > { %v4604_v13 = vadd.f32 %v4603_v1, %v4602_v22 }
 0x592   : > { %v8337_v16 = vpop.f32.mrb[24].mxu1 }
 0x593   : > { %v4373_v38 = vrot.slane %v8337_v16, 1  ;;  %v4494_v32 = vsub.f32 %v8320_v61, %v8337_v16  ;;  %v8342_v17 = vpop.f32.mrb[25].mxu1 }
 0x594   : > { %v4372_v37 = vrot.slane %v8342_v17, 1  ;;  %v4493_v23 = vsub.f32 %v8325_v60, %v8342_v17 }
 0x595   : > { %v4524_v6 = vmul.f32 %v4494_v32, %v4494_v32  ;;  %v4436_v15 = vsub.f32 %v8337_v16, %v4373_v38 }
 0x596   : > { %v4374_v12 = vsel %vm4335_vm9, %v4372_v37, %v4373_v38  ;;  %v4523_v31 = vmul.f32 %v4493_v23, %v4493_v23 }
 0x597   : > { %v4554_v10 = vadd.f32 %v4524_v6, %v4464_v41  ;;  %v4435_v5 = vsub.f32 %v8342_v17, %v4374_v12  ;;  %v4466_v24 = vmul.f32 %v4436_v15, %v4436_v15 }
 0x598   : > { %v4553_v40 = vadd.f32 %v4523_v31, %v4463_v47 }
 0x599   : > { %v4607_v63 = vsel %vm4562_vm13, %v4554_v10, 0.0  ;;  %v4465_v1 = vmul.f32 %v4435_v5, %v4435_v5 }
 0x59a   : > { %v4605_v14 = vsel %vm1656_vm2, %v4553_v40, 0.0 }
 0x59b   : > { %v4606_v34 = vadd.f32 %v4605_v14, %v4604_v13 }
 0x59d   : > { %v4608_v8 = vadd.f32 %v4607_v63, %v4606_v34 }
 0x5b2   : > { %v8352_v53 = vpop.f32.mrb[26].mxu1 }
 0x5b3   : > { %v4376_v9 = vrot.slane %v8352_v53, 1  ;;  %v4496_v0 = vsub.f32 %v8337_v16, %v8352_v53  ;;  %v8357_v42 = vpop.f32.mrb[27].mxu1 }
 0x5b4   : > { %v4375_v28 = vrot.slane %v8357_v42, 1  ;;  %v4495_v62 = vsub.f32 %v8342_v17, %v8357_v42 }
 0x5b5   : > { %v4526_v22 = vmul.f32 %v4496_v0, %v4496_v0  ;;  %v4438_v12 = vsub.f32 %v8352_v53, %v4376_v9 }
 0x5b6   : > { %v4377_v13 = vsel %vm4335_vm9, %v4375_v28, %v4376_v9  ;;  %v4525_v48 = vmul.f32 %v4495_v62, %v4495_v62 }
 0x5b7   : > { %v4556_v38 = vadd.f32 %v4526_v22, %v4466_v24  ;;  %v4437_v32 = vsub.f32 %v8357_v42, %v4377_v13  ;;  %v4468_v63 = vmul.f32 %v4438_v12, %v4438_v12 }
 0x5b8   : > { %v4555_v37 = vadd.f32 %v4525_v48, %v4465_v1 }
 0x5b9   : > { %v4611_v6 = vsel %vm4562_vm13, %v4556_v38, 0.0  ;;  %v4467_v15 = vmul.f32 %v4437_v32, %v4437_v32 }
 0x5ba   : > { %v4609_v23 = vsel %vm1656_vm2, %v4555_v37, 0.0 }
 0x5bb   : > { %v4610_v41 = vadd.f32 %v4609_v23, %v4608_v8 }
 0x5bd   : > { %v4612_v47 = vadd.f32 %v4611_v6, %v4610_v41 }
 0x5d1   : > { %v8367_v31 = vpop.f32.mrb[28].mxu1 }
 0x5d2   : > { %v4379_v10 = vrot.slane %v8367_v31, 1  ;;  %v4498_v5 = vsub.f32 %v8352_v53, %v8367_v31  ;;  %v8372_v40 = vpop.f32.mrb[29].mxu1 }
 0x5d3   : > { %v4378_v14 = vrot.slane %v8372_v40, 1  ;;  %v4497_v34 = vsub.f32 %v8357_v42, %v8372_v40 }
 0x5d4   : > { %v4528_v8 = vmul.f32 %v4498_v5, %v4498_v5  ;;  %v4440_v38 = vsub.f32 %v8367_v31, %v4379_v10 }
 0x5d5   : > { %v4527_v0 = vmul.f32 %v4497_v34, %v4497_v34  ;;  %v4380_v9 = vsel %vm4335_vm9, %v4378_v14, %v4379_v10 }
 0x5d6   : > { %v4439_v28 = vsub.f32 %v8372_v40, %v4380_v9  ;;  %v4558_v62 = vadd.f32 %v4528_v8, %v4468_v63  ;;  %v4470_v6 = vmul.f32 %v4440_v38, %v4440_v38  ;;  %v5642_v38 = vmov 0.0|0.0  }
 0x5d7   : > { %v4557_v24 = vadd.f32 %v4527_v0, %v4467_v15  ;;  %5586 = vmatprep.subr.bf16.mxu0 %v5642_v38 }
 0x5d8   : > { %v4615_v13 = vsel %vm4562_vm13, %v4558_v62, 0.0  ;;  %v4469_v5 = vmul.f32 %v4439_v28, %v4439_v28  ;;  %v4704_v28 = vld [vmem:[%s8590_s5] sm:$0xff] }
 0x5d9   : > { %v4613_v22 = vsel %vm1656_vm2, %v4557_v24, 0.0 }
 0x5da   : > { %v4614_v1 = vadd.f32 %v4613_v22, %v4612_v47 }
 0x5dc   : > { %v4616_v48 = vadd.f32 %v4615_v13, %v4614_v1 }
 0x5de   : > { %v8382_v37 = vpop.f32.mrb[30].mxu1 }
 0x5df   : > { %v4500_v32 = vsub.f32 %v8367_v31, %v8382_v37  ;;  %v8386_v23 = vpop.f32.mrb[31].mxu1 }
 0x5e0   : > { %v4499_v41 = vsub.f32 %v8372_v40, %v8386_v23 }
 0x5e1   : > { %v4530_v12 = vmul.f32 %v4500_v32, %v4500_v32 }
 0x5e2   : > { %v4529_v14 = vmul.f32 %v4499_v41, %v4499_v41  ;;  %v4629_v41 = vld [vmem:[%s8589_s4] sm:$0x1] }
 0x5e3   : > { %v4560_v47 = vadd.f32 %v4530_v12, %v4470_v6 }
 0x5e4   : > { %v4559_v34 = vadd.f32 %v4529_v14, %v4469_v5  ;;  %v4706_v14 = vld [vmem:[%s8591_s6] sm:$0x1] }
 0x5e5   : > { %v4619_v10 = vsel %vm4562_vm13, %v4560_v47, 0.0 }
 0x5e6   : > { %v4617_v63 = vsel %vm1656_vm2, %v4559_v34, 0.0 }
 0x5e7   : > { %v4618_v8 = vadd.f32 %v4617_v63, %v4616_v48  ;;  %v4705_v48 = vld [vmem:[%s8590_s5 + $0x8] sm:$0xff] }
 0x5e8   : > { %v5587_v32 = vpack.c.bf16 %v4705_v48, %v4704_v28 }
 0x5e9   : > { %v4620_v15 = vadd.f32 %v4619_v10, %v4618_v8 }
 0x5eb   : > { %v4621_v0 = vrot.slane %v4620_v15, 4 }
 0x5ed   : > { %v4622_v9 = vadd.f32 %v4621_v0, %v4620_v15  ;;  %v4786_v0 = vlaneseq }
 0x5ef   : > { %v4623_v62 = vrot.slane %v4622_v9, 2 }
 0x5f1   : > { %v4624_v24 = vadd.f32 %v4623_v62, %v4622_v9  ;;  %v4787_v9 = vshrl.u32 %v4786_v0, 7 }
 0x5f3   : > { %v4625_v22 = vrot.slane %v4624_v24, 1  ;;  %v4788_v62 = vsub.s32 0, %v4787_v9  ;;  %v8679_v9 = vld [vmem:[#allocation19_spill] sm:$0xff] }
 0x5f5   : > { %v4626_v1 = vadd.f32 %v4625_v22, %v4624_v24 }
 0x5f7   : > { %v4627_v13 = vmul.f32 0.0044444446, %v4626_v1 }
 0x5f9   : > { %5553 = vmatmul.mubr.msk.f32.vlgmr.msra.gmra.mrb[32].mxu0 %vm1656_vm2, %v4627_v13 }
 0x5fa   : > { %5559 = vmatprep.mubr.msk.f32.mxu0 %vm5641_vm6, %v8674_v36  ;;  %5588 = vmatpush3.bf16.msra.mxu0 %v5587_v32 }
 0x6cc   : > { %v4699_v6 = vpop.f32.mrb[32].mxu0 }
 0x6cd   : > { %v4700_v12 = vadd.f32 %v4699_v6, %v4629_v41  ;;  %v5554_v5 = vpop.f32.mrb[33].mxu0 }
 0x6cf   : > { %v4703_v36 = vmax.f32 %v4700_v12, 0.0 }
 0x6d1   : > { %5560 = vmatmul.mubr.msk.f32.vlgmr.msra.gmra.mrb[34].mxu0 %vm1722_vm4, %v4703_v36 }
 0x7a4   : > { %v4776_v47 = vpop.f32.mrb[34].mxu0 }
 0x7a5   : > { %v4777_v34 = vadd.f32 %v4776_v47, %v4706_v14  ;;  %v5561_v63 = vpop.f32.mrb[35].mxu0  ;;  %v8676_v47 = vld [vmem:[#allocation6_spill] sm:$0xff] }
 0x7a7   : > { %v5339_v8 = vmul.f32 -1.442695, %v4777_v34 }
 0x7a9   : > { %5615 = vpow2.f32 %v5339_v8  ;;  %v8677_v8 = vld [vmem:[#allocation17_spill] sm:$0xff] }
 0x7b3   : > { %v5616_v10 = vpop.eup %5615 }
 0x7b4   : > { %v4783_v15 = vadd.f32 1.0, %v5616_v10 }
 0x7b6   : > { %5617 = vrcp.f32 %v4783_v15  ;;  %v8678_v15 = vld [vmem:[#allocation5_spill] sm:$0xff] }
 0x7c0   : > { %v5618_v24 = vpop.eup %5617 }
 0x7c1   : > { %v8408_v22 = vrot.slane %v5618_v24, %v4788_v62  ;;  %v8680_v62 = vld [vmem:[#allocation18_spill] sm:$0xff] }
 0x7c3   : > { %v4790_v1 = vmul.f32 %v8408_v22, %v7726_v11  ;;  %v4791_v13 = vmul.f32 %v7722_v43, %v8408_v22  ;;  %v4792_v28 = vmul.f32 %v8408_v22, %v7807_v57  ;;  %v4793_v48 = vmul.f32 %v7800_v19, %v8408_v22 }
 0x7c4   : > { %v4794_v38 = vmul.f32 %v8408_v22, %v7900_v58  ;;  %v4795_v32 = vmul.f32 %v7893_v20, %v8408_v22  ;;  %v4796_v41 = vmul.f32 %v8408_v22, %v7994_v25  ;;  %v4797_v11 = vmul.f32 %v7987_v50, %v8408_v22 }
 0x7c5   : > { %v8428_v43 = vmul.f32 %v8408_v22, %v8080_v2  ;;  %v8432_v57 = vmul.f32 %v8073_v29, %v8408_v22  ;;  %v8436_v19 = vmul.f32 %v8408_v22, %v8136_v45  ;;  %v8440_v20 = vmul.f32 %v8130_v54, %v8408_v22 }
 0x7c6   : > { %v8444_v58 = vmul.f32 %v8408_v22, %v8183_v35  ;;  %v8448_v50 = vmul.f32 %v8177_v27, %v8408_v22  ;;  %v8452_v25 = vmul.f32 %v8408_v22, %v8224_v18  ;;  %v8456_v29 = vmul.f32 %v8218_v52, %v8408_v22 }
 0x7c7   : > { %v4820_v2 = vmul.f32 %v8408_v22, %v8386_v23  ;;  %v4821_v54 = vmul.f32 %v8382_v37, %v8408_v22  ;;  %v4822_v45 = vadd.f32 %v4790_v1, %v6378_v7  ;;  %v4823_v35 = vadd.f32 %v6372_v44, %v4791_v13 }
 0x7c8   : > { %v4806_v27 = vmul.f32 %v8408_v22, %v8277_v49  ;;  %v4807_v18 = vmul.f32 %v8272_v59, %v8408_v22  ;;  %v4808_v52 = vmul.f32 %v8408_v22, %v8292_v26  ;;  %v4824_v6 = vadd.f32 %v4792_v28, %v6453_v56 }
 0x7c9   : > { %v8472_v23 = vadd.f32 %v4820_v2, %v7368_v3  ;;  %v8475_v37 = vadd.f32 %v7361_v55, %v4821_v54  ;;  %vm4854_vm2 = vcmp.gt.f32.partialorder %v4822_v45, 0.0  ;;  %v4886_v44 = vmul.f32 %v4822_v45, %v6907_v21  ;;  %v8682_v2 = vld [vmem:[#allocation7_spill] sm:$0xff] }
 0x7ca   : > { %v4838_v7 = vadd.f32 %v4806_v27, %v6892_v4  ;;  %v4839_v49 = vadd.f32 %v6890_v33, %v4807_v18  ;;  %v4887_v59 = vmul.f32 %v4823_v35, %v6907_v21  ;;  %v4840_v26 = vadd.f32 %v4808_v52, %v7039_v51  ;;  %v8675_v33 = vld [vmem:[#allocation4_spill] sm:$0xff]  ;;  %v8683_v27 = vld [vmem:[#allocation21_spill] sm:$0xff] }
 0x7cb   : > { %v4918_v12 = vsel %vm4854_vm2, %v4822_v45, %v4886_v44  ;;  %vm4855_vm12 = vcmp.gt.f32.partialorder %v4823_v35, 0.0  ;;  %v4888_v55 = vmul.f32 %v4824_v6, %v6907_v21  ;;  %v4809_v4 = vmul.f32 %v8287_v39, %v8408_v22  ;;  %v8684_v44 = vld [vmem:[#allocation20_spill] sm:$0xff] }
 0x7cc   : > { %vm4870_vm4 = vcmp.gt.f32.partialorder %v4838_v7, 0.0  ;;  %v4902_v56 = vmul.f32 %v4838_v7, %v6907_v21  ;;  %4950 = vxpose.xlu0.b32.start [1/16] (narrow) %v4918_v12, 8  ;;  %vm4871_vm8 = vcmp.gt.f32.partialorder %v4839_v49, 0.0  ;;  %v4903_v5 = vmul.f32 %v4839_v49, %v6907_v21 }
 0x7cd   : > { %v4825_v36 = vadd.f32 %v8675_v33, %v4793_v48  ;;  %v4919_v14 = vsel %vm4855_vm12, %v4823_v35, %v4887_v59  ;;  %v4810_v51 = vmul.f32 %v8408_v22, %v8310_v30  ;;  %v4826_v34 = vadd.f32 %v4794_v38, %v8676_v47  ;;  %v8681_v48 = vld [vmem:[#allocation8_spill] sm:$0xff] }
 0x7ce   : > { %v4934_v3 = vsel %vm4870_vm4, %v4838_v7, %v4902_v56  ;;  %v4811_v63 = vmul.f32 %v8305_v46, %v8408_v22  ;;  %vm4856_vm0 = vcmp.gt.f32.partialorder %v4824_v6, 0.0  ;;  %v4841_v10 = vadd.f32 %v8677_v8, %v4809_v4 }
 0x7cf   : > { %4982 = vxpose.xlu1.b32.start [1/16] (narrow) %v4934_v3, 8  ;;  %v4827_v0 = vadd.f32 %v8678_v15, %v4795_v32  ;;  %v4842_v39 = vadd.f32 %v4810_v51, %v8679_v9  ;;  %v4935_v1 = vsel %vm4871_vm8, %v4839_v49, %v4903_v5  ;;  %v4904_v13 = vmul.f32 %v4840_v26, %v6907_v21  ;;  %v8693_v9 = vld [vmem:[#allocation14_spill] sm:$0xff] }
 0x7d0   : > { %4951 = vxpose.xlu0.b32.cont [2/16] (narrow) %v4919_v14, 8  ;;  %v4843_v24 = vadd.f32 %v8680_v62, %v4811_v63  ;;  %vm4872_vm1 = vcmp.gt.f32.partialorder %v4840_v26, 0.0  ;;  %v4920_v30 = vsel %vm4856_vm0, %v4824_v6, %v4888_v55  ;;  %v4889_v28 = vmul.f32 %v4825_v36, %v6907_v21  ;;  %v8687_v55 = vld [vmem:[#allocation9_spill] sm:$0xff] }
 0x7d1   : > { %vm4857_vm3 = vcmp.gt.f32.partialorder %v4825_v36, 0.0  ;;  %v4812_v46 = vmul.f32 %v8408_v22, %v8325_v60  ;;  %v4828_v38 = vadd.f32 %v4796_v41, %v8681_v48  ;;  %v4813_v32 = vmul.f32 %v8320_v61, %v8408_v22  ;;  %v8685_v61 = vld [vmem:[#allocation23_spill] sm:$0xff] }
 0x7d2   : > { %v4829_v54 = vadd.f32 %v8682_v2, %v4797_v11  ;;  %v4936_v45 = vsel %vm4872_vm1, %v4840_v26, %v4904_v13  ;;  %v4905_v35 = vmul.f32 %v4841_v10, %v6907_v21  ;;  %v4814_v52 = vmul.f32 %v8408_v22, %v8342_v17  ;;  %v8686_v11 = vld [vmem:[#allocation10_spill] sm:$0xff]  ;;  %v8694_v13 = vld [vmem:[#allocation13_spill] sm:$0xff] }
 0x7d3   : > { %4983 = vxpose.xlu1.b32.cont [2/16] (narrow) %v4935_v1, 8  ;;  %v4844_v18 = vadd.f32 %v4812_v46, %v8683_v27  ;;  %vm4873_vm9 = vcmp.gt.f32.partialorder %v4841_v10, 0.0  ;;  %v4921_v6 = vsel %vm4857_vm3, %v4825_v36, %v4889_v28  ;;  %v4890_v60 = vmul.f32 %v4826_v34, %v6907_v21  ;;  %v8689_v36 = vld [vmem:[#allocation22_spill] sm:$0xff] }
 0x7d4   : > { %4952 = vxpose.xlu0.b32.cont [3/16] (narrow) %v4920_v30, 8  ;;  %v4845_v41 = vadd.f32 %v8684_v44, %v4813_v32  ;;  %vm4858_vm13 = vcmp.gt.f32.partialorder %v4826_v34, 0.0  ;;  %v4846_v7 = vadd.f32 %v4814_v52, %v8685_v61  ;;  %v4830_v49 = vadd.f32 %v8428_v43, %v8686_v11  ;;  %v8688_v43 = vld [vmem:[#allocation12_spill] sm:$0xff]  ;;  %v8696_v46 = vld [vmem:[#allocation26_spill] sm:$0xff] }
 0x7d5   : > { %v4937_v12 = vsel %vm4873_vm9, %v4841_v10, %v4905_v35  ;;  %v4906_v59 = vmul.f32 %v4842_v39, %v6907_v21  ;;  %vm4874_vm7 = vcmp.gt.f32.partialorder %v4842_v39, 0.0  ;;  %v4922_v17 = vsel %vm4858_vm13, %v4826_v34, %v4890_v60 }
 0x7d6   : > { %v4891_v26 = vmul.f32 %v4827_v0, %v6907_v21  ;;  %v4815_v56 = vmul.f32 %v8337_v16, %v8408_v22  ;;  %vm4859_vm10 = vcmp.gt.f32.partialorder %v4827_v0, 0.0  ;;  %v4831_v3 = vadd.f32 %v8687_v55, %v8432_v57  ;;  %v8690_v16 = vld [vmem:[#allocation11_spill] sm:$0xff]  ;;  %v8691_v57 = vld [vmem:[#allocation25_spill] sm:$0xff] }
 0x7d7   : > { %4984 = vxpose.xlu1.b32.cont [3/16] (narrow) %v4936_v45, 8  ;;  %v4816_v5 = vmul.f32 %v8408_v22, %v8357_v42  ;;  %v4832_v4 = vadd.f32 %v8436_v19, %v8688_v43  ;;  %v4907_v33 = vmul.f32 %v4843_v24, %v6907_v21  ;;  %v4817_v51 = vmul.f32 %v8352_v53, %v8408_v22  ;;  %v8692_v19 = vld [vmem:[#allocation24_spill] sm:$0xff] }
 0x7d8   : > { %4953 = vxpose.xlu0.b32.cont [4/16] (narrow) %v4921_v6, 8  ;;  %v4847_v14 = vadd.f32 %v8689_v36, %v4815_v56  ;;  %v8531_v47 = vadd.f32 %v8690_v16, %v8440_v20  ;;  %v4938_v34 = vsel %vm4874_vm7, %v4842_v39, %v4906_v59  ;;  %vm4875_vm11 = vcmp.gt.f32.partialorder %v4843_v24, 0.0 }
 0x7d9   : > { %v4848_v63 = vadd.f32 %v4816_v5, %v8691_v57  ;;  %v4923_v42 = vsel %vm4859_vm10, %v4827_v0, %v4891_v26  ;;  %v4892_v8 = vmul.f32 %v4828_v38, %v6907_v21  ;;  %v4849_v10 = vadd.f32 %v8692_v19, %v4817_v51 }
 0x7da   : > { %vm4860_vm14 = vcmp.gt.f32.partialorder %v4828_v38, 0.0  ;;  %v4939_v15 = vsel %vm4875_vm11, %v4843_v24, %v4907_v33  ;;  %vm4876_vm15 = vcmp.gt.f32.partialorder %v4844_v18, 0.0  ;;  %v4908_v53 = vmul.f32 %v4844_v18, %v6907_v21  ;;  %v8695_v24 = vld [vmem:[#allocation27_spill] sm:$0xff] }
 0x7db   : > { %4985 = vxpose.xlu1.b32.cont [4/16] (narrow) %v4937_v12, 8  ;;  %v4818_v20 = vmul.f32 %v8408_v22, %v8372_v40  ;;  %v4834_v39 = vadd.f32 %v8444_v58, %v8693_v9  ;;  %v4924_v62 = vsel %vm4860_vm14, %v4828_v38, %v4892_v8  ;;  %v4893_v0 = vmul.f32 %v4829_v54, %v6907_v21  ;;  %v8697_v58 = vld [vmem:[#allocation16_spill] sm:$0xff] }
 0x7dc   : > { %4954 = vxpose.xlu0.b32.cont [5/16] (narrow) %v4922_v17, 8  ;;  %v4819_v1 = vmul.f32 %v8367_v31, %v8408_v22  ;;  %v4835_v30 = vadd.f32 %v8694_v13, %v8448_v50  ;;  %vm4861_vm5 = vcmp.gt.f32.partialorder %v4829_v54, 0.0  ;;  %v4940_v40 = vsel %vm4876_vm15, %v4844_v18, %v4908_v53  ;;  %v8698_v22 = vld [vmem:[#allocation15_spill] sm:$0xff] }
 0x7dd   : > { %v4850_v28 = vadd.f32 %v4818_v20, %v8695_v24  ;;  %v4909_v32 = vmul.f32 %v4845_v41, %v6907_v21  ;;  %v4836_v38 = vadd.f32 %v8452_v25, %v8697_v58  ;;  %vm4877_vm6 = vcmp.gt.f32.partialorder %v4845_v41, 0.0 }
 0x7de   : > { %v4851_v48 = vadd.f32 %v8696_v46, %v4819_v1  ;;  %v4925_v2 = vsel %vm4861_vm5, %v4829_v54, %v4893_v0  ;;  %v4894_v31 = vmul.f32 %v4830_v49, %v6907_v21  ;;  %vm4862_vm2 = vcmp.gt.f32.partialorder %v4830_v49, 0.0 }
 0x7df   : > { %4986 = vxpose.xlu1.b32.cont [5/16] (narrow) %v4938_v34, 8  ;;  %v4837_v50 = vadd.f32 %v8698_v22, %v8456_v29  ;;  %v4941_v45 = vsel %vm4877_vm6, %v4845_v41, %v4909_v32  ;;  %v4910_v35 = vmul.f32 %v4846_v7, %v6907_v21  ;;  %vm4878_vm4 = vcmp.gt.f32.partialorder %v4846_v7, 0.0 }
 0x7e0   : > { %4955 = vxpose.xlu0.b32.cont [6/16] (narrow) %v4923_v42, 8  ;;  %v4926_v27 = vsel %vm4862_vm2, %v4830_v49, %v4894_v31  ;;  %v4895_v18 = vmul.f32 %v4831_v3, %v6907_v21  ;;  %vm4863_vm12 = vcmp.gt.f32.partialorder %v4831_v3, 0.0  ;;  %v4911_v54 = vmul.f32 %v4847_v14, %v6907_v21 }
 0x7e1   : > { %v4942_v25 = vsel %vm4878_vm4, %v4846_v7, %v4910_v35  ;;  %vm4879_vm8 = vcmp.gt.f32.partialorder %v4847_v14, 0.0  ;;  %v4896_v6 = vmul.f32 %v4832_v4, %v6907_v21  ;;  %vm4864_vm0 = vcmp.gt.f32.partialorder %v4832_v4, 0.0 }
 0x7e2   : > { %v4927_v52 = vsel %vm4863_vm12, %v4831_v3, %v4895_v18  ;;  %v4943_v29 = vsel %vm4879_vm8, %v4847_v14, %v4911_v54  ;;  %v4912_v60 = vmul.f32 %v4848_v63, %v6907_v21  ;;  %vm4880_vm1 = vcmp.gt.f32.partialorder %v4848_v63, 0.0 }
 0x7e3   : > { %4987 = vxpose.xlu1.b32.cont [6/16] (narrow) %v4939_v15, 8  ;;  %v4928_v44 = vsel %vm4864_vm0, %v4832_v4, %v4896_v6  ;;  %v4897_v41 = vmul.f32 %v8531_v47, %v6907_v21  ;;  %vm4865_vm3 = vcmp.gt.f32.partialorder %v8531_v47, 0.0  ;;  %v4913_v7 = vmul.f32 %v4849_v10, %v6907_v21 }
 0x7e4   : > { %4956 = vxpose.xlu0.b32.cont [7/16] (narrow) %v4924_v62, 8  ;;  %v4944_v61 = vsel %vm4880_vm1, %v4848_v63, %v4912_v60  ;;  %vm4881_vm9 = vcmp.gt.f32.partialorder %v4849_v10, 0.0  ;;  %v4898_v49 = vmul.f32 %v4834_v39, %v6907_v21  ;;  %vm4866_vm13 = vcmp.gt.f32.partialorder %v4834_v39, 0.0 }
 0x7e5   : > { %v4929_v11 = vsel %vm4865_vm3, %v8531_v47, %v4897_v41  ;;  %v4945_v12 = vsel %vm4881_vm9, %v4849_v10, %v4913_v7  ;;  %v4914_v59 = vmul.f32 %v4850_v28, %v6907_v21  ;;  %vm4882_vm7 = vcmp.gt.f32.partialorder %v4850_v28, 0.0 }
 0x7e6   : > { %v4930_v17 = vsel %vm4866_vm13, %v4834_v39, %v4898_v49  ;;  %v4899_v26 = vmul.f32 %v4835_v30, %v6907_v21  ;;  %vm4867_vm10 = vcmp.gt.f32.partialorder %v4835_v30, 0.0  ;;  %v4915_v55 = vmul.f32 %v4851_v48, %v6907_v21 }
 0x7e7   : > { %4988 = vxpose.xlu1.b32.cont [7/16] (narrow) %v4940_v40, 8  ;;  %v4946_v56 = vsel %vm4882_vm7, %v4850_v28, %v4914_v59  ;;  %vm4883_vm11 = vcmp.gt.f32.partialorder %v4851_v48, 0.0  ;;  %v4900_v5 = vmul.f32 %v4836_v38, %v6907_v21  ;;  %vm4868_vm14 = vcmp.gt.f32.partialorder %v4836_v38, 0.0 }
 0x7e8   : > { %4957 = vxpose.xlu0.b32.cont [8/16] (narrow) %v4925_v2, 8  ;;  %v4931_v3 = vsel %vm4867_vm10, %v4835_v30, %v4899_v26  ;;  %v4947_v43 = vsel %vm4883_vm11, %v4851_v48, %v4915_v55  ;;  %v4916_v4 = vmul.f32 %v8472_v23, %v6907_v21  ;;  %vm4884_vm15 = vcmp.gt.f32.partialorder %v8472_v23, 0.0 }
 0x7e9   : > { %v4932_v33 = vsel %vm4868_vm14, %v4836_v38, %v4900_v5  ;;  %v4901_v36 = vmul.f32 %v4837_v50, %v6907_v21  ;;  %vm4869_vm5 = vcmp.gt.f32.partialorder %v4837_v50, 0.0  ;;  %v4917_v51 = vmul.f32 %v8475_v37, %v6907_v21 }
 0x7ea   : > { %v4948_v14 = vsel %vm4884_vm15, %v8472_v23, %v4916_v4  ;;  %vm4885_vm6 = vcmp.gt.f32.partialorder %v8475_v37, 0.0 }
 0x7eb   : > { %4989 = vxpose.xlu1.b32.cont [8/16] (narrow) %v4941_v45, 8  ;;  %v4933_v16 = vsel %vm4869_vm5, %v4837_v50, %v4901_v36  ;;  %v4949_v47 = vsel %vm4885_vm6, %v8475_v37, %v4917_v51 }
 0x7ec   : > { %4958 = vxpose.xlu0.b32.cont [9/16] (narrow) %v4926_v27, 8 }
 0x7ef   : > { %4990 = vxpose.xlu1.b32.cont [9/16] (narrow) %v4942_v25, 8 }
 0x7f0   : > { %4959 = vxpose.xlu0.b32.cont [10/16] (narrow) %v4927_v52, 8 }
 0x7f3   : > { %4991 = vxpose.xlu1.b32.cont [10/16] (narrow) %v4943_v29, 8 }
 0x7f4   : > { %4960 = vxpose.xlu0.b32.cont [11/16] (narrow) %v4928_v44, 8 }
 0x7f7   : > { %4992 = vxpose.xlu1.b32.cont [11/16] (narrow) %v4944_v61, 8 }
 0x7f8   : > { %4961 = vxpose.xlu0.b32.cont [12/16] (narrow) %v4929_v11, 8 }
 0x7fb   : > { %4993 = vxpose.xlu1.b32.cont [12/16] (narrow) %v4945_v12, 8 }
 0x7fc   : > { %4962 = vxpose.xlu0.b32.cont [13/16] (narrow) %v4930_v17, 8 }
 0x7ff   : > { %4994 = vxpose.xlu1.b32.cont [13/16] (narrow) %v4946_v56, 8 }
 0x800   : > { %4963 = vxpose.xlu0.b32.cont [14/16] (narrow) %v4931_v3, 8 }
 0x803   : > { %4995 = vxpose.xlu1.b32.cont [14/16] (narrow) %v4947_v43, 8 }
 0x804   : > { %4964 = vxpose.xlu0.b32.cont [15/16] (narrow) %v4932_v33, 8 }
 0x807   : > { %4996 = vxpose.xlu1.b32.cont [15/16] (narrow) %v4948_v14, 8 }
 0x808   : > { %4965 = vxpose.xlu0.b32.end [16/16] (narrow) %v4933_v16, 8 }
 0x80b   : > { %4997 = vxpose.xlu1.b32.end [16/16] (narrow) %v4949_v47, 8 }
 0x84c   : > { %v4966_v34 = vpop.trf.xlu0 }
 0x84d   : > { %5014 = vst [vmem:[%s307_s26] sm:$0xff] %v4966_v34 }
 0x84f   : > { %v4998_v57 = vpop.trf.xlu1 }
 0x850   : > { %5015 = vst [vmem:[%s307_s26 + $0x8] sm:$0xff] %v4998_v57 }
 0x851 PF: > { %s20_s29 = sadd.s32 1, %s5625_s29  }
 0x852   : > { %p17_p4 = scmp.ge.s32.totalorder %s20_s29, 4  }
 0x854   :  { %19 = sbr.rel (!%p17_p4) target bundleno = 3 (0x3), region = 87 }

</bundles_post_ra>
